<compile_context>
chip_gen: v7x
topology: tpu7x:2x2x1
jax: 0.10.0
libtpu: 0.0.40
codegen_flags: <defaults>
</compile_context>

<pallas_src>
import functools

import numpy as np

import jax
import jax.numpy as jnp
from jax import lax
from jax.experimental import pallas as pl
from jax.experimental.pallas import tpu as pltpu

F_SIZE = (8, 8)      # args.final_feature_size
DELTA = 4.0          # regional_soft_argmax delta_treshold
KP = 80              # contraction depth for matmul #1: 64 positions + 1 bias row, padded to 80


# ----------------------------- fused Pallas kernel -----------------------------

def _vitap_head_kernel(x_ref, a1_ref, a23_ref, b2_ref, wl1_ref, bl1_ref,
                       wl2_ref, bl2_ref, out_ref, *, wf, s, h_scale, w_scale, delta):
    # x_ref:   (KP, T)    cost volumes, positions on sublanes (rows 0..63), row 64 == 1 (bias
    #                     driver), rows 65..KP-1 == 0; maps on the 128/256 lanes.  bf16.
    # a1_ref:  (1024, KP) conv1 (1->16, 3x3, p=1) + bias as structured-sparse matrix.  bf16.
    # a23_ref: (352, 1024) rows 0..287 = conv2 (q*32+o, stride-2, all 9 output positions),
    #                      rows 288..351 = conv3 heatmap.  bf16.
    t = x_ref.shape[1]

    # matmul #1 (MXU, bf16 operands, f32 accumulate): conv1 + bias (folded) for all 16 channels
    # and 64 positions, then ReLU.
    x1 = jnp.dot(a1_ref[...], x_ref[...], preferred_element_type=jnp.float32)   # (1024, T)
    x1 = jnp.maximum(x1, 0.0)

    # matmul #2: conv2 (all 9 output positions, 32 ch) and conv3 heatmap in one MXU pass.
    zh = jnp.dot(a23_ref[...], x1.astype(jnp.bfloat16),
                 preferred_element_type=jnp.float32)                            # (352, T)

    # ---- occlusion branch: ReLU, adaptive avg-pool (mean over 9 positions), occ MLP ----
    z = jnp.maximum(zh[0:288, :] + b2_ref[...], 0.0)       # (288, T) = (9 pos x 32 ch, T)
    pooled = z[0:32, :]
    for q in range(1, 9):                                   # static unroll, aligned 32-row slices
        pooled = pooled + z[32 * q:32 * (q + 1), :]
    # 1/9 pooling scale is pre-folded into wl1 in the wrapper.
    h1 = jnp.maximum(
        jnp.dot(wl1_ref[...], pooled, preferred_element_type=jnp.float32) + bl1_ref[...],
        0.0)                                                # (16, T)
    occ = jnp.sum(wl2_ref[...] * h1, axis=0, keepdims=True) + bl2_ref[...]      # (1, T)

    # ---- coordinate branch: conv3 heatmap -> simplified softmax + regional soft-argmax ----
    # (conv3 bias omitted: cancels in exp(heat - max) and in the windowed renormalization.)
    heat = zh[288:288 + s, :]                               # (64, T)
    mx = jnp.max(heat, axis=0, keepdims=True)               # (1, T)
    e = jnp.exp(heat - mx)                                  # unnormalized softmax weights

    posf = lax.broadcasted_iota(jnp.int32, (s, t), 0).astype(jnp.float32)
    yyf = jnp.floor(posf * (1.0 / wf))
    xxf = posf - wf * yyf

    # hard argmax over positions (first occurrence); argmax(softmax) == argmax(logits)
    amax = jnp.min(jnp.where(heat >= mx, posf, jnp.float32(s)), axis=0, keepdims=True)
    ay = jnp.floor(amax * (1.0 / wf))
    ax = amax - wf * ay

    # Chebyshev window around the argmax; the global softmax denominator cancels in the
    # windowed renormalization.  Padded lane columns (maps >= M) give constant heat -> the
    # window still contains >= 1 cell, so denom > 0 and no NaN/Inf ever leaks.
    win = (jnp.abs(yyf - ay) <= delta) & (jnp.abs(xxf - ax) <= delta)
    we = jnp.where(win, e, 0.0)
    denom = jnp.sum(we, axis=0, keepdims=True)
    rinv = pl.reciprocal(denom, approx=True)                # EUP; ~1e-3 rel. error, fine here
    ex = jnp.sum(we * xxf, axis=0, keepdims=True) * (rinv * w_scale)            # (1, T)
    ey = jnp.sum(we * yyf, axis=0, keepdims=True) * (rinv * h_scale)            # (1, T)

    # Pack the three 1-row results into one lane-dense 8-sublane block:
    #   row 0 = occ logit, row 1 = x * W/Wf, row 2 = y * H/Hf, rows 3..7 = 0 (padding).
    row = lax.broadcasted_iota(jnp.int32, (8, t), 0)
    packed = jnp.zeros((8, t), jnp.float32)
    packed = jnp.where(row == 2, ey, packed)
    packed = jnp.where(row == 1, ex, packed)
    packed = jnp.where(row == 0, occ, packed)
    out_ref[...] = packed                                   # single unmasked full-tile store


# ----------------------------- wrapper -----------------------------

def init_params(key):
    ks = jax.random.split(key, 10)
    p = {}
    p["w1"] = 0.3 * jax.random.normal(ks[0], (16, 1, 3, 3), jnp.float32)
    p["b1"] = 0.1 * jax.random.normal(ks[1], (16,), jnp.float32)
    p["w2"] = 0.1 * jax.random.normal(ks[2], (32, 16, 3, 3), jnp.float32)
    p["b2"] = 0.1 * jax.random.normal(ks[3], (32,), jnp.float32)
    p["w3"] = 0.2 * jax.random.normal(ks[4], (1, 16, 3, 3), jnp.float32)
    p["b3"] = 0.1 * jax.random.normal(ks[5], (1,), jnp.float32)
    p["wl1"] = 0.2 * jax.random.normal(ks[6], (16, 32), jnp.float32)   # Linear(32,16).weight
    p["bl1"] = 0.1 * jax.random.normal(ks[7], (16,), jnp.float32)
    p["wl2"] = 0.2 * jax.random.normal(ks[8], (1, 16), jnp.float32)    # Linear(16,1).weight
    p["bl2"] = 0.1 * jax.random.normal(ks[9], (1,), jnp.float32)
    return p


def _build_conv_matrices(params, Hf, Wf, kpad):
    """Fold conv1 (incl. bias), conv2 and conv3 (padding / stride / im2col) into dense matrices.

    Built once per parameter set in the wrapper; cast to bf16 for the MXU (f32 accumulate in
    the kernel keeps the reduction exact).
    """
    S = Hf * Wf
    yi, xi = np.divmod(np.arange(S), Wf)

    # stride-1 / pad-1 taps: tap1[p, p2] = 3*kh + kw if input p2 feeds output p, else masked
    dy = yi[None, :] - yi[:, None]
    dx = xi[None, :] - xi[:, None]
    valid1 = ((np.abs(dy) <= 1) & (np.abs(dx) <= 1)).astype(np.float32)
    tap1 = np.where(valid1 > 0, (dy + 1) * 3 + (dx + 1), 0)

    # conv1: A1[c*S+p, p2] = w1[c, kh, kw]; extra column kpad-region carries the bias (paired
    # with the constant-1 row appended to the x tile), remaining columns are zero padding.
    w1r = params["w1"].reshape(16, 9)
    A1 = (w1r[:, tap1] * valid1[None]).reshape(16 * S, S)
    b1col = jnp.repeat(params["b1"], S)[:, None]                       # (16*S, 1), row = c*S+p
    A1 = jnp.concatenate(
        [A1, b1col, jnp.zeros((16 * S, kpad - S - 1), jnp.float32)], axis=1)   # (16*S, kpad)

    # conv3: A3[p, c*S+p2] = w3[c, kh, kw]
    w3r = params["w3"].reshape(16, 9)
    A3 = jnp.transpose(w3r[:, tap1] * valid1[None], (1, 0, 2)).reshape(S, 16 * S)

    # conv2 (stride 2, no pad, 3x3 output): A2[q*32+o, c*S+p2] = w2[o, c, kh, kw]
    oy, ox = np.divmod(np.arange(9), 3)
    ky = yi[None, :] - 2 * oy[:, None]
    kx = xi[None, :] - 2 * ox[:, None]
    valid2 = ((ky >= 0) & (ky < 3) & (kx >= 0) & (kx < 3)).astype(np.float32)
    tap2 = np.where(valid2 > 0, ky * 3 + kx, 0)
    w2r = params["w2"].reshape(32, 16, 9)
    A2 = (w2r[:, :, tap2] * valid2[None, None])           # (o, c, q, p2)
    A2 = jnp.transpose(A2, (2, 0, 1, 3)).reshape(9 * 32, 16 * S)

    A23 = jnp.concatenate([A2, A3], axis=0)               # (352, 16*S)
    return A1.astype(jnp.bfloat16), A23.astype(jnp.bfloat16)


@functools.partial(jax.jit, static_argnums=(1, 2))
def vitap_head_forward(cost_volumes, H, W, params):
    B, T, N, Hf, Wf = cost_volumes.shape
    assert (Hf, Wf) == F_SIZE
    M = B * T * N
    S = Hf * Wf

    # 256 lanes fills the 256-wide MXU on v6e/v7x; fall back to 128 whenever 256 would collapse
    # the grid to one step, so the "parallel" map axis still feeds both v7x TensorCores.
    tile_m = 256 if (M + 255) // 256 >= 2 else 128
    Mp = ((M + tile_m - 1) // tile_m) * tile_m

    # Positions on sublanes, maps on lanes; bf16 cast fused into the transpose (single pass).
    # Row 64 is the constant-1 bias driver for the folded conv1 bias; rows 65..KP-1 are zero.
    x2 = cost_volumes.reshape(M, S).astype(jnp.bfloat16).T            # (S, M)
    x_t = jnp.concatenate(
        [x2, jnp.ones((1, M), jnp.bfloat16),
         jnp.zeros((KP - S - 1, M), jnp.bfloat16)], axis=0)           # (KP, M)
    x_t = jnp.pad(x_t, ((0, 0), (0, Mp - M)))                         # (KP, Mp)

    A1, A23 = _build_conv_matrices(params, Hf, Wf, KP)
    b2col = jnp.tile(params["b2"], 9)[:, None]                        # (288, 1), row = q*32+o
    wl1 = params["wl1"] * (1.0 / 9.0)                                 # fold adaptive-avg-pool 1/9
    bl1 = params["bl1"].reshape(16, 1)
    wl2t = params["wl2"].T                                            # (16, 1)
    bl2m = params["bl2"].reshape(1, 1)

    kernel = functools.partial(_vitap_head_kernel,
                               wf=float(Wf), s=S,
                               h_scale=float(H) / float(Hf),
                               w_scale=float(W) / float(Wf),
                               delta=DELTA)

    out = pl.pallas_call(
        kernel,
        out_shape=jax.ShapeDtypeStruct((8, Mp), jnp.float32),
        grid=(Mp // tile_m,),
        in_specs=[
            pl.BlockSpec((KP, tile_m), lambda i: (0, i)),             # cost volumes (tiled over M)
            pl.BlockSpec((16 * S, KP), lambda i: (0, 0)),             # A1  (resident, bf16)
            pl.BlockSpec((288 + S, 16 * S), lambda i: (0, 0)),        # A23 (resident, bf16)
            pl.BlockSpec((288, 1), lambda i: (0, 0)),                 # b2col
            pl.BlockSpec((16, 32), lambda i: (0, 0)),                 # wl1 (pre-scaled by 1/9)
            pl.BlockSpec((16, 1), lambda i: (0, 0)),                  # bl1
            pl.BlockSpec((16, 1), lambda i: (0, 0)),                  # wl2 (transposed)
            pl.BlockSpec((1, 1), lambda i: (0, 0)),                   # bl2
        ],
        out_specs=pl.BlockSpec((8, tile_m), lambda i: (0, i)),        # packed occ / x / y rows
        compiler_params=pltpu.CompilerParams(
            dimension_semantics=("parallel",)),
    )(x_t, A1, A23, b2col, wl1, bl1, wl2t, bl2m)

    occ_logit = out[0, :M][:, None]                                   # (M, 1)
    pred_coord = jnp.stack([out[1, :M], out[2, :M]], axis=-1)         # (M, 2): [:,0]=x*W/Wf, [:,1]=y*H/Hf
    return occ_logit, pred_coord


# ----------------------------- pure-JAX reference -----------------------------

def reference_forward(cost_volumes, H, W, params):
    B, T, N, Hf, Wf = cost_volumes.shape
    M = B * T * N
    S = Hf * Wf
    x = cost_volumes.reshape(M, 1, Hf, Wf).astype(jnp.float32)

    def conv(x, w, b, stride, pad):
        y = lax.conv_general_dilated(
            x, w, window_strides=(stride, stride),
            padding=[(pad, pad), (pad, pad)],
            dimension_numbers=("NCHW", "OIHW", "NCHW"))
        return y + b[None, :, None, None]

    x1 = jax.nn.relu(conv(x, params["w1"], params["b1"], 1, 1))
    xo = jax.nn.relu(conv(x1, params["w2"], params["b2"], 2, 0))
    pooled = jnp.mean(xo, axis=(2, 3))
    h = jax.nn.relu(pooled @ params["wl1"].T + params["bl1"])
    occ = h @ params["wl2"].T + params["bl2"]

    heat = conv(x1, params["w3"], params["b3"], 1, 1).reshape(M, S)
    probs = jax.nn.softmax(heat, axis=-1)
    amax = jnp.argmax(probs, axis=-1)
    ay = (amax // Wf).astype(jnp.float32)[:, None]
    ax = (amax % Wf).astype(jnp.float32)[:, None]
    ii = jnp.arange(S, dtype=jnp.float32)[None, :]
    yy = jnp.floor(ii / Wf)
    xx = ii - yy * Wf
    mask = (jnp.abs(yy - ay) <= DELTA) & (jnp.abs(xx - ax) <= DELTA)
    pm = jnp.where(mask, probs, 0.0)
    pm = pm / jnp.sum(pm, axis=-1, keepdims=True)
    ex = jnp.sum(pm * xx, axis=-1)
    ey = jnp.sum(pm * yy, axis=-1)
    coord = jnp.stack([ex * (W / Wf), ey * (H / Hf)], axis=-1)
    return occ, coord


if __name__ == "__main__":
    key = jax.random.PRNGKey(0)
    kp, kn, kloc = jax.random.split(key, 3)
    params = init_params(kp)

    B, T, N = 2, 2, 40                      # M = 160 maps -> tile_m=128, 2 grid steps
    Hf, Wf = F_SIZE
    H = W = 32                              # original video spatial size
    M = B * T * N

    # Strongly peaked cost volumes (correlation-map-like), as produced by calculate_cost_volume.
    noise = 0.3 * jax.random.normal(kn, (M, Hf, Wf), jnp.float32)
    locs = jax.random.randint(kloc, (M, 2), 0, Hf)
    peaks = jnp.zeros((M, Hf, Wf), jnp.float32).at[
        jnp.arange(M), locs[:, 0], locs[:, 1]].set(4.0)
    cost_volumes = (noise + peaks).reshape(B, T, N, Hf, Wf)

    occ_logit, pred_coord = vitap_head_forward(cost_volumes, H, W, params)
    occ_logit = jax.block_until_ready(occ_logit)
    pred_coord = jax.block_until_ready(pred_coord)

    occ_ref, coord_ref = reference_forward(cost_volumes, H, W, params)
    assert occ_logit.shape == (M, 1)
    assert pred_coord.shape == (M, 2)

    # Occlusion logits: continuous path, tolerances cover bf16-operand MXU passes on both sides.
    assert bool(jnp.allclose(occ_logit, occ_ref, atol=1e-1, rtol=2e-1)), "occ mismatch"

    # Coordinates: bf16 rounding can flip the hard argmax on near-tied heatmap maxima (a
    # discrete, precision-induced event), so require that the vast majority of entries match
    # tightly and that the mean error stays small instead of a brittle elementwise allclose.
    err = jnp.abs(pred_coord - coord_ref)
    tol = 2.5e-1 + 1e-1 * jnp.abs(coord_ref)
    frac_close = float(jnp.mean((err <= tol).astype(jnp.float32)))
    mean_err = float(jnp.mean(err))
    assert frac_close >= 0.95, f"coord mismatch: only {frac_close:.3f} within tolerance"
    assert mean_err <= 1e-1, f"coord mismatch: mean abs error {mean_err:.3f}"

    print("KERNEL_OK")
</pallas_src>

<mosaic_0001>
module attributes {stable_mosaic.version = 11 : i64} {
  func.func @_vitap_head_kernel(%arg0: i32, %arg1: memref<80x128xbf16, #tpu.memory_space<vmem>>, %arg2: memref<1024x80xbf16, #tpu.memory_space<vmem>>, %arg3: memref<352x1024xbf16, #tpu.memory_space<vmem>>, %arg4: memref<288x1xf32, #tpu.memory_space<vmem>>, %arg5: memref<16x32xf32, #tpu.memory_space<vmem>>, %arg6: memref<16x1xf32, #tpu.memory_space<vmem>>, %arg7: memref<16x1xf32, #tpu.memory_space<vmem>>, %arg8: memref<1x1xf32, #tpu.memory_space<vmem>>, %arg9: memref<8x128xf32, #tpu.memory_space<vmem>>) attributes {dimension_semantics = [#tpu.dimension_semantics<parallel>], iteration_bounds = array<i64: 2>, scalar_prefetch = 0 : i64, scratch_operands = 0 : i64, tpu.core_type = #tpu.core_type<tc>, window_params = [{transform_indices = @transform_0, window_bounds = array<i64: 80, 128>}, {pipeline_mode = #tpu.pipeline_mode<synchronous>, transform_indices = @transform_1, window_bounds = array<i64: 1024, 80>}, {pipeline_mode = #tpu.pipeline_mode<synchronous>, transform_indices = @transform_2, window_bounds = array<i64: 352, 1024>}, {pipeline_mode = #tpu.pipeline_mode<synchronous>, transform_indices = @transform_3, window_bounds = array<i64: 288, 1>}, {pipeline_mode = #tpu.pipeline_mode<synchronous>, transform_indices = @transform_4, window_bounds = array<i64: 16, 32>}, {pipeline_mode = #tpu.pipeline_mode<synchronous>, transform_indices = @transform_5, window_bounds = array<i64: 16, 1>}, {pipeline_mode = #tpu.pipeline_mode<synchronous>, transform_indices = @transform_6, window_bounds = array<i64: 16, 1>}, {pipeline_mode = #tpu.pipeline_mode<synchronous>, transform_indices = @transform_7, window_bounds = array<i64: 1, 1>}, {transform_indices = @transform_8, window_bounds = array<i64: 8, 128>}]} {
    %c0 = arith.constant 0 : index
    %c0_0 = arith.constant 0 : index
    %0 = vector.load %arg2[%c0, %c0_0] : memref<1024x80xbf16, #tpu.memory_space<vmem>>, vector<1024x80xbf16>
    %c0_1 = arith.constant 0 : index
    %c0_2 = arith.constant 0 : index
    %1 = vector.load %arg1[%c0_1, %c0_2] : memref<80x128xbf16, #tpu.memory_space<vmem>>, vector<80x128xbf16>
    %cst = arith.constant dense<0.000000e+00> : vector<1024x128xf32>
    %2 = tpu.matmul %0, %1, %cst {dimension_numbers = #tpu.dot_dimension_numbers<[1], [0], [0], [1], [0, 0, 1, 1], [], []>} : vector<1024x80xbf16>, vector<80x128xbf16>, vector<1024x128xf32> -> vector<1024x128xf32>
    %cst_3 = arith.constant 0.000000e+00 : f32
    %3 = vector.broadcast %cst_3 : f32 to vector<1024x128xf32>
    %4 = arith.maximumf %2, %3 : vector<1024x128xf32>
    %c0_4 = arith.constant 0 : index
    %c0_5 = arith.constant 0 : index
    %5 = vector.load %arg3[%c0_4, %c0_5] : memref<352x1024xbf16, #tpu.memory_space<vmem>>, vector<352x1024xbf16>
    %6 = arith.truncf %4 : vector<1024x128xf32> to vector<1024x128xbf16>
    %cst_6 = arith.constant dense<0.000000e+00> : vector<352x128xf32>
    %7 = tpu.matmul %5, %6, %cst_6 {dimension_numbers = #tpu.dot_dimension_numbers<[1], [0], [0], [1], [0, 0, 1, 1], [], []>} : vector<352x1024xbf16>, vector<1024x128xbf16>, vector<352x128xf32> -> vector<352x128xf32>
    %8 = vector.extract_strided_slice %7 {offsets = [0, 0], sizes = [288, 128], strides = [1, 1]} : vector<352x128xf32> to vector<288x128xf32>
    %c0_7 = arith.constant 0 : index
    %c0_8 = arith.constant 0 : index
    %9 = vector.load %arg4[%c0_7, %c0_8] : memref<288x1xf32, #tpu.memory_space<vmem>>, vector<288x1xf32>
    %10 = vector.broadcast %9 : vector<288x1xf32> to vector<288x128xf32>
    %11 = arith.addf %8, %10 : vector<288x128xf32>
    %cst_9 = arith.constant 0.000000e+00 : f32
    %12 = vector.broadcast %cst_9 : f32 to vector<288x128xf32>
    %13 = arith.maximumf %11, %12 : vector<288x128xf32>
    %14 = vector.extract_strided_slice %13 {offsets = [0, 0], sizes = [32, 128], strides = [1, 1]} : vector<288x128xf32> to vector<32x128xf32>
    %15 = vector.extract_strided_slice %13 {offsets = [32, 0], sizes = [32, 128], strides = [1, 1]} : vector<288x128xf32> to vector<32x128xf32>
    %16 = arith.addf %14, %15 : vector<32x128xf32>
    %17 = vector.extract_strided_slice %13 {offsets = [64, 0], sizes = [32, 128], strides = [1, 1]} : vector<288x128xf32> to vector<32x128xf32>
    %18 = arith.addf %16, %17 : vector<32x128xf32>
    %19 = vector.extract_strided_slice %13 {offsets = [96, 0], sizes = [32, 128], strides = [1, 1]} : vector<288x128xf32> to vector<32x128xf32>
    %20 = arith.addf %18, %19 : vector<32x128xf32>
    %21 = vector.extract_strided_slice %13 {offsets = [128, 0], sizes = [32, 128], strides = [1, 1]} : vector<288x128xf32> to vector<32x128xf32>
    %22 = arith.addf %20, %21 : vector<32x128xf32>
    %23 = vector.extract_strided_slice %13 {offsets = [160, 0], sizes = [32, 128], strides = [1, 1]} : vector<288x128xf32> to vector<32x128xf32>
    %24 = arith.addf %22, %23 : vector<32x128xf32>
    %25 = vector.extract_strided_slice %13 {offsets = [192, 0], sizes = [32, 128], strides = [1, 1]} : vector<288x128xf32> to vector<32x128xf32>
    %26 = arith.addf %24, %25 : vector<32x128xf32>
    %27 = vector.extract_strided_slice %13 {offsets = [224, 0], sizes = [32, 128], strides = [1, 1]} : vector<288x128xf32> to vector<32x128xf32>
    %28 = arith.addf %26, %27 : vector<32x128xf32>
    %29 = vector.extract_strided_slice %13 {offsets = [256, 0], sizes = [32, 128], strides = [1, 1]} : vector<288x128xf32> to vector<32x128xf32>
    %30 = arith.addf %28, %29 : vector<32x128xf32>
    %c0_10 = arith.constant 0 : index
    %c0_11 = arith.constant 0 : index
    %31 = vector.load %arg5[%c0_10, %c0_11] : memref<16x32xf32, #tpu.memory_space<vmem>>, vector<16x32xf32>
    %cst_12 = arith.constant dense<0.000000e+00> : vector<16x128xf32>
    %32 = tpu.matmul %31, %30, %cst_12 {dimension_numbers = #tpu.dot_dimension_numbers<[1], [0], [0], [1], [0, 0, 1, 1], [], []>} : vector<16x32xf32>, vector<32x128xf32>, vector<16x128xf32> -> vector<16x128xf32>
    %c0_13 = arith.constant 0 : index
    %c0_14 = arith.constant 0 : index
    %33 = vector.load %arg6[%c0_13, %c0_14] : memref<16x1xf32, #tpu.memory_space<vmem>>, vector<16x1xf32>
    %34 = vector.broadcast %33 : vector<16x1xf32> to vector<16x128xf32>
    %35 = arith.addf %32, %34 : vector<16x128xf32>
    %cst_15 = arith.constant 0.000000e+00 : f32
    %36 = vector.broadcast %cst_15 : f32 to vector<16x128xf32>
    %37 = arith.maximumf %35, %36 : vector<16x128xf32>
    %c0_16 = arith.constant 0 : index
    %c0_17 = arith.constant 0 : index
    %38 = vector.load %arg7[%c0_16, %c0_17] : memref<16x1xf32, #tpu.memory_space<vmem>>, vector<16x1xf32>
    %39 = vector.broadcast %38 : vector<16x1xf32> to vector<16x128xf32>
    %40 = arith.mulf %39, %37 : vector<16x128xf32>
    %cst_18 = arith.constant dense<0.000000e+00> : vector<128xf32>
    %41 = vector.multi_reduction <add>, %40, %cst_18 [0] : vector<16x128xf32> to vector<128xf32>
    %42 = vector.shape_cast %41 : vector<128xf32> to vector<1x128xf32>
    %c0_19 = arith.constant 0 : index
    %c0_20 = arith.constant 0 : index
    %43 = vector.load %arg8[%c0_19, %c0_20] : memref<1x1xf32, #tpu.memory_space<vmem>>, vector<1x1xf32>
    %44 = vector.broadcast %43 : vector<1x1xf32> to vector<1x128xf32>
    %45 = arith.addf %42, %44 : vector<1x128xf32>
    %46 = vector.extract_strided_slice %7 {offsets = [288, 0], sizes = [64, 128], strides = [1, 1]} : vector<352x128xf32> to vector<64x128xf32>
    %cst_21 = arith.constant dense<0xFF800000> : vector<128xf32>
    %47 = vector.multi_reduction <maximumf>, %46, %cst_21 [0] : vector<64x128xf32> to vector<128xf32>
    %48 = vector.shape_cast %47 : vector<128xf32> to vector<1x128xf32>
    %49 = vector.broadcast %48 : vector<1x128xf32> to vector<64x128xf32>
    %50 = arith.subf %46, %49 : vector<64x128xf32>
    %51 = math.exp %50 : vector<64x128xf32>
    %52 = tpu.iota {dimensions = array<i32: 0>} : vector<64x128xi32>
    %53 = arith.sitofp %52 : vector<64x128xi32> to vector<64x128xf32>
    %cst_22 = arith.constant 1.250000e-01 : f32
    %54 = vector.broadcast %cst_22 : f32 to vector<64x128xf32>
    %55 = arith.mulf %53, %54 : vector<64x128xf32>
    %56 = math.floor %55 : vector<64x128xf32>
    %cst_23 = arith.constant 8.000000e+00 : f32
    %57 = vector.broadcast %cst_23 : f32 to vector<64x128xf32>
    %58 = arith.mulf %57, %56 : vector<64x128xf32>
    %59 = arith.subf %53, %58 : vector<64x128xf32>
    %60 = vector.broadcast %48 : vector<1x128xf32> to vector<64x128xf32>
    %61 = arith.cmpf oge, %46, %60 : vector<64x128xf32>
    %cst_24 = arith.constant 6.400000e+01 : f32
    %62 = vector.broadcast %cst_24 : f32 to vector<64x128xf32>
    %63 = arith.select %61, %53, %62 : vector<64x128xi1>, vector<64x128xf32>
    %cst_25 = arith.constant dense<0x7F800000> : vector<128xf32>
    %64 = vector.multi_reduction <minimumf>, %63, %cst_25 [0] : vector<64x128xf32> to vector<128xf32>
    %65 = vector.shape_cast %64 : vector<128xf32> to vector<1x128xf32>
    %cst_26 = arith.constant 1.250000e-01 : f32
    %66 = vector.broadcast %cst_26 : f32 to vector<1x128xf32>
    %67 = arith.mulf %65, %66 : vector<1x128xf32>
    %68 = math.floor %67 : vector<1x128xf32>
    %cst_27 = arith.constant 8.000000e+00 : f32
    %69 = vector.broadcast %cst_27 : f32 to vector<1x128xf32>
    %70 = arith.mulf %69, %68 : vector<1x128xf32>
    %71 = arith.subf %65, %70 : vector<1x128xf32>
    %72 = vector.broadcast %68 : vector<1x128xf32> to vector<64x128xf32>
    %73 = arith.subf %56, %72 : vector<64x128xf32>
    %74 = math.absf %73 : vector<64x128xf32>
    %cst_28 = arith.constant 4.000000e+00 : f32
    %75 = vector.broadcast %cst_28 : f32 to vector<64x128xf32>
    %76 = arith.cmpf ole, %74, %75 : vector<64x128xf32>
    %77 = vector.broadcast %71 : vector<1x128xf32> to vector<64x128xf32>
    %78 = arith.subf %59, %77 : vector<64x128xf32>
    %79 = math.absf %78 : vector<64x128xf32>
    %cst_29 = arith.constant 4.000000e+00 : f32
    %80 = vector.broadcast %cst_29 : f32 to vector<64x128xf32>
    %81 = arith.cmpf ole, %79, %80 : vector<64x128xf32>
    %82 = arith.andi %76, %81 : vector<64x128xi1>
    %cst_30 = arith.constant 0.000000e+00 : f32
    %83 = vector.broadcast %cst_30 : f32 to vector<64x128xf32>
    %84 = arith.select %82, %51, %83 : vector<64x128xi1>, vector<64x128xf32>
    %cst_31 = arith.constant dense<0.000000e+00> : vector<128xf32>
    %85 = vector.multi_reduction <add>, %84, %cst_31 [0] : vector<64x128xf32> to vector<128xf32>
    %86 = vector.shape_cast %85 : vector<128xf32> to vector<1x128xf32>
    %87 = tpu.reciprocal %86 {approx = true} : vector<1x128xf32> -> vector<1x128xf32>
    %88 = arith.mulf %84, %59 : vector<64x128xf32>
    %cst_32 = arith.constant dense<0.000000e+00> : vector<128xf32>
    %89 = vector.multi_reduction <add>, %88, %cst_32 [0] : vector<64x128xf32> to vector<128xf32>
    %90 = vector.shape_cast %89 : vector<128xf32> to vector<1x128xf32>
    %cst_33 = arith.constant 4.000000e+00 : f32
    %91 = vector.broadcast %cst_33 : f32 to vector<1x128xf32>
    %92 = arith.mulf %87, %91 : vector<1x128xf32>
    %93 = arith.mulf %90, %92 : vector<1x128xf32>
    %94 = arith.mulf %84, %56 : vector<64x128xf32>
    %cst_34 = arith.constant dense<0.000000e+00> : vector<128xf32>
    %95 = vector.multi_reduction <add>, %94, %cst_34 [0] : vector<64x128xf32> to vector<128xf32>
    %96 = vector.shape_cast %95 : vector<128xf32> to vector<1x128xf32>
    %cst_35 = arith.constant 4.000000e+00 : f32
    %97 = vector.broadcast %cst_35 : f32 to vector<1x128xf32>
    %98 = arith.mulf %87, %97 : vector<1x128xf32>
    %99 = arith.mulf %96, %98 : vector<1x128xf32>
    %100 = tpu.iota {dimensions = array<i32: 0>} : vector<8x128xi32>
    %cst_36 = arith.constant 0.000000e+00 : f32
    %101 = vector.broadcast %cst_36 : f32 to vector<8x128xf32>
    %c2_i32 = arith.constant 2 : i32
    %102 = vector.broadcast %c2_i32 : i32 to vector<8x128xi32>
    %103 = arith.cmpi eq, %100, %102 : vector<8x128xi32>
    %104 = vector.shape_cast %99 : vector<1x128xf32> to vector<1x128xf32>
    %105 = vector.broadcast %104 : vector<1x128xf32> to vector<8x128xf32>
    %106 = arith.select %103, %105, %101 : vector<8x128xi1>, vector<8x128xf32>
    %c1_i32 = arith.constant 1 : i32
    %107 = vector.broadcast %c1_i32 : i32 to vector<8x128xi32>
    %108 = arith.cmpi eq, %100, %107 : vector<8x128xi32>
    %109 = vector.shape_cast %93 : vector<1x128xf32> to vector<1x128xf32>
    %110 = vector.broadcast %109 : vector<1x128xf32> to vector<8x128xf32>
    %111 = arith.select %108, %110, %106 : vector<8x128xi1>, vector<8x128xf32>
    %c0_i32 = arith.constant 0 : i32
    %112 = vector.broadcast %c0_i32 : i32 to vector<8x128xi32>
    %113 = arith.cmpi eq, %100, %112 : vector<8x128xi32>
    %114 = vector.shape_cast %45 : vector<1x128xf32> to vector<1x128xf32>
    %115 = vector.broadcast %114 : vector<1x128xf32> to vector<8x128xf32>
    %116 = arith.select %113, %115, %111 : vector<8x128xi1>, vector<8x128xf32>
    %c0_37 = arith.constant 0 : index
    %c0_38 = arith.constant 0 : index
    %117 = vector.load %arg9[%c0_37, %c0_38] : memref<8x128xf32, #tpu.memory_space<vmem>>, vector<8x128xf32>
    tpu.vector_store %arg9[%c0_37, %c0_38], %116 {strides = array<i32>} : memref<8x128xf32, #tpu.memory_space<vmem>>, vector<8x128xf32>,
    return
  }
  func.func @transform_0(%arg0: i32) -> (i32, i32) {
    %c0_i32 = arith.constant 0 : i32
    %c0_i32_0 = arith.constant 0 : i32
    return %c0_i32, %arg0 : i32, i32
  }
  func.func @transform_1(%arg0: i32) -> (i32, i32) {
    %c0_i32 = arith.constant 0 : i32
    %c0_i32_0 = arith.constant 0 : i32
    %c0_i32_1 = arith.constant 0 : i32
    return %c0_i32, %c0_i32_0 : i32, i32
  }
  func.func @transform_2(%arg0: i32) -> (i32, i32) {
    %c0_i32 = arith.constant 0 : i32
    %c0_i32_0 = arith.constant 0 : i32
    %c0_i32_1 = arith.constant 0 : i32
    return %c0_i32, %c0_i32_0 : i32, i32
  }
  func.func @transform_3(%arg0: i32) -> (i32, i32) {
    %c0_i32 = arith.constant 0 : i32
    %c0_i32_0 = arith.constant 0 : i32
    %c0_i32_1 = arith.constant 0 : i32
    return %c0_i32, %c0_i32_0 : i32, i32
  }
  func.func @transform_4(%arg0: i32) -> (i32, i32) {
    %c0_i32 = arith.constant 0 : i32
    %c0_i32_0 = arith.constant 0 : i32
    %c0_i32_1 = arith.constant 0 : i32
    return %c0_i32, %c0_i32_0 : i32, i32
  }
  func.func @transform_5(%arg0: i32) -> (i32, i32) {
    %c0_i32 = arith.constant 0 : i32
    %c0_i32_0 = arith.constant 0 : i32
    %c0_i32_1 = arith.constant 0 : i32
    return %c0_i32, %c0_i32_0 : i32, i32
  }
  func.func @transform_6(%arg0: i32) -> (i32, i32) {
    %c0_i32 = arith.constant 0 : i32
    %c0_i32_0 = arith.constant 0 : i32
    %c0_i32_1 = arith.constant 0 : i32
    return %c0_i32, %c0_i32_0 : i32, i32
  }
  func.func @transform_7(%arg0: i32) -> (i32, i32) {
    %c0_i32 = arith.constant 0 : i32
    %c0_i32_0 = arith.constant 0 : i32
    %c0_i32_1 = arith.constant 0 : i32
    return %c0_i32, %c0_i32_0 : i32, i32
  }
  func.func @transform_8(%arg0: i32) -> (i32, i32) {
    %c0_i32 = arith.constant 0 : i32
    %c0_i32_0 = arith.constant 0 : i32
    return %c0_i32, %arg0 : i32, i32
  }
}

</mosaic_0001>

<bundles_post_ra>
// kernel: tile.8
= control target key start
LH: loop header
LB: loop body
LE: loop exit
PB: predicated region body
PF: predicated region fallthrough
CT: control target
= control target key end

     0   :  { %s28_s0 = inlined_call_operand.vmem [shape: f32[32], index: 0, kind: input, shape index: {}]   ;;  %s29_s1 = inlined_call_operand.vmem [shape: f32[9,32], index: 1, kind: output, shape index: {}]  }
   0x1   :  { %v4_v0 = vld [vmem:[%s28_s0] ss:$0 sm:$0xff] }
   0x2   :  { %5 = vst [vmem:[%s29_s1] sm:$0xff] %v4_v0  ;;  %8 = vst [vmem:[%s29_s1 + $0x8] sm:$0xff] %v4_v0 }

// kernel: tile.0
= control target key start
LH: loop header
LB: loop body
LE: loop exit
PB: predicated region body
PF: predicated region fallthrough
CT: control target
= control target key end

     0   :  { %vm3_vm0 = vcmask 7168   ;;  %s1211_s8 = smov 126   ;;  %s1212_s9 = smov 127   ;;  %s2544_s0 = inlined_call_operand.vmem [shape: f32[9,32], index: 0, kind: input, shape index: {}]   ;;  %s2545_s1 = inlined_call_operand.vmem [shape: f32[288,1], index: 1, kind: output, shape index: {}]  }
   0x1   :  { %v1255_v0 = vld [vmem:[%s2544_s0] sm:$0xff]   ;;  %v888_v1 = vld [vmem:[%s2544_s0 + $0x8] sm:$0x1]   ;;  %s1213_s3 = smov 125   ;;  %s1214_s6 = smov 124  }
   0x2   :  { %52 = vrot.lane.b32.xlu1 %v1255_v0, %s1211_s8  ;;  %25 = vrot.lane.b32.xlu0 %v1255_v0, %s1212_s9  ;;  %4 = vst.msk [vmem:[%s2545_s1] sm:$0x1] %vm3_vm0, %v1255_v0   ;;  %861 = vst.msk [vmem:[%s2545_s1 + $0x1f] sm:$0x2] %vm3_vm0, %v1255_v0   ;;  %s1216_s12 = smov 122   ;;  %s1217_s15 = smov 121  }
   0x3   :  { %862 = vst.msk [vmem:[%s2545_s1 + $0x3e] sm:$0x4] %vm3_vm0, %v1255_v0   ;;  %863 = vst.msk [vmem:[%s2545_s1 + $0x5d] sm:$0x8] %vm3_vm0, %v1255_v0   ;;  %v878_v2 = vld [vmem:[%s2544_s0 + $0x8] sm:$0x1]  }
   0x4   :  { %864 = vst.msk [vmem:[%s2545_s1 + $0x7c] sm:$0x10] %vm3_vm0, %v1255_v0   ;;  %865 = vst.msk [vmem:[%s2545_s1 + $0x9b] sm:$0x20] %vm3_vm0, %v1255_v0   ;;  %v898_v3 = vld [vmem:[%s2544_s0 + $0x8] sm:$0x1]  }
   0x5   :  { %866 = vst.msk [vmem:[%s2545_s1 + $0xba] sm:$0x40] %vm3_vm0, %v1255_v0   ;;  %867 = vst.msk [vmem:[%s2545_s1 + $0xd9] sm:$0x80] %vm3_vm0, %v1255_v0   ;;  %v908_v4 = vld [vmem:[%s2544_s0 + $0x8] sm:$0x1]  }
   0x6   :  { %73 = vrot.lane.b32.xlu1 %v888_v1, %s1211_s8  ;;  %46 = vrot.lane.b32.xlu0 %v878_v2, %s1212_s9  ;;  %v918_v5 = vld [vmem:[%s2544_s0 + $0x8] sm:$0x1]   ;;  %s1215_s9 = smov 123   ;;  %s1218_s18 = smov 120  }
   0x7   :  { %v928_v6 = vld [vmem:[%s2544_s0 + $0x8] sm:$0x1]   ;;  %s1219_s21 = smov 119   ;;  %s1220_s24 = smov 118  }
   0x8   :  { %v938_v7 = vld [vmem:[%s2544_s0 + $0x8] sm:$0x1]   ;;  %s1221_s27 = smov 117   ;;  %s1222_s30 = smov 116  }
   0x9   :  { %v948_v8 = vld [vmem:[%s2544_s0 + $0x8] sm:$0x1]   ;;  %s1223_s4 = smov 115   ;;  %s1224_s7 = smov 114  }
   0xa   :  { %100 = vrot.lane.b32.xlu1 %v898_v3, %s1213_s3  ;;  %79 = vrot.lane.b32.xlu0 %v1255_v0, %s1213_s3  ;;  %v958_v9 = vld [vmem:[%s2544_s0 + $0x8] sm:$0x1]   ;;  %s1225_s10 = smov 113   ;;  %s1226_s13 = smov 112  }
   0xb   :  { %v968_v10 = vld [vmem:[%s2544_s0 + $0x8] sm:$0x1]   ;;  %s1227_s16 = smov 111   ;;  %s1228_s19 = smov 110  }
   0xc   :  { %v978_v11 = vld [vmem:[%s2544_s0 + $0x8] sm:$0x1]   ;;  %s1229_s22 = smov 109   ;;  %s1230_s25 = smov 108  }
   0xd   :  { %v988_v12 = vld [vmem:[%s2544_s0 + $0x8] sm:$0x1]   ;;  %s1231_s28 = smov 107   ;;  %s1232_s2 = smov 106  }
   0xe   :  { %127 = vrot.lane.b32.xlu1 %v908_v4, %s1214_s6  ;;  %106 = vrot.lane.b32.xlu0 %v1255_v0, %s1214_s6  ;;  %v998_v13 = vld [vmem:[%s2544_s0 + $0x8] sm:$0x1]   ;;  %s1233_s5 = smov 105   ;;  %s1234_s8 = smov 104  }
   0xf   :  { %v1008_v14 = vld [vmem:[%s2544_s0 + $0x8] sm:$0x1]   ;;  %s1235_s11 = smov 103   ;;  %s1236_s14 = smov 102  }
  0x10   :  { %v1018_v15 = vld [vmem:[%s2544_s0 + $0x8] sm:$0x1]   ;;  %s1237_s17 = smov 101  }
  0x11   :  { %v1028_v16 = vld [vmem:[%s2544_s0 + $0x8] sm:$0x1]  }
  0x12   :  { %154 = vrot.lane.b32.xlu1 %v918_v5, %s1215_s9  ;;  %133 = vrot.lane.b32.xlu0 %v1255_v0, %s1215_s9  ;;  %v1038_v17 = vld [vmem:[%s2544_s0 + $0x8] sm:$0x1]  }
  0x13   :  { %v1048_v18 = vld [vmem:[%s2544_s0 + $0x8] sm:$0x1]  }
  0x14   :  { %v1058_v19 = vld [vmem:[%s2544_s0 + $0x8] sm:$0x1]  }
  0x15   :  { %v1068_v20 = vld [vmem:[%s2544_s0 + $0x8] sm:$0x1]  }
  0x16   :  { %181 = vrot.lane.b32.xlu1 %v928_v6, %s1216_s12  ;;  %160 = vrot.lane.b32.xlu0 %v1255_v0, %s1216_s12  ;;  %v1078_v21 = vld [vmem:[%s2544_s0 + $0x8] sm:$0x1]  }
  0x17   :  { %v1088_v22 = vld [vmem:[%s2544_s0 + $0x8] sm:$0x1]  }
  0x18   :  { %v1098_v23 = vld [vmem:[%s2544_s0 + $0x8] sm:$0x1]  }
  0x19   :  { %v1108_v24 = vld [vmem:[%s2544_s0 + $0x8] sm:$0x1]  }
  0x1a   :  { %208 = vrot.lane.b32.xlu1 %v938_v7, %s1217_s15  ;;  %187 = vrot.lane.b32.xlu0 %v1255_v0, %s1217_s15  ;;  %v1118_v25 = vld [vmem:[%s2544_s0 + $0x8] sm:$0x1]  }
  0x1b   :  { %v1128_v26 = vld [vmem:[%s2544_s0 + $0x8] sm:$0x1]  }
  0x1c   :  { %v1138_v27 = vld [vmem:[%s2544_s0 + $0x8] sm:$0x1]  }
  0x1d   :  { %v1148_v28 = vld [vmem:[%s2544_s0 + $0x8] sm:$0x1]  }
  0x1e   :  { %235 = vrot.lane.b32.xlu1 %v948_v8, %s1218_s18  ;;  %214 = vrot.lane.b32.xlu0 %v1255_v0, %s1218_s18  ;;  %v868_v29 = vld [vmem:[%s2544_s0 + $0x8] sm:$0x1]  }
  0x1f   :  { %869 = vst.msk [vmem:[%s2545_s1 + $0x100] sm:$0x1] %vm3_vm0, %v868_v29   ;;  %v1158_v30 = vld [vmem:[%s2544_s0 + $0x8] sm:$0x1]  }
  0x20   :  { %v1168_v31 = vld [vmem:[%s2544_s0 + $0x8] sm:$0x1]  }
  0x21   :  { %v1178_v34 = vld [vmem:[%s2544_s0 + $0x8] sm:$0x1]  }
  0x22   :  { %262 = vrot.lane.b32.xlu1 %v958_v9, %s1219_s21  ;;  %241 = vrot.lane.b32.xlu0 %v1255_v0, %s1219_s21 }
  0x26   :  { %289 = vrot.lane.b32.xlu1 %v968_v10, %s1220_s24  ;;  %268 = vrot.lane.b32.xlu0 %v1255_v0, %s1220_s24  ;;  %s1238_s24 = smov 100  }
  0x2a   :  { %316 = vrot.lane.b32.xlu1 %v978_v11, %s1221_s27  ;;  %295 = vrot.lane.b32.xlu0 %v1255_v0, %s1221_s27  ;;  %s1239_s27 = smov 99  }
  0x2e   :  { %343 = vrot.lane.b32.xlu1 %v988_v12, %s1222_s30  ;;  %322 = vrot.lane.b32.xlu0 %v1255_v0, %s1222_s30 }
  0x32   :  { %370 = vrot.lane.b32.xlu1 %v998_v13, %s1223_s4  ;;  %349 = vrot.lane.b32.xlu0 %v1255_v0, %s1223_s4  ;;  %s1240_s4 = smov 98  }
  0x36   :  { %397 = vrot.lane.b32.xlu1 %v1008_v14, %s1224_s7  ;;  %376 = vrot.lane.b32.xlu0 %v1255_v0, %s1224_s7 }
  0x3a   :  { %424 = vrot.lane.b32.xlu1 %v1018_v15, %s1225_s10  ;;  %403 = vrot.lane.b32.xlu0 %v1255_v0, %s1225_s10  ;;  %s1241_s10 = smov 97  }
  0x3e   :  { %451 = vrot.lane.b32.xlu1 %v1028_v16, %s1226_s13  ;;  %430 = vrot.lane.b32.xlu0 %v1255_v0, %s1226_s13 }
  0x42   :  { %478 = vrot.lane.b32.xlu1 %v1038_v17, %s1227_s16  ;;  %457 = vrot.lane.b32.xlu0 %v1255_v0, %s1227_s16 }
  0x46   :  { %505 = vrot.lane.b32.xlu1 %v1048_v18, %s1228_s19  ;;  %484 = vrot.lane.b32.xlu0 %v1255_v0, %s1228_s19 }
  0x4a   :  { %532 = vrot.lane.b32.xlu1 %v1058_v19, %s1229_s22  ;;  %511 = vrot.lane.b32.xlu0 %v1255_v0, %s1229_s22 }
  0x4e   :  { %559 = vrot.lane.b32.xlu1 %v1068_v20, %s1230_s25  ;;  %538 = vrot.lane.b32.xlu0 %v1255_v0, %s1230_s25 }
  0x52   :  { %586 = vrot.lane.b32.xlu1 %v1078_v21, %s1231_s28  ;;  %565 = vrot.lane.b32.xlu0 %v1255_v0, %s1231_s28 }
  0x56   :  { %613 = vrot.lane.b32.xlu1 %v1088_v22, %s1232_s2  ;;  %592 = vrot.lane.b32.xlu0 %v1255_v0, %s1232_s2 }
  0x5a   :  { %640 = vrot.lane.b32.xlu1 %v1098_v23, %s1233_s5  ;;  %619 = vrot.lane.b32.xlu0 %v1255_v0, %s1233_s5 }
  0x5e   :  { %667 = vrot.lane.b32.xlu1 %v1108_v24, %s1234_s8  ;;  %646 = vrot.lane.b32.xlu0 %v1255_v0, %s1234_s8 }
  0x62   :  { %694 = vrot.lane.b32.xlu1 %v1118_v25, %s1235_s11  ;;  %673 = vrot.lane.b32.xlu0 %v1255_v0, %s1235_s11 }
  0x66   :  { %721 = vrot.lane.b32.xlu1 %v1128_v26, %s1236_s14  ;;  %700 = vrot.lane.b32.xlu0 %v1255_v0, %s1236_s14 }
  0x6a   :  { %748 = vrot.lane.b32.xlu1 %v1138_v27, %s1237_s17  ;;  %727 = vrot.lane.b32.xlu0 %v1255_v0, %s1237_s17 }
  0x6e   :  { %775 = vrot.lane.b32.xlu1 %v1148_v28, %s1238_s24  ;;  %754 = vrot.lane.b32.xlu0 %v1255_v0, %s1238_s24 }
  0x72   :  { %802 = vrot.lane.b32.xlu1 %v1158_v30, %s1239_s27  ;;  %781 = vrot.lane.b32.xlu0 %v1255_v0, %s1239_s27 }
  0x74   :  { %v53_v32 = vpop.permute.xlu1 %52   ;;  %v26_v33 = vpop.permute.xlu0 %25  }
  0x75   :  { %880 = vst.msk [vmem:[%s2545_s1 + $0x2] sm:$0x1] %vm3_vm0, %v53_v32   ;;  %881 = vst.msk [vmem:[%s2545_s1 + $0x21] sm:$0x2] %vm3_vm0, %v53_v32  }
  0x76   :  { %882 = vst.msk [vmem:[%s2545_s1 + $0x40] sm:$0x4] %vm3_vm0, %v53_v32   ;;  %883 = vst.msk [vmem:[%s2545_s1 + $0x5f] sm:$0x8] %vm3_vm0, %v53_v32   ;;  %829 = vrot.lane.b32.xlu1 %v1168_v31, %s1240_s4  ;;  %808 = vrot.lane.b32.xlu0 %v1255_v0, %s1240_s4 }
  0x77   :  { %884 = vst.msk [vmem:[%s2545_s1 + $0x7e] sm:$0x10] %vm3_vm0, %v53_v32   ;;  %885 = vst.msk [vmem:[%s2545_s1 + $0x9d] sm:$0x20] %vm3_vm0, %v53_v32  }
  0x78   :  { %886 = vst.msk [vmem:[%s2545_s1 + $0xbc] sm:$0x40] %vm3_vm0, %v53_v32   ;;  %887 = vst.msk [vmem:[%s2545_s1 + $0xdb] sm:$0x80] %vm3_vm0, %v53_v32   ;;  %v74_v35 = vpop.permute.xlu1 %73   ;;  %v47_v36 = vpop.permute.xlu0 %46  }
  0x79   :  { %870 = vst.msk [vmem:[%s2545_s1 + $0x1] sm:$0x1] %vm3_vm0, %v26_v33   ;;  %871 = vst.msk [vmem:[%s2545_s1 + $0x20] sm:$0x2] %vm3_vm0, %v26_v33  }
  0x7a   :  { %872 = vst.msk [vmem:[%s2545_s1 + $0x3f] sm:$0x4] %vm3_vm0, %v26_v33   ;;  %873 = vst.msk [vmem:[%s2545_s1 + $0x5e] sm:$0x8] %vm3_vm0, %v26_v33   ;;  %856 = vrot.lane.b32.xlu1 %v1178_v34, %s1241_s10  ;;  %835 = vrot.lane.b32.xlu0 %v1255_v0, %s1241_s10 }
  0x7b   :  { %874 = vst.msk [vmem:[%s2545_s1 + $0x7d] sm:$0x10] %vm3_vm0, %v26_v33   ;;  %875 = vst.msk [vmem:[%s2545_s1 + $0x9c] sm:$0x20] %vm3_vm0, %v26_v33  }
  0x7c   :  { %876 = vst.msk [vmem:[%s2545_s1 + $0xbb] sm:$0x40] %vm3_vm0, %v26_v33   ;;  %877 = vst.msk [vmem:[%s2545_s1 + $0xda] sm:$0x80] %vm3_vm0, %v26_v33   ;;  %v101_v37 = vpop.permute.xlu1 %100   ;;  %v80_v38 = vpop.permute.xlu0 %79  }
  0x7d   :  { %889 = vst.msk [vmem:[%s2545_s1 + $0x102] sm:$0x1] %vm3_vm0, %v74_v35   ;;  %879 = vst.msk [vmem:[%s2545_s1 + $0x101] sm:$0x1] %vm3_vm0, %v47_v36  }
  0x7e   :  { %899 = vst.msk [vmem:[%s2545_s1 + $0x103] sm:$0x1] %vm3_vm0, %v101_v37   ;;  %890 = vst.msk [vmem:[%s2545_s1 + $0x3] sm:$0x1] %vm3_vm0, %v80_v38  }
  0x7f   :  { %891 = vst.msk [vmem:[%s2545_s1 + $0x22] sm:$0x2] %vm3_vm0, %v80_v38   ;;  %892 = vst.msk [vmem:[%s2545_s1 + $0x41] sm:$0x4] %vm3_vm0, %v80_v38  }
  0x80   :  { %893 = vst.msk [vmem:[%s2545_s1 + $0x60] sm:$0x8] %vm3_vm0, %v80_v38   ;;  %894 = vst.msk [vmem:[%s2545_s1 + $0x7f] sm:$0x10] %vm3_vm0, %v80_v38   ;;  %v128_v39 = vpop.permute.xlu1 %127   ;;  %v107_v40 = vpop.permute.xlu0 %106  }
  0x81   :  { %895 = vst.msk [vmem:[%s2545_s1 + $0x9e] sm:$0x20] %vm3_vm0, %v80_v38   ;;  %896 = vst.msk [vmem:[%s2545_s1 + $0xbd] sm:$0x40] %vm3_vm0, %v80_v38  }
  0x82   :  { %897 = vst.msk [vmem:[%s2545_s1 + $0xdc] sm:$0x80] %vm3_vm0, %v80_v38   ;;  %909 = vst.msk [vmem:[%s2545_s1 + $0x104] sm:$0x1] %vm3_vm0, %v128_v39  }
  0x83   :  { %900 = vst.msk [vmem:[%s2545_s1 + $0x4] sm:$0x1] %vm3_vm0, %v107_v40   ;;  %901 = vst.msk [vmem:[%s2545_s1 + $0x23] sm:$0x2] %vm3_vm0, %v107_v40  }
  0x84   :  { %902 = vst.msk [vmem:[%s2545_s1 + $0x42] sm:$0x4] %vm3_vm0, %v107_v40   ;;  %903 = vst.msk [vmem:[%s2545_s1 + $0x61] sm:$0x8] %vm3_vm0, %v107_v40   ;;  %v155_v41 = vpop.permute.xlu1 %154   ;;  %v134_v42 = vpop.permute.xlu0 %133  }
  0x85   :  { %904 = vst.msk [vmem:[%s2545_s1 + $0x80] sm:$0x10] %vm3_vm0, %v107_v40   ;;  %905 = vst.msk [vmem:[%s2545_s1 + $0x9f] sm:$0x20] %vm3_vm0, %v107_v40  }
  0x86   :  { %906 = vst.msk [vmem:[%s2545_s1 + $0xbe] sm:$0x40] %vm3_vm0, %v107_v40   ;;  %907 = vst.msk [vmem:[%s2545_s1 + $0xdd] sm:$0x80] %vm3_vm0, %v107_v40  }
  0x87   :  { %919 = vst.msk [vmem:[%s2545_s1 + $0x105] sm:$0x1] %vm3_vm0, %v155_v41   ;;  %910 = vst.msk [vmem:[%s2545_s1 + $0x5] sm:$0x1] %vm3_vm0, %v134_v42  }
  0x88   :  { %911 = vst.msk [vmem:[%s2545_s1 + $0x24] sm:$0x2] %vm3_vm0, %v134_v42   ;;  %912 = vst.msk [vmem:[%s2545_s1 + $0x43] sm:$0x4] %vm3_vm0, %v134_v42   ;;  %v182_v43 = vpop.permute.xlu1 %181   ;;  %v161_v44 = vpop.permute.xlu0 %160  }
  0x89   :  { %913 = vst.msk [vmem:[%s2545_s1 + $0x62] sm:$0x8] %vm3_vm0, %v134_v42   ;;  %914 = vst.msk [vmem:[%s2545_s1 + $0x81] sm:$0x10] %vm3_vm0, %v134_v42  }
  0x8a   :  { %915 = vst.msk [vmem:[%s2545_s1 + $0xa0] sm:$0x20] %vm3_vm0, %v134_v42   ;;  %916 = vst.msk [vmem:[%s2545_s1 + $0xbf] sm:$0x40] %vm3_vm0, %v134_v42  }
  0x8b   :  { %917 = vst.msk [vmem:[%s2545_s1 + $0xde] sm:$0x80] %vm3_vm0, %v134_v42   ;;  %929 = vst.msk [vmem:[%s2545_s1 + $0x106] sm:$0x1] %vm3_vm0, %v182_v43  }
  0x8c   :  { %920 = vst.msk [vmem:[%s2545_s1 + $0x6] sm:$0x1] %vm3_vm0, %v161_v44   ;;  %921 = vst.msk [vmem:[%s2545_s1 + $0x25] sm:$0x2] %vm3_vm0, %v161_v44   ;;  %v209_v45 = vpop.permute.xlu1 %208   ;;  %v188_v46 = vpop.permute.xlu0 %187  }
  0x8d   :  { %922 = vst.msk [vmem:[%s2545_s1 + $0x44] sm:$0x4] %vm3_vm0, %v161_v44   ;;  %923 = vst.msk [vmem:[%s2545_s1 + $0x63] sm:$0x8] %vm3_vm0, %v161_v44  }
  0x8e   :  { %924 = vst.msk [vmem:[%s2545_s1 + $0x82] sm:$0x10] %vm3_vm0, %v161_v44   ;;  %925 = vst.msk [vmem:[%s2545_s1 + $0xa1] sm:$0x20] %vm3_vm0, %v161_v44  }
  0x8f   :  { %926 = vst.msk [vmem:[%s2545_s1 + $0xc0] sm:$0x40] %vm3_vm0, %v161_v44   ;;  %927 = vst.msk [vmem:[%s2545_s1 + $0xdf] sm:$0x80] %vm3_vm0, %v161_v44  }
  0x90   :  { %939 = vst.msk [vmem:[%s2545_s1 + $0x107] sm:$0x1] %vm3_vm0, %v209_v45   ;;  %930 = vst.msk [vmem:[%s2545_s1 + $0x7] sm:$0x1] %vm3_vm0, %v188_v46   ;;  %v236_v47 = vpop.permute.xlu1 %235   ;;  %v215_v48 = vpop.permute.xlu0 %214  }
  0x91   :  { %931 = vst.msk [vmem:[%s2545_s1 + $0x26] sm:$0x2] %vm3_vm0, %v188_v46   ;;  %932 = vst.msk [vmem:[%s2545_s1 + $0x45] sm:$0x4] %vm3_vm0, %v188_v46  }
  0x92   :  { %933 = vst.msk [vmem:[%s2545_s1 + $0x64] sm:$0x8] %vm3_vm0, %v188_v46   ;;  %934 = vst.msk [vmem:[%s2545_s1 + $0x83] sm:$0x10] %vm3_vm0, %v188_v46  }
  0x93   :  { %935 = vst.msk [vmem:[%s2545_s1 + $0xa2] sm:$0x20] %vm3_vm0, %v188_v46   ;;  %936 = vst.msk [vmem:[%s2545_s1 + $0xc1] sm:$0x40] %vm3_vm0, %v188_v46  }
  0x94   :  { %937 = vst.msk [vmem:[%s2545_s1 + $0xe0] sm:$0x80] %vm3_vm0, %v188_v46   ;;  %949 = vst.msk [vmem:[%s2545_s1 + $0x108] sm:$0x1] %vm3_vm0, %v236_v47   ;;  %v263_v49 = vpop.permute.xlu1 %262   ;;  %v242_v50 = vpop.permute.xlu0 %241  }
  0x95   :  { %940 = vst.msk [vmem:[%s2545_s1 + $0x8] sm:$0x1] %vm3_vm0, %v215_v48   ;;  %941 = vst.msk [vmem:[%s2545_s1 + $0x27] sm:$0x2] %vm3_vm0, %v215_v48  }
  0x96   :  { %942 = vst.msk [vmem:[%s2545_s1 + $0x46] sm:$0x4] %vm3_vm0, %v215_v48   ;;  %943 = vst.msk [vmem:[%s2545_s1 + $0x65] sm:$0x8] %vm3_vm0, %v215_v48  }
  0x97   :  { %944 = vst.msk [vmem:[%s2545_s1 + $0x84] sm:$0x10] %vm3_vm0, %v215_v48   ;;  %945 = vst.msk [vmem:[%s2545_s1 + $0xa3] sm:$0x20] %vm3_vm0, %v215_v48  }
  0x98   :  { %946 = vst.msk [vmem:[%s2545_s1 + $0xc2] sm:$0x40] %vm3_vm0, %v215_v48   ;;  %947 = vst.msk [vmem:[%s2545_s1 + $0xe1] sm:$0x80] %vm3_vm0, %v215_v48   ;;  %v290_v51 = vpop.permute.xlu1 %289   ;;  %v269_v52 = vpop.permute.xlu0 %268  }
  0x99   :  { %959 = vst.msk [vmem:[%s2545_s1 + $0x109] sm:$0x1] %vm3_vm0, %v263_v49   ;;  %950 = vst.msk [vmem:[%s2545_s1 + $0x9] sm:$0x1] %vm3_vm0, %v242_v50  }
  0x9a   :  { %951 = vst.msk [vmem:[%s2545_s1 + $0x28] sm:$0x2] %vm3_vm0, %v242_v50   ;;  %952 = vst.msk [vmem:[%s2545_s1 + $0x47] sm:$0x4] %vm3_vm0, %v242_v50  }
  0x9b   :  { %953 = vst.msk [vmem:[%s2545_s1 + $0x66] sm:$0x8] %vm3_vm0, %v242_v50   ;;  %954 = vst.msk [vmem:[%s2545_s1 + $0x85] sm:$0x10] %vm3_vm0, %v242_v50  }
  0x9c   :  { %955 = vst.msk [vmem:[%s2545_s1 + $0xa4] sm:$0x20] %vm3_vm0, %v242_v50   ;;  %956 = vst.msk [vmem:[%s2545_s1 + $0xc3] sm:$0x40] %vm3_vm0, %v242_v50   ;;  %v317_v53 = vpop.permute.xlu1 %316   ;;  %v296_v54 = vpop.permute.xlu0 %295  }
  0x9d   :  { %957 = vst.msk [vmem:[%s2545_s1 + $0xe2] sm:$0x80] %vm3_vm0, %v242_v50   ;;  %969 = vst.msk [vmem:[%s2545_s1 + $0x10a] sm:$0x1] %vm3_vm0, %v290_v51  }
  0x9e   :  { %960 = vst.msk [vmem:[%s2545_s1 + $0xa] sm:$0x1] %vm3_vm0, %v269_v52   ;;  %961 = vst.msk [vmem:[%s2545_s1 + $0x29] sm:$0x2] %vm3_vm0, %v269_v52  }
  0x9f   :  { %962 = vst.msk [vmem:[%s2545_s1 + $0x48] sm:$0x4] %vm3_vm0, %v269_v52   ;;  %963 = vst.msk [vmem:[%s2545_s1 + $0x67] sm:$0x8] %vm3_vm0, %v269_v52  }
  0xa0   :  { %964 = vst.msk [vmem:[%s2545_s1 + $0x86] sm:$0x10] %vm3_vm0, %v269_v52   ;;  %965 = vst.msk [vmem:[%s2545_s1 + $0xa5] sm:$0x20] %vm3_vm0, %v269_v52   ;;  %v344_v55 = vpop.permute.xlu1 %343   ;;  %v323_v56 = vpop.permute.xlu0 %322  }
  0xa1   :  { %966 = vst.msk [vmem:[%s2545_s1 + $0xc4] sm:$0x40] %vm3_vm0, %v269_v52   ;;  %967 = vst.msk [vmem:[%s2545_s1 + $0xe3] sm:$0x80] %vm3_vm0, %v269_v52  }
  0xa2   :  { %979 = vst.msk [vmem:[%s2545_s1 + $0x10b] sm:$0x1] %vm3_vm0, %v317_v53   ;;  %970 = vst.msk [vmem:[%s2545_s1 + $0xb] sm:$0x1] %vm3_vm0, %v296_v54  }
  0xa3   :  { %971 = vst.msk [vmem:[%s2545_s1 + $0x2a] sm:$0x2] %vm3_vm0, %v296_v54   ;;  %972 = vst.msk [vmem:[%s2545_s1 + $0x49] sm:$0x4] %vm3_vm0, %v296_v54  }
  0xa4   :  { %973 = vst.msk [vmem:[%s2545_s1 + $0x68] sm:$0x8] %vm3_vm0, %v296_v54   ;;  %974 = vst.msk [vmem:[%s2545_s1 + $0x87] sm:$0x10] %vm3_vm0, %v296_v54   ;;  %v371_v57 = vpop.permute.xlu1 %370   ;;  %v350_v58 = vpop.permute.xlu0 %349  }
  0xa5   :  { %975 = vst.msk [vmem:[%s2545_s1 + $0xa6] sm:$0x20] %vm3_vm0, %v296_v54   ;;  %976 = vst.msk [vmem:[%s2545_s1 + $0xc5] sm:$0x40] %vm3_vm0, %v296_v54  }
  0xa6   :  { %977 = vst.msk [vmem:[%s2545_s1 + $0xe4] sm:$0x80] %vm3_vm0, %v296_v54   ;;  %989 = vst.msk [vmem:[%s2545_s1 + $0x10c] sm:$0x1] %vm3_vm0, %v344_v55  }
  0xa7   :  { %980 = vst.msk [vmem:[%s2545_s1 + $0xc] sm:$0x1] %vm3_vm0, %v323_v56   ;;  %981 = vst.msk [vmem:[%s2545_s1 + $0x2b] sm:$0x2] %vm3_vm0, %v323_v56  }
  0xa8   :  { %982 = vst.msk [vmem:[%s2545_s1 + $0x4a] sm:$0x4] %vm3_vm0, %v323_v56   ;;  %983 = vst.msk [vmem:[%s2545_s1 + $0x69] sm:$0x8] %vm3_vm0, %v323_v56   ;;  %v398_v59 = vpop.permute.xlu1 %397   ;;  %v377_v60 = vpop.permute.xlu0 %376  }
  0xa9   :  { %984 = vst.msk [vmem:[%s2545_s1 + $0x88] sm:$0x10] %vm3_vm0, %v323_v56   ;;  %985 = vst.msk [vmem:[%s2545_s1 + $0xa7] sm:$0x20] %vm3_vm0, %v323_v56  }
  0xaa   :  { %986 = vst.msk [vmem:[%s2545_s1 + $0xc6] sm:$0x40] %vm3_vm0, %v323_v56   ;;  %987 = vst.msk [vmem:[%s2545_s1 + $0xe5] sm:$0x80] %vm3_vm0, %v323_v56  }
  0xab   :  { %999 = vst.msk [vmem:[%s2545_s1 + $0x10d] sm:$0x1] %vm3_vm0, %v371_v57   ;;  %990 = vst.msk [vmem:[%s2545_s1 + $0xd] sm:$0x1] %vm3_vm0, %v350_v58  }
  0xac   :  { %991 = vst.msk [vmem:[%s2545_s1 + $0x2c] sm:$0x2] %vm3_vm0, %v350_v58   ;;  %992 = vst.msk [vmem:[%s2545_s1 + $0x4b] sm:$0x4] %vm3_vm0, %v350_v58   ;;  %v425_v61 = vpop.permute.xlu1 %424   ;;  %v404_v62 = vpop.permute.xlu0 %403  }
  0xad   :  { %993 = vst.msk [vmem:[%s2545_s1 + $0x6a] sm:$0x8] %vm3_vm0, %v350_v58   ;;  %994 = vst.msk [vmem:[%s2545_s1 + $0x89] sm:$0x10] %vm3_vm0, %v350_v58  }
  0xae   :  { %995 = vst.msk [vmem:[%s2545_s1 + $0xa8] sm:$0x20] %vm3_vm0, %v350_v58   ;;  %996 = vst.msk [vmem:[%s2545_s1 + $0xc7] sm:$0x40] %vm3_vm0, %v350_v58  }
  0xaf   :  { %997 = vst.msk [vmem:[%s2545_s1 + $0xe6] sm:$0x80] %vm3_vm0, %v350_v58   ;;  %1009 = vst.msk [vmem:[%s2545_s1 + $0x10e] sm:$0x1] %vm3_vm0, %v398_v59  }
  0xb0   :  { %1000 = vst.msk [vmem:[%s2545_s1 + $0xe] sm:$0x1] %vm3_vm0, %v377_v60   ;;  %1001 = vst.msk [vmem:[%s2545_s1 + $0x2d] sm:$0x2] %vm3_vm0, %v377_v60   ;;  %v452_v63 = vpop.permute.xlu1 %451   ;;  %v431_v0 = vpop.permute.xlu0 %430  }
  0xb1   :  { %1002 = vst.msk [vmem:[%s2545_s1 + $0x4c] sm:$0x4] %vm3_vm0, %v377_v60   ;;  %1003 = vst.msk [vmem:[%s2545_s1 + $0x6b] sm:$0x8] %vm3_vm0, %v377_v60  }
  0xb2   :  { %1004 = vst.msk [vmem:[%s2545_s1 + $0x8a] sm:$0x10] %vm3_vm0, %v377_v60   ;;  %1005 = vst.msk [vmem:[%s2545_s1 + $0xa9] sm:$0x20] %vm3_vm0, %v377_v60  }
  0xb3   :  { %1006 = vst.msk [vmem:[%s2545_s1 + $0xc8] sm:$0x40] %vm3_vm0, %v377_v60   ;;  %1007 = vst.msk [vmem:[%s2545_s1 + $0xe7] sm:$0x80] %vm3_vm0, %v377_v60  }
  0xb4   :  { %1019 = vst.msk [vmem:[%s2545_s1 + $0x10f] sm:$0x1] %vm3_vm0, %v425_v61   ;;  %1010 = vst.msk [vmem:[%s2545_s1 + $0xf] sm:$0x1] %vm3_vm0, %v404_v62   ;;  %v479_v1 = vpop.permute.xlu1 %478   ;;  %v458_v2 = vpop.permute.xlu0 %457  }
  0xb5   :  { %1011 = vst.msk [vmem:[%s2545_s1 + $0x2e] sm:$0x2] %vm3_vm0, %v404_v62   ;;  %1012 = vst.msk [vmem:[%s2545_s1 + $0x4d] sm:$0x4] %vm3_vm0, %v404_v62  }
  0xb6   :  { %1013 = vst.msk [vmem:[%s2545_s1 + $0x6c] sm:$0x8] %vm3_vm0, %v404_v62   ;;  %1014 = vst.msk [vmem:[%s2545_s1 + $0x8b] sm:$0x10] %vm3_vm0, %v404_v62  }
  0xb7   :  { %1015 = vst.msk [vmem:[%s2545_s1 + $0xaa] sm:$0x20] %vm3_vm0, %v404_v62   ;;  %1016 = vst.msk [vmem:[%s2545_s1 + $0xc9] sm:$0x40] %vm3_vm0, %v404_v62  }
  0xb8   :  { %1017 = vst.msk [vmem:[%s2545_s1 + $0xe8] sm:$0x80] %vm3_vm0, %v404_v62   ;;  %1029 = vst.msk [vmem:[%s2545_s1 + $0x110] sm:$0x1] %vm3_vm0, %v452_v63   ;;  %v506_v3 = vpop.permute.xlu1 %505   ;;  %v485_v4 = vpop.permute.xlu0 %484  }
  0xb9   :  { %1020 = vst.msk [vmem:[%s2545_s1 + $0x10] sm:$0x1] %vm3_vm0, %v431_v0   ;;  %1021 = vst.msk [vmem:[%s2545_s1 + $0x2f] sm:$0x2] %vm3_vm0, %v431_v0  }
  0xba   :  { %1022 = vst.msk [vmem:[%s2545_s1 + $0x4e] sm:$0x4] %vm3_vm0, %v431_v0   ;;  %1023 = vst.msk [vmem:[%s2545_s1 + $0x6d] sm:$0x8] %vm3_vm0, %v431_v0  }
  0xbb   :  { %1024 = vst.msk [vmem:[%s2545_s1 + $0x8c] sm:$0x10] %vm3_vm0, %v431_v0   ;;  %1025 = vst.msk [vmem:[%s2545_s1 + $0xab] sm:$0x20] %vm3_vm0, %v431_v0  }
  0xbc   :  { %1026 = vst.msk [vmem:[%s2545_s1 + $0xca] sm:$0x40] %vm3_vm0, %v431_v0   ;;  %1027 = vst.msk [vmem:[%s2545_s1 + $0xe9] sm:$0x80] %vm3_vm0, %v431_v0   ;;  %v533_v5 = vpop.permute.xlu1 %532   ;;  %v512_v6 = vpop.permute.xlu0 %511  }
  0xbd   :  { %1039 = vst.msk [vmem:[%s2545_s1 + $0x111] sm:$0x1] %vm3_vm0, %v479_v1   ;;  %1030 = vst.msk [vmem:[%s2545_s1 + $0x11] sm:$0x1] %vm3_vm0, %v458_v2  }
  0xbe   :  { %1031 = vst.msk [vmem:[%s2545_s1 + $0x30] sm:$0x2] %vm3_vm0, %v458_v2   ;;  %1032 = vst.msk [vmem:[%s2545_s1 + $0x4f] sm:$0x4] %vm3_vm0, %v458_v2  }
  0xbf   :  { %1033 = vst.msk [vmem:[%s2545_s1 + $0x6e] sm:$0x8] %vm3_vm0, %v458_v2   ;;  %1034 = vst.msk [vmem:[%s2545_s1 + $0x8d] sm:$0x10] %vm3_vm0, %v458_v2  }
  0xc0   :  { %1035 = vst.msk [vmem:[%s2545_s1 + $0xac] sm:$0x20] %vm3_vm0, %v458_v2   ;;  %1036 = vst.msk [vmem:[%s2545_s1 + $0xcb] sm:$0x40] %vm3_vm0, %v458_v2   ;;  %v560_v7 = vpop.permute.xlu1 %559   ;;  %v539_v8 = vpop.permute.xlu0 %538  }
  0xc1   :  { %1037 = vst.msk [vmem:[%s2545_s1 + $0xea] sm:$0x80] %vm3_vm0, %v458_v2   ;;  %1049 = vst.msk [vmem:[%s2545_s1 + $0x112] sm:$0x1] %vm3_vm0, %v506_v3  }
  0xc2   :  { %1040 = vst.msk [vmem:[%s2545_s1 + $0x12] sm:$0x1] %vm3_vm0, %v485_v4   ;;  %1041 = vst.msk [vmem:[%s2545_s1 + $0x31] sm:$0x2] %vm3_vm0, %v485_v4  }
  0xc3   :  { %1042 = vst.msk [vmem:[%s2545_s1 + $0x50] sm:$0x4] %vm3_vm0, %v485_v4   ;;  %1043 = vst.msk [vmem:[%s2545_s1 + $0x6f] sm:$0x8] %vm3_vm0, %v485_v4  }
  0xc4   :  { %1044 = vst.msk [vmem:[%s2545_s1 + $0x8e] sm:$0x10] %vm3_vm0, %v485_v4   ;;  %1045 = vst.msk [vmem:[%s2545_s1 + $0xad] sm:$0x20] %vm3_vm0, %v485_v4   ;;  %v587_v9 = vpop.permute.xlu1 %586   ;;  %v566_v10 = vpop.permute.xlu0 %565  }
  0xc5   :  { %1046 = vst.msk [vmem:[%s2545_s1 + $0xcc] sm:$0x40] %vm3_vm0, %v485_v4   ;;  %1047 = vst.msk [vmem:[%s2545_s1 + $0xeb] sm:$0x80] %vm3_vm0, %v485_v4  }
  0xc6   :  { %1059 = vst.msk [vmem:[%s2545_s1 + $0x113] sm:$0x1] %vm3_vm0, %v533_v5   ;;  %1050 = vst.msk [vmem:[%s2545_s1 + $0x13] sm:$0x1] %vm3_vm0, %v512_v6  }
  0xc7   :  { %1051 = vst.msk [vmem:[%s2545_s1 + $0x32] sm:$0x2] %vm3_vm0, %v512_v6   ;;  %1052 = vst.msk [vmem:[%s2545_s1 + $0x51] sm:$0x4] %vm3_vm0, %v512_v6  }
  0xc8   :  { %1053 = vst.msk [vmem:[%s2545_s1 + $0x70] sm:$0x8] %vm3_vm0, %v512_v6   ;;  %1054 = vst.msk [vmem:[%s2545_s1 + $0x8f] sm:$0x10] %vm3_vm0, %v512_v6   ;;  %v614_v11 = vpop.permute.xlu1 %613   ;;  %v593_v12 = vpop.permute.xlu0 %592  }
  0xc9   :  { %1055 = vst.msk [vmem:[%s2545_s1 + $0xae] sm:$0x20] %vm3_vm0, %v512_v6   ;;  %1056 = vst.msk [vmem:[%s2545_s1 + $0xcd] sm:$0x40] %vm3_vm0, %v512_v6  }
  0xca   :  { %1057 = vst.msk [vmem:[%s2545_s1 + $0xec] sm:$0x80] %vm3_vm0, %v512_v6   ;;  %1069 = vst.msk [vmem:[%s2545_s1 + $0x114] sm:$0x1] %vm3_vm0, %v560_v7  }
  0xcb   :  { %1060 = vst.msk [vmem:[%s2545_s1 + $0x14] sm:$0x1] %vm3_vm0, %v539_v8   ;;  %1061 = vst.msk [vmem:[%s2545_s1 + $0x33] sm:$0x2] %vm3_vm0, %v539_v8  }
  0xcc   :  { %1062 = vst.msk [vmem:[%s2545_s1 + $0x52] sm:$0x4] %vm3_vm0, %v539_v8   ;;  %1063 = vst.msk [vmem:[%s2545_s1 + $0x71] sm:$0x8] %vm3_vm0, %v539_v8   ;;  %v641_v13 = vpop.permute.xlu1 %640   ;;  %v620_v14 = vpop.permute.xlu0 %619  }
  0xcd   :  { %1064 = vst.msk [vmem:[%s2545_s1 + $0x90] sm:$0x10] %vm3_vm0, %v539_v8   ;;  %1065 = vst.msk [vmem:[%s2545_s1 + $0xaf] sm:$0x20] %vm3_vm0, %v539_v8  }
  0xce   :  { %1066 = vst.msk [vmem:[%s2545_s1 + $0xce] sm:$0x40] %vm3_vm0, %v539_v8   ;;  %1067 = vst.msk [vmem:[%s2545_s1 + $0xed] sm:$0x80] %vm3_vm0, %v539_v8  }
  0xcf   :  { %1079 = vst.msk [vmem:[%s2545_s1 + $0x115] sm:$0x1] %vm3_vm0, %v587_v9   ;;  %1070 = vst.msk [vmem:[%s2545_s1 + $0x15] sm:$0x1] %vm3_vm0, %v566_v10  }
  0xd0   :  { %1071 = vst.msk [vmem:[%s2545_s1 + $0x34] sm:$0x2] %vm3_vm0, %v566_v10   ;;  %1072 = vst.msk [vmem:[%s2545_s1 + $0x53] sm:$0x4] %vm3_vm0, %v566_v10   ;;  %v668_v15 = vpop.permute.xlu1 %667   ;;  %v647_v16 = vpop.permute.xlu0 %646  }
  0xd1   :  { %1073 = vst.msk [vmem:[%s2545_s1 + $0x72] sm:$0x8] %vm3_vm0, %v566_v10   ;;  %1074 = vst.msk [vmem:[%s2545_s1 + $0x91] sm:$0x10] %vm3_vm0, %v566_v10  }
  0xd2   :  { %1075 = vst.msk [vmem:[%s2545_s1 + $0xb0] sm:$0x20] %vm3_vm0, %v566_v10   ;;  %1076 = vst.msk [vmem:[%s2545_s1 + $0xcf] sm:$0x40] %vm3_vm0, %v566_v10  }
  0xd3   :  { %1077 = vst.msk [vmem:[%s2545_s1 + $0xee] sm:$0x80] %vm3_vm0, %v566_v10   ;;  %1089 = vst.msk [vmem:[%s2545_s1 + $0x116] sm:$0x1] %vm3_vm0, %v614_v11  }
  0xd4   :  { %1080 = vst.msk [vmem:[%s2545_s1 + $0x16] sm:$0x1] %vm3_vm0, %v593_v12   ;;  %1081 = vst.msk [vmem:[%s2545_s1 + $0x35] sm:$0x2] %vm3_vm0, %v593_v12   ;;  %v695_v17 = vpop.permute.xlu1 %694   ;;  %v674_v18 = vpop.permute.xlu0 %673  }
  0xd5   :  { %1082 = vst.msk [vmem:[%s2545_s1 + $0x54] sm:$0x4] %vm3_vm0, %v593_v12   ;;  %1083 = vst.msk [vmem:[%s2545_s1 + $0x73] sm:$0x8] %vm3_vm0, %v593_v12  }
  0xd6   :  { %1084 = vst.msk [vmem:[%s2545_s1 + $0x92] sm:$0x10] %vm3_vm0, %v593_v12   ;;  %1085 = vst.msk [vmem:[%s2545_s1 + $0xb1] sm:$0x20] %vm3_vm0, %v593_v12  }
  0xd7   :  { %1086 = vst.msk [vmem:[%s2545_s1 + $0xd0] sm:$0x40] %vm3_vm0, %v593_v12   ;;  %1087 = vst.msk [vmem:[%s2545_s1 + $0xef] sm:$0x80] %vm3_vm0, %v593_v12  }
  0xd8   :  { %1099 = vst.msk [vmem:[%s2545_s1 + $0x117] sm:$0x1] %vm3_vm0, %v641_v13   ;;  %1090 = vst.msk [vmem:[%s2545_s1 + $0x17] sm:$0x1] %vm3_vm0, %v620_v14   ;;  %v722_v19 = vpop.permute.xlu1 %721   ;;  %v701_v20 = vpop.permute.xlu0 %700  }
  0xd9   :  { %1091 = vst.msk [vmem:[%s2545_s1 + $0x36] sm:$0x2] %vm3_vm0, %v620_v14   ;;  %1092 = vst.msk [vmem:[%s2545_s1 + $0x55] sm:$0x4] %vm3_vm0, %v620_v14  }
  0xda   :  { %1093 = vst.msk [vmem:[%s2545_s1 + $0x74] sm:$0x8] %vm3_vm0, %v620_v14   ;;  %1094 = vst.msk [vmem:[%s2545_s1 + $0x93] sm:$0x10] %vm3_vm0, %v620_v14  }
  0xdb   :  { %1095 = vst.msk [vmem:[%s2545_s1 + $0xb2] sm:$0x20] %vm3_vm0, %v620_v14   ;;  %1096 = vst.msk [vmem:[%s2545_s1 + $0xd1] sm:$0x40] %vm3_vm0, %v620_v14  }
  0xdc   :  { %1097 = vst.msk [vmem:[%s2545_s1 + $0xf0] sm:$0x80] %vm3_vm0, %v620_v14   ;;  %1109 = vst.msk [vmem:[%s2545_s1 + $0x118] sm:$0x1] %vm3_vm0, %v668_v15   ;;  %v749_v21 = vpop.permute.xlu1 %748   ;;  %v728_v22 = vpop.permute.xlu0 %727  }
  0xdd   :  { %1100 = vst.msk [vmem:[%s2545_s1 + $0x18] sm:$0x1] %vm3_vm0, %v647_v16   ;;  %1101 = vst.msk [vmem:[%s2545_s1 + $0x37] sm:$0x2] %vm3_vm0, %v647_v16  }
  0xde   :  { %1102 = vst.msk [vmem:[%s2545_s1 + $0x56] sm:$0x4] %vm3_vm0, %v647_v16   ;;  %1103 = vst.msk [vmem:[%s2545_s1 + $0x75] sm:$0x8] %vm3_vm0, %v647_v16  }
  0xdf   :  { %1104 = vst.msk [vmem:[%s2545_s1 + $0x94] sm:$0x10] %vm3_vm0, %v647_v16   ;;  %1105 = vst.msk [vmem:[%s2545_s1 + $0xb3] sm:$0x20] %vm3_vm0, %v647_v16  }
  0xe0   :  { %1106 = vst.msk [vmem:[%s2545_s1 + $0xd2] sm:$0x40] %vm3_vm0, %v647_v16   ;;  %1107 = vst.msk [vmem:[%s2545_s1 + $0xf1] sm:$0x80] %vm3_vm0, %v647_v16   ;;  %v776_v23 = vpop.permute.xlu1 %775   ;;  %v755_v24 = vpop.permute.xlu0 %754  }
  0xe1   :  { %1119 = vst.msk [vmem:[%s2545_s1 + $0x119] sm:$0x1] %vm3_vm0, %v695_v17   ;;  %1110 = vst.msk [vmem:[%s2545_s1 + $0x19] sm:$0x1] %vm3_vm0, %v674_v18  }
  0xe2   :  { %1111 = vst.msk [vmem:[%s2545_s1 + $0x38] sm:$0x2] %vm3_vm0, %v674_v18   ;;  %1112 = vst.msk [vmem:[%s2545_s1 + $0x57] sm:$0x4] %vm3_vm0, %v674_v18  }
  0xe3   :  { %1113 = vst.msk [vmem:[%s2545_s1 + $0x76] sm:$0x8] %vm3_vm0, %v674_v18   ;;  %1114 = vst.msk [vmem:[%s2545_s1 + $0x95] sm:$0x10] %vm3_vm0, %v674_v18  }
  0xe4   :  { %1115 = vst.msk [vmem:[%s2545_s1 + $0xb4] sm:$0x20] %vm3_vm0, %v674_v18   ;;  %1116 = vst.msk [vmem:[%s2545_s1 + $0xd3] sm:$0x40] %vm3_vm0, %v674_v18   ;;  %v803_v25 = vpop.permute.xlu1 %802   ;;  %v782_v26 = vpop.permute.xlu0 %781  }
  0xe5   :  { %1117 = vst.msk [vmem:[%s2545_s1 + $0xf2] sm:$0x80] %vm3_vm0, %v674_v18   ;;  %1129 = vst.msk [vmem:[%s2545_s1 + $0x11a] sm:$0x1] %vm3_vm0, %v722_v19  }
  0xe6   :  { %1120 = vst.msk [vmem:[%s2545_s1 + $0x1a] sm:$0x1] %vm3_vm0, %v701_v20   ;;  %1121 = vst.msk [vmem:[%s2545_s1 + $0x39] sm:$0x2] %vm3_vm0, %v701_v20  }
  0xe7   :  { %1122 = vst.msk [vmem:[%s2545_s1 + $0x58] sm:$0x4] %vm3_vm0, %v701_v20   ;;  %1123 = vst.msk [vmem:[%s2545_s1 + $0x77] sm:$0x8] %vm3_vm0, %v701_v20  }
  0xe8   :  { %1124 = vst.msk [vmem:[%s2545_s1 + $0x96] sm:$0x10] %vm3_vm0, %v701_v20   ;;  %1125 = vst.msk [vmem:[%s2545_s1 + $0xb5] sm:$0x20] %vm3_vm0, %v701_v20   ;;  %v830_v27 = vpop.permute.xlu1 %829   ;;  %v809_v28 = vpop.permute.xlu0 %808  }
  0xe9   :  { %1126 = vst.msk [vmem:[%s2545_s1 + $0xd4] sm:$0x40] %vm3_vm0, %v701_v20   ;;  %1127 = vst.msk [vmem:[%s2545_s1 + $0xf3] sm:$0x80] %vm3_vm0, %v701_v20  }
  0xea   :  { %1139 = vst.msk [vmem:[%s2545_s1 + $0x11b] sm:$0x1] %vm3_vm0, %v749_v21   ;;  %1130 = vst.msk [vmem:[%s2545_s1 + $0x1b] sm:$0x1] %vm3_vm0, %v728_v22  }
  0xeb   :  { %1131 = vst.msk [vmem:[%s2545_s1 + $0x3a] sm:$0x2] %vm3_vm0, %v728_v22   ;;  %1132 = vst.msk [vmem:[%s2545_s1 + $0x59] sm:$0x4] %vm3_vm0, %v728_v22  }
  0xec   :  { %1133 = vst.msk [vmem:[%s2545_s1 + $0x78] sm:$0x8] %vm3_vm0, %v728_v22   ;;  %1134 = vst.msk [vmem:[%s2545_s1 + $0x97] sm:$0x10] %vm3_vm0, %v728_v22   ;;  %v857_v29 = vpop.permute.xlu1 %856   ;;  %v836_v30 = vpop.permute.xlu0 %835  }
  0xed   :  { %1135 = vst.msk [vmem:[%s2545_s1 + $0xb6] sm:$0x20] %vm3_vm0, %v728_v22   ;;  %1136 = vst.msk [vmem:[%s2545_s1 + $0xd5] sm:$0x40] %vm3_vm0, %v728_v22  }
  0xee   :  { %1137 = vst.msk [vmem:[%s2545_s1 + $0xf4] sm:$0x80] %vm3_vm0, %v728_v22   ;;  %1149 = vst.msk [vmem:[%s2545_s1 + $0x11c] sm:$0x1] %vm3_vm0, %v776_v23  }
  0xef   :  { %1140 = vst.msk [vmem:[%s2545_s1 + $0x1c] sm:$0x1] %vm3_vm0, %v755_v24   ;;  %1141 = vst.msk [vmem:[%s2545_s1 + $0x3b] sm:$0x2] %vm3_vm0, %v755_v24  }
  0xf0   :  { %1142 = vst.msk [vmem:[%s2545_s1 + $0x5a] sm:$0x4] %vm3_vm0, %v755_v24   ;;  %1143 = vst.msk [vmem:[%s2545_s1 + $0x79] sm:$0x8] %vm3_vm0, %v755_v24  }
  0xf1   :  { %1144 = vst.msk [vmem:[%s2545_s1 + $0x98] sm:$0x10] %vm3_vm0, %v755_v24   ;;  %1145 = vst.msk [vmem:[%s2545_s1 + $0xb7] sm:$0x20] %vm3_vm0, %v755_v24  }
  0xf2   :  { %1146 = vst.msk [vmem:[%s2545_s1 + $0xd6] sm:$0x40] %vm3_vm0, %v755_v24   ;;  %1147 = vst.msk [vmem:[%s2545_s1 + $0xf5] sm:$0x80] %vm3_vm0, %v755_v24  }
  0xf3   :  { %1159 = vst.msk [vmem:[%s2545_s1 + $0x11d] sm:$0x1] %vm3_vm0, %v803_v25   ;;  %1150 = vst.msk [vmem:[%s2545_s1 + $0x1d] sm:$0x1] %vm3_vm0, %v782_v26  }
  0xf4   :  { %1151 = vst.msk [vmem:[%s2545_s1 + $0x3c] sm:$0x2] %vm3_vm0, %v782_v26   ;;  %1152 = vst.msk [vmem:[%s2545_s1 + $0x5b] sm:$0x4] %vm3_vm0, %v782_v26  }
  0xf5   :  { %1153 = vst.msk [vmem:[%s2545_s1 + $0x7a] sm:$0x8] %vm3_vm0, %v782_v26   ;;  %1154 = vst.msk [vmem:[%s2545_s1 + $0x99] sm:$0x10] %vm3_vm0, %v782_v26  }
  0xf6   :  { %1155 = vst.msk [vmem:[%s2545_s1 + $0xb8] sm:$0x20] %vm3_vm0, %v782_v26   ;;  %1156 = vst.msk [vmem:[%s2545_s1 + $0xd7] sm:$0x40] %vm3_vm0, %v782_v26  }
  0xf7   :  { %1157 = vst.msk [vmem:[%s2545_s1 + $0xf6] sm:$0x80] %vm3_vm0, %v782_v26   ;;  %1169 = vst.msk [vmem:[%s2545_s1 + $0x11e] sm:$0x1] %vm3_vm0, %v830_v27  }
  0xf8   :  { %1160 = vst.msk [vmem:[%s2545_s1 + $0x1e] sm:$0x1] %vm3_vm0, %v809_v28   ;;  %1161 = vst.msk [vmem:[%s2545_s1 + $0x3d] sm:$0x2] %vm3_vm0, %v809_v28  }
  0xf9   :  { %1162 = vst.msk [vmem:[%s2545_s1 + $0x5c] sm:$0x4] %vm3_vm0, %v809_v28   ;;  %1163 = vst.msk [vmem:[%s2545_s1 + $0x7b] sm:$0x8] %vm3_vm0, %v809_v28  }
  0xfa   :  { %1164 = vst.msk [vmem:[%s2545_s1 + $0x9a] sm:$0x10] %vm3_vm0, %v809_v28   ;;  %1165 = vst.msk [vmem:[%s2545_s1 + $0xb9] sm:$0x20] %vm3_vm0, %v809_v28  }
  0xfb   :  { %1166 = vst.msk [vmem:[%s2545_s1 + $0xd8] sm:$0x40] %vm3_vm0, %v809_v28   ;;  %1167 = vst.msk [vmem:[%s2545_s1 + $0xf7] sm:$0x80] %vm3_vm0, %v809_v28  }
  0xfc   :  { %1179 = vst.msk [vmem:[%s2545_s1 + $0x11f] sm:$0x1] %vm3_vm0, %v857_v29   ;;  %1170 = vst.msk [vmem:[%s2545_s1 + $0x1f] sm:$0x1] %vm3_vm0, %v836_v30  }
  0xfd   :  { %1171 = vst.msk [vmem:[%s2545_s1 + $0x3e] sm:$0x2] %vm3_vm0, %v836_v30   ;;  %1172 = vst.msk [vmem:[%s2545_s1 + $0x5d] sm:$0x4] %vm3_vm0, %v836_v30  }
  0xfe   :  { %1173 = vst.msk [vmem:[%s2545_s1 + $0x7c] sm:$0x8] %vm3_vm0, %v836_v30   ;;  %1174 = vst.msk [vmem:[%s2545_s1 + $0x9b] sm:$0x10] %vm3_vm0, %v836_v30  }
  0xff   :  { %1175 = vst.msk [vmem:[%s2545_s1 + $0xba] sm:$0x20] %vm3_vm0, %v836_v30   ;;  %1176 = vst.msk [vmem:[%s2545_s1 + $0xd9] sm:$0x40] %vm3_vm0, %v836_v30  }
 0x100   :  { %1177 = vst.msk [vmem:[%s2545_s1 + $0xf8] sm:$0x80] %vm3_vm0, %v836_v30  }

// kernel: vitap_head_forward.1
= control target key start
LH: loop header
LB: loop body
LE: loop exit
PB: predicated region body
PF: predicated region fallthrough
CT: control target
= control target key end

     0   :  { %s6830_s0 = inlined_call_operand.vmem [shape: bf16[80,256], index: 0, kind: input, shape index: {}]   ;;  %s6831_s1 = inlined_call_operand.vmem [shape: bf16[1024,80], index: 1, kind: input, shape index: {}]   ;;  %s6832_s2 = inlined_call_operand.vmem [shape: bf16[352,1024], index: 2, kind: input, shape index: {}]   ;;  %s6833_s3 = inlined_call_operand.vmem [shape: f32[288,1], index: 3, kind: input, shape index: {}]   ;;  %s6834_s4 = inlined_call_operand.vmem [shape: f32[16,32], index: 4, kind: input, shape index: {}]   ;;  %s6835_s5 = inlined_call_operand.vmem [shape: f32[16,1], index: 5, kind: input, shape index: {}]   ;;  %s6836_s6 = inlined_call_operand.vmem [shape: f32[16,1], index: 6, kind: input, shape index: {}]   ;;  %s6837_s7 = inlined_call_operand.<no memory space> [shape: f32[1,1], index: 7, kind: input, shape index: {}]   ;;  %s6838_s8 = inlined_call_operand.vmem [shape: f32[8,256], index: 8, kind: output, shape index: {}]  }
   0x1   :  { %v13_v0 = vstv %s6837_s7 }
   0x2   :  { %14 = vst [vmem:[#allocation2] sm:$0x1] %v13_v0 }
   0x3   :  { %s5265_s29 = smov 0   ;;  %s5267_s30 = smov 0  }
   0x4   :  { %s5269_s9 = smov 0  }
   0x5 LB: > { %s4452_s7 = sadd.s32 4294967295, %s5214_s9   ;;  %s5282_s10 = sadd.s32 1, %s5214_s9   ;;  %s5214_s9 = sphi %s5269_s9, %s6847_s9   ;;  %s5210_s30 = sphi %s5267_s30, %s6846_s30   ;;  %s5206_s29 = sphi %s5265_s29, %s6845_s29  }
   0x6   : > { %s24_s11 = ssub.s32 %s5214_s9, %s5282_s10  ;;  %s27_s12 = sadd.s32 1, %s5210_s30 }
   0x7   : > { %p25_p0 = scmp.eq.s32.totalorder %s24_s11, 0  ;;  %p34_p1 = scmp.ne.s32.totalorder %s5210_s30, %s5206_s29 }
   0x8   : > { %p35_p2 = scmp.eq.s32.totalorder %s5214_s9, 0  ;;  %p4455_p4 = scmp.ge.s32.totalorder %s5214_s9, 2 }
   0x9   : > { %s5291_s13 = scalar_select %p25_p0, %s5210_s30, %s27_s12  }
   0xa   : > { %p36_p3 = por %p35_p2, %p34_p1  ;;  %254 = sbr.rel (%p4455_p4) target bundleno = 28 (0x1c), region = 44 }
  0x11   : > { %257 = sbr.rel (!%p36_p3) target bundleno = 28 (0x1c), region = 48  ;;  %s259_s14 = sand.u32 (%p36_p3), 1, %s5210_s30  }
  0x12   : > { %s4456_s15 = sshll.u32 (%p36_p3), %s5214_s9, 2  ;;  %s5076_s16 = smul.u32 (%p36_p3), 40, %s259_s14 }
  0x13   : > { %s263_s19 = scalar_lea.vmem (%p36_p3), %s6830_s0, %s4456_s15 }
  0x14   : > { %v279_v1 = vld [vmem:[%s263_s19] sm:$0xf] (%p36_p3)  ;;  %v281_v2 = vld [vmem:[%s263_s19 + $0x8] sm:$0xf] (%p36_p3)  ;;  %v283_v3 = vld [vmem:[%s263_s19 + $0x10] sm:$0xf] (%p36_p3) }
  0x15   : > { %v285_v4 = vld [vmem:[%s263_s19 + $0x18] sm:$0xf] (%p36_p3)  ;;  %v287_v5 = vld [vmem:[%s263_s19 + $0x20] sm:$0xf] (%p36_p3)  ;;  %s261_s20 = scalar_lea.vmem (%p36_p3), [#allocation3], %s5076_s16 }
  0x16   : > { %280 = vst [vmem:[%s261_s20] sm:$0xf] (%p36_p3), %v279_v1  ;;  %282 = vst [vmem:[%s261_s20 + $0x4] sm:$0xf] (%p36_p3), %v281_v2  ;;  %v289_v6 = vld [vmem:[%s263_s19 + $0x28] sm:$0xf] (%p36_p3) }
  0x17   : > { %284 = vst [vmem:[%s261_s20 + $0x8] sm:$0xf] (%p36_p3), %v283_v3  ;;  %286 = vst [vmem:[%s261_s20 + $0xc] sm:$0xf] (%p36_p3), %v285_v4  ;;  %v291_v7 = vld [vmem:[%s263_s19 + $0x30] sm:$0xf] (%p36_p3) }
  0x18   : > { %288 = vst [vmem:[%s261_s20 + $0x10] sm:$0xf] %v287_v5  ;;  %v293_v8 = vld [vmem:[%s263_s19 + $0x38] sm:$0xf]  ;;  %290 = vst [vmem:[%s261_s20 + $0x14] sm:$0xf] %v289_v6 }
  0x19   : > { %292 = vst [vmem:[%s261_s20 + $0x18] sm:$0xf] %v291_v7  ;;  %294 = vst [vmem:[%s261_s20 + $0x1c] sm:$0xf] %v293_v8  ;;  %v295_v9 = vld [vmem:[%s263_s19 + $0x40] sm:$0xf] }
  0x1a   : > { %v297_v10 = vld [vmem:[%s263_s19 + $0x48] sm:$0xf]  ;;  %296 = vst [vmem:[%s261_s20 + $0x20] sm:$0xf] %v295_v9 }
  0x1b   : > { %298 = vst [vmem:[%s261_s20 + $0x24] sm:$0xf] %v297_v10 }
  0x1c PF: > { %p4457_p5 = scmp.ge.s32.totalorder %s5214_s9, 1  ;;  %p340_p6 = scmp.lt.s32.totalorder %s5214_s9, 3 }
  0x1e   : > { %p341_p7 = pnand %p4457_p5, %p340_p6 }
  0x20   : > { %344 = sbr.rel (%p341_p7) target bundleno = 1299 (0x513), region = 89 }
  0x27   : > { %s347_s21 = sand.u32 1, %s5206_s29   ;;  %v5110_v11 = vld [vmem:[%s6831_s1] sm:$0xff]   ;;  %vm872_vm0 = vcmask 654336   ;;  %v5111_v17 = vld [vmem:[%s6831_s1 + $0x8] sm:$0xff]   ;;  %v5112_v18 = vld [vmem:[%s6831_s1 + $0x10] sm:$0xff]   ;;  %v5216_v41 = vmov 0  }
  0x28   : > { %s5077_s24 = smul.u32 40, %s347_s21  ;;  %4857 = vmatprep.mubr.msk.bf16.mxu0 %vm872_vm0, %v5110_v11  ;;  %v5113_v19 = vld [vmem:[%s6831_s1 + $0x18] sm:$0xff]   ;;  %v5114_v20 = vld [vmem:[%s6831_s1 + $0x20] sm:$0xff]   ;;  %v5115_v21 = vld [vmem:[%s6831_s1 + $0x28] sm:$0xff]   ;;  %5004 = vmatprep.subr.bf16.mxu1 %v5216_v41  ;;  %vm4028_vm1 = vcmask 261120   ;;  %p379_p8 = scmp.lt.s32.totalorder %s4452_s7, 1 }
  0x29   : > { %v5116_v22 = vld [vmem:[%s6831_s1 + $0x30] sm:$0xff]   ;;  %v5117_v23 = vld [vmem:[%s6831_s1 + $0x38] sm:$0xff]   ;;  %v5118_v24 = vld [vmem:[%s6831_s1 + $0x40] sm:$0xff]   ;;  %5103 = vset.pattern.permute.xlu0 %v5216_v41  ;;  %5104 = vset.pattern.permute.xlu1 %v5216_v41 }
  0x2a   : > { %s349_s25 = scalar_lea.vmem [#allocation3], %s5077_s24  ;;  %v5119_v25 = vld [vmem:[%s6831_s1 + $0x48] sm:$0xff]   ;;  %v5120_v26 = vld [vmem:[%s6831_s1 + $0x50] sm:$0xff]   ;;  %v5121_v27 = vld [vmem:[%s6831_s1 + $0x58] sm:$0xff]   ;;  %s6849_s7 = smov (!%p379_p8, %s4452_s7), 1 }
  0x2b   : > { %v5105_v12 = vld [vmem:[%s349_s25] sm:$0xff]   ;;  %v5106_v13 = vld [vmem:[%s349_s25 + $0x8] sm:$0xff]   ;;  %v5107_v14 = vld [vmem:[%s349_s25 + $0x10] sm:$0xff]   ;;  %s4458_s11 = sshll.u32 %s6849_s7, 3 }
  0x2c   : > { %4847 = vmatprep.subr.bf16.mxu0 %v5105_v12  ;;  %v5108_v15 = vld [vmem:[%s349_s25 + $0x18] sm:$0xff]   ;;  %v5109_v16 = vld [vmem:[%s349_s25 + $0x20] sm:$0xff]   ;;  %s382_s15 = scalar_lea.vmem %s6838_s8, %s4458_s11 }
  0x2d   : > { %4848 = vmatpush3.bf16.msra.mxu0 %v5105_v12  ;;  %v5122_v28 = vld [vmem:[%s6831_s1 + $0x60] sm:$0xff]   ;;  %v5123_v29 = vld [vmem:[%s6831_s1 + $0x68] sm:$0xff]   ;;  %v5124_v30 = vld [vmem:[%s6831_s1 + $0x70] sm:$0xff]  }
  0x2e   : > { %4849 = vmatprep.subr.bf16.mxu0 %v5106_v13  ;;  %v5125_v31 = vld [vmem:[%s6831_s1 + $0x78] sm:$0xff]   ;;  %v5126_v32 = vld [vmem:[%s6831_s1 + $0x80] sm:$0xff]   ;;  %v5127_v33 = vld [vmem:[%s6831_s1 + $0x88] sm:$0xff]  }
  0x2f   : > { %v5128_v34 = vld [vmem:[%s6831_s1 + $0x90] sm:$0xff]   ;;  %v5129_v35 = vld [vmem:[%s6831_s1 + $0x98] sm:$0xff]   ;;  %v5130_v36 = vld [vmem:[%s6831_s1 + $0xa0] sm:$0xff]  }
  0x30   : > { %v5131_v37 = vld [vmem:[%s6831_s1 + $0xa8] sm:$0xff]   ;;  %v5132_v38 = vld [vmem:[%s6831_s1 + $0xb0] sm:$0xff]   ;;  %v5133_v39 = vld [vmem:[%s6831_s1 + $0xb8] sm:$0xff]  }
  0x31   : > { %4850 = vmatpush3.bf16.msra.mxu0 %v5106_v13  ;;  %v5134_v40 = vld [vmem:[%s6831_s1 + $0xc0] sm:$0xff]   ;;  %v5135_v42 = vld [vmem:[%s6831_s1 + $0xc8] sm:$0xff]   ;;  %v5136_v43 = vld [vmem:[%s6831_s1 + $0xd0] sm:$0xff]  }
  0x32   : > { %4851 = vmatprep.subr.bf16.mxu0 %v5107_v14  ;;  %v5137_v44 = vld [vmem:[%s6831_s1 + $0xd8] sm:$0xff]   ;;  %v5138_v45 = vld [vmem:[%s6831_s1 + $0xe0] sm:$0xff]   ;;  %v5139_v46 = vld [vmem:[%s6831_s1 + $0xe8] sm:$0xff]  }
  0x33   : > { %v5140_v47 = vld [vmem:[%s6831_s1 + $0xf0] sm:$0xff]   ;;  %v5141_v48 = vld [vmem:[%s6831_s1 + $0xf8] sm:$0xff]   ;;  %v5142_v49 = vld [vmem:[%s6831_s1 + $0x100] sm:$0xff]  }
  0x34   : > { %v5143_v50 = vld [vmem:[%s6831_s1 + $0x108] sm:$0xff]   ;;  %v5144_v51 = vld [vmem:[%s6831_s1 + $0x110] sm:$0xff]   ;;  %v5145_v52 = vld [vmem:[%s6831_s1 + $0x118] sm:$0xff]  }
  0x35   : > { %4852 = vmatpush3.bf16.msra.mxu0 %v5107_v14  ;;  %v5146_v53 = vld [vmem:[%s6831_s1 + $0x120] sm:$0xff]   ;;  %v5147_v54 = vld [vmem:[%s6831_s1 + $0x128] sm:$0xff]   ;;  %v5148_v55 = vld [vmem:[%s6831_s1 + $0x130] sm:$0xff]  }
  0x36   : > { %4853 = vmatprep.subr.bf16.mxu0 %v5108_v15  ;;  %v5149_v56 = vld [vmem:[%s6831_s1 + $0x138] sm:$0xff]   ;;  %v5150_v57 = vld [vmem:[%s6831_s1 + $0x140] sm:$0xff]   ;;  %v5151_v58 = vld [vmem:[%s6831_s1 + $0x148] sm:$0xff]  }
  0x37   : > { %v5152_v59 = vld [vmem:[%s6831_s1 + $0x150] sm:$0xff]   ;;  %v5153_v60 = vld [vmem:[%s6831_s1 + $0x158] sm:$0xff]   ;;  %v5154_v61 = vld [vmem:[%s6831_s1 + $0x160] sm:$0xff]  }
  0x38   : > { %v5155_v62 = vld [vmem:[%s6831_s1 + $0x168] sm:$0xff]   ;;  %v5156_v63 = vld [vmem:[%s6831_s1 + $0x170] sm:$0xff]   ;;  %v5157_v0 = vld [vmem:[%s6831_s1 + $0x178] sm:$0xff]  }
  0x39   : > { %4854 = vmatpush3.bf16.msra.mxu0 %v5108_v15  ;;  %v5158_v1 = vld [vmem:[%s6831_s1 + $0x180] sm:$0xff]   ;;  %v5159_v2 = vld [vmem:[%s6831_s1 + $0x188] sm:$0xff]   ;;  %v5160_v3 = vld [vmem:[%s6831_s1 + $0x190] sm:$0xff]  }
  0x3a   : > { %4855 = vmatprep.subr.bf16.mxu0 %v5109_v16  ;;  %v5161_v4 = vld [vmem:[%s6831_s1 + $0x198] sm:$0xff]   ;;  %v5162_v5 = vld [vmem:[%s6831_s1 + $0x1a0] sm:$0xff]   ;;  %v5163_v6 = vld [vmem:[%s6831_s1 + $0x1a8] sm:$0xff]  }
  0x3b   : > { %v5164_v7 = vld [vmem:[%s6831_s1 + $0x1b0] sm:$0xff]   ;;  %v5165_v10 = vld [vmem:[%s6831_s1 + $0x1b8] sm:$0xff]   ;;  %v5166_v12 = vld [vmem:[%s6831_s1 + $0x1c0] sm:$0xff]  }
  0x3d   : > { %4856 = vmatpush3.bf16.msra.mxu0 %v5109_v16  ;;  %v5535_v16 = vld [vmem:[%s6832_s2 + $0x208] sm:$0xff] }
  0x3e   : > { %2858 = vmatprep.subr.bf16.mxu0 %v5216_v41 }
  0x40   : > { %4858 = vmatmul.mubr.msk.bf16.vlgmr.msra.gmra.mrb[0].mxu0 %vm872_vm0, %v5111_v17 }
  0x41   : > { %4861 = vmatprep.mubr.msk.bf16.mxu0 %vm872_vm0, %v5112_v18 }
  0x48   : > { %4862 = vmatmul.mubr.msk.bf16.gmra.mrb[4].mxu0 %vm872_vm0, %v5113_v19  ;;  %v5540_v19 = vld [vmem:[%s6832_s2 + $0x228] sm:$0xff] }
  0x49   : > { %4865 = vmatprep.mubr.msk.bf16.mxu0 %vm872_vm0, %v5114_v20 }
  0x50   : > { %4866 = vmatmul.mubr.msk.bf16.gmra.mrb[8].mxu0 %vm872_vm0, %v5115_v21  ;;  %v4658_v21 = vcombine.low %v5535_v16, %v5540_v19 }
  0x51   : > { %4869 = vmatprep.mubr.msk.bf16.mxu0 %vm872_vm0, %v5116_v22  ;;  %v4659_v22 = vcombine.high %v5535_v16, %v5540_v19  ;;  %v1823_v16 = vld [vmem:[%s6832_s2 + $0x2a8] sm:$0xff] }
  0x53   : > { %3163 = vmatprep.mubr.bf16.mxu1 %v4659_v22 }
  0x58   : > { %4870 = vmatmul.mubr.msk.bf16.gmra.mrb[12].mxu0 %vm872_vm0, %v5117_v23 }
  0x59   : > { %4873 = vmatprep.mubr.msk.bf16.mxu0 %vm872_vm0, %v5118_v24 }
  0x60   : > { %4874 = vmatmul.mubr.msk.bf16.gmra.mrb[16].mxu0 %vm872_vm0, %v5119_v25 }
  0x61   : > { %4877 = vmatprep.mubr.msk.bf16.mxu0 %vm872_vm0, %v5120_v26  ;;  %v5167_v26 = vld [vmem:[%s6831_s1 + $0x1c8] sm:$0xff]  }
  0x68   : > { %4878 = vmatmul.mubr.msk.bf16.gmra.mrb[20].mxu0 %vm872_vm0, %v5121_v27 }
  0x69   : > { %4881 = vmatprep.mubr.msk.bf16.mxu0 %vm872_vm0, %v5122_v28  ;;  %v5168_v28 = vld [vmem:[%s6831_s1 + $0x1d0] sm:$0xff]  }
  0x70   : > { %4882 = vmatmul.mubr.msk.bf16.gmra.mrb[24].mxu0 %vm872_vm0, %v5123_v29 }
  0x71   : > { %4885 = vmatprep.mubr.msk.bf16.mxu0 %vm872_vm0, %v5124_v30 }
  0x78   : > { %4886 = vmatmul.mubr.msk.bf16.gmra.mrb[28].mxu0 %vm872_vm0, %v5125_v31 }
  0x79   : > { %4889 = vmatprep.mubr.msk.bf16.mxu0 %vm872_vm0, %v5126_v32 }
  0x80   : > { %4890 = vmatmul.mubr.msk.bf16.gmra.mrb[32].mxu0 %vm872_vm0, %v5127_v33 }
  0x81   : > { %4893 = vmatprep.mubr.msk.bf16.mxu0 %vm872_vm0, %v5128_v34 }
  0x88   : > { %4894 = vmatmul.mubr.msk.bf16.gmra.mrb[36].mxu0 %vm872_vm0, %v5129_v35 }
  0x89   : > { %4897 = vmatprep.mubr.msk.bf16.mxu0 %vm872_vm0, %v5130_v36 }
  0x90   : > { %4898 = vmatmul.mubr.msk.bf16.gmra.mrb[40].mxu0 %vm872_vm0, %v5131_v37 }
  0x91   : > { %4901 = vmatprep.mubr.msk.bf16.mxu0 %vm872_vm0, %v5132_v38  ;;  %v5169_v38 = vld [vmem:[%s6831_s1 + $0x1d8] sm:$0xff]  }
  0x98   : > { %4902 = vmatmul.mubr.msk.bf16.gmra.mrb[44].mxu0 %vm872_vm0, %v5133_v39 }
  0x99   : > { %4905 = vmatprep.mubr.msk.bf16.mxu0 %vm872_vm0, %v5134_v40  ;;  %v5170_v40 = vld [vmem:[%s6831_s1 + $0x1e0] sm:$0xff]  }
  0xa0   : > { %4906 = vmatmul.mubr.msk.bf16.gmra.mrb[48].mxu0 %vm872_vm0, %v5135_v42 }
  0xa1   : > { %4909 = vmatprep.mubr.msk.bf16.mxu0 %vm872_vm0, %v5136_v43 }
  0xa8   : > { %4910 = vmatmul.mubr.msk.bf16.gmra.mrb[52].mxu0 %vm872_vm0, %v5137_v44 }
  0xa9   : > { %4913 = vmatprep.mubr.msk.bf16.mxu0 %vm872_vm0, %v5138_v45 }
  0xb0   : > { %4914 = vmatmul.mubr.msk.bf16.gmra.mrb[56].mxu0 %vm872_vm0, %v5139_v46 }
  0xb1   : > { %4917 = vmatprep.mubr.msk.bf16.mxu0 %vm872_vm0, %v5140_v47 }
  0xb8   : > { %4918 = vmatmul.mubr.msk.bf16.gmra.mrb[60].mxu0 %vm872_vm0, %v5141_v48 }
  0xb9   : > { %4921 = vmatprep.mubr.msk.bf16.mxu0 %vm872_vm0, %v5142_v49 }
  0xc0   : > { %4922 = vmatmul.mubr.msk.bf16.gmra.mrb[64].mxu0 %vm872_vm0, %v5143_v50 }
  0xc1   : > { %4925 = vmatprep.mubr.msk.bf16.mxu0 %vm872_vm0, %v5144_v51  ;;  %v5171_v51 = vld [vmem:[%s6831_s1 + $0x1e8] sm:$0xff]  }
  0xc8   : > { %4926 = vmatmul.mubr.msk.bf16.gmra.mrb[68].mxu0 %vm872_vm0, %v5145_v52 }
  0xc9   : > { %4929 = vmatprep.mubr.msk.bf16.mxu0 %vm872_vm0, %v5146_v53  ;;  %v5172_v53 = vld [vmem:[%s6831_s1 + $0x1f0] sm:$0xff]  }
  0xd0   : > { %4930 = vmatmul.mubr.msk.bf16.gmra.mrb[72].mxu0 %vm872_vm0, %v5147_v54 }
  0xd1   : > { %4933 = vmatprep.mubr.msk.bf16.mxu0 %vm872_vm0, %v5148_v55 }
  0xd8   : > { %4934 = vmatmul.mubr.msk.bf16.gmra.mrb[76].mxu0 %vm872_vm0, %v5149_v56 }
  0xd9   : > { %4937 = vmatprep.mubr.msk.bf16.mxu0 %vm872_vm0, %v5150_v57 }
  0xe0   : > { %4938 = vmatmul.mubr.msk.bf16.gmra.mrb[80].mxu0 %vm872_vm0, %v5151_v58 }
  0xe1   : > { %4941 = vmatprep.mubr.msk.bf16.mxu0 %vm872_vm0, %v5152_v59 }
  0xe8   : > { %4942 = vmatmul.mubr.msk.bf16.gmra.mrb[84].mxu0 %vm872_vm0, %v5153_v60 }
  0xe9   : > { %4945 = vmatprep.mubr.msk.bf16.mxu0 %vm872_vm0, %v5154_v61  ;;  %v5581_v61 = vld [vmem:[%s6832_s2] sm:$0xff] }
  0xf0   : > { %4946 = vmatmul.mubr.msk.bf16.gmra.mrb[88].mxu0 %vm872_vm0, %v5155_v62  ;;  %v5586_v62 = vld [vmem:[%s6832_s2 + $0x20] sm:$0xff] }
  0xf1   : > { %4949 = vmatprep.mubr.msk.bf16.mxu0 %vm872_vm0, %v5156_v63 }
  0xf8   : > { %4950 = vmatmul.mubr.msk.bf16.gmra.mrb[92].mxu0 %vm872_vm0, %v5157_v0 }
  0xf9   : > { %4953 = vmatprep.mubr.msk.bf16.mxu0 %vm872_vm0, %v5158_v1  ;;  %v5173_v1 = vld [vmem:[%s6831_s1 + $0x1f8] sm:$0xff]  }
 0x100   : > { %4954 = vmatmul.mubr.msk.bf16.gmra.mrb[96].mxu0 %vm872_vm0, %v5159_v2 }
 0x101   : > { %4957 = vmatprep.mubr.msk.bf16.mxu0 %vm872_vm0, %v5160_v3  ;;  %v4593_v3 = vcombine.high %v5581_v61, %v5586_v62 }
 0x108   : > { %4958 = vmatmul.mubr.msk.bf16.gmra.mrb[100].mxu0 %vm872_vm0, %v5161_v4 }
 0x109   : > { %4961 = vmatprep.mubr.msk.bf16.mxu0 %vm872_vm0, %v5162_v5 }
 0x110   : > { %4962 = vmatmul.mubr.msk.bf16.gmra.mrb[104].mxu0 %vm872_vm0, %v5163_v6 }
 0x111   : > { %4965 = vmatprep.mubr.msk.bf16.mxu0 %vm872_vm0, %v5164_v7 }
 0x113   : > { %v4859_v8 = vpop.f32.mrb[0].mxu0 }
 0x114   : > { %v1099_v9 = vpop.f32.mrb[1].mxu0  ;;  %v1612_v13 = vmax.f32 %v4859_v8, 0.0 }
 0x115   : > { %v4860_v11 = vpop.f32.mrb[2].mxu0  ;;  %v1610_v17 = vmax.f32 %v1099_v9, 0.0 }
 0x116   : > { %v1613_v14 = vmax.f32 %v4860_v11, 0.0  ;;  %v1102_v15 = vpop.f32.mrb[3].mxu0 }
 0x117   : > { %v1611_v18 = vmax.f32 %v1102_v15, 0.0 }
 0x118   : > { %v1915_v20 = vpack.c.bf16 %v1613_v14, %v1612_v13  ;;  %4966 = vmatmul.mubr.msk.bf16.gmra.mrb[108].mxu0 %vm872_vm0, %v5165_v10 }
 0x119   : > { %v1914_v23 = vpack.c.bf16 %v1611_v18, %v1610_v17  ;;  %4969 = vmatprep.mubr.msk.bf16.mxu0 %vm872_vm0, %v5166_v12 }
 0x11b   : > { %v4863_v24 = vpop.f32.mrb[4].mxu0  ;;  %2859 = vmatpush1.bf16.msra.mxu0 %v1914_v23 }
 0x11c   : > { %v1115_v25 = vpop.f32.mrb[5].mxu0  ;;  %2860 = vmatprep.subr.bf16.mxu0 %v5216_v41  ;;  %v1616_v29 = vmax.f32 %v4863_v24, 0.0 }
 0x11d   : > { %v4864_v27 = vpop.f32.mrb[6].mxu0  ;;  %v1614_v32 = vmax.f32 %v1115_v25, 0.0 }
 0x11e   : > { %v1617_v30 = vmax.f32 %v4864_v27, 0.0  ;;  %v1118_v31 = vpop.f32.mrb[7].mxu0 }
 0x11f   : > { %v1615_v33 = vmax.f32 %v1118_v31, 0.0  ;;  %2861 = vmatpush1.bf16.msra.mxu0 %v1915_v20 }
 0x120   : > { %v1917_v34 = vpack.c.bf16 %v1617_v30, %v1616_v29  ;;  %2862 = vmatprep.subr.bf16.mxu0 %v5216_v41  ;;  %4970 = vmatmul.mubr.msk.bf16.gmra.mrb[112].mxu0 %vm872_vm0, %v5167_v26 }
 0x121   : > { %v1916_v35 = vpack.c.bf16 %v1615_v33, %v1614_v32  ;;  %4973 = vmatprep.mubr.msk.bf16.mxu0 %vm872_vm0, %v5168_v28 }
 0x123   : > { %v4867_v36 = vpop.f32.mrb[8].mxu0  ;;  %2863 = vmatpush1.bf16.msra.mxu0 %v1916_v35 }
 0x124   : > { %v1131_v37 = vpop.f32.mrb[9].mxu0  ;;  %2864 = vmatprep.subr.bf16.mxu0 %v5216_v41  ;;  %v1620_v42 = vmax.f32 %v4867_v36, 0.0 }
 0x125   : > { %v4868_v39 = vpop.f32.mrb[10].mxu0  ;;  %v1618_v45 = vmax.f32 %v1131_v37, 0.0 }
 0x126   : > { %v1621_v43 = vmax.f32 %v4868_v39, 0.0  ;;  %v1134_v44 = vpop.f32.mrb[11].mxu0 }
 0x127   : > { %v1619_v46 = vmax.f32 %v1134_v44, 0.0  ;;  %2865 = vmatpush1.bf16.msra.mxu0 %v1917_v34 }
 0x128   : > { %v1919_v47 = vpack.c.bf16 %v1621_v43, %v1620_v42  ;;  %2866 = vmatprep.subr.bf16.mxu0 %v5216_v41  ;;  %4974 = vmatmul.mubr.msk.bf16.gmra.mrb[116].mxu0 %vm872_vm0, %v5169_v38 }
 0x129   : > { %v1918_v48 = vpack.c.bf16 %v1619_v46, %v1618_v45  ;;  %4977 = vmatprep.mubr.msk.bf16.mxu0 %vm872_vm0, %v5170_v40 }
 0x12b   : > { %v4871_v49 = vpop.f32.mrb[12].mxu0  ;;  %2867 = vmatpush1.bf16.msra.mxu0 %v1918_v48 }
 0x12c   : > { %v1147_v50 = vpop.f32.mrb[13].mxu0  ;;  %2868 = vmatprep.subr.bf16.mxu0 %v5216_v41  ;;  %v1624_v54 = vmax.f32 %v4871_v49, 0.0 }
 0x12d   : > { %v4872_v52 = vpop.f32.mrb[14].mxu0  ;;  %v1622_v57 = vmax.f32 %v1147_v50, 0.0 }
 0x12e   : > { %v1625_v55 = vmax.f32 %v4872_v52, 0.0  ;;  %v1150_v56 = vpop.f32.mrb[15].mxu0  ;;  %v1746_v52 = vld [vmem:[%s6832_s2 + $0x40] sm:$0xff] }
 0x12f   : > { %v1623_v58 = vmax.f32 %v1150_v56, 0.0  ;;  %2869 = vmatpush1.bf16.msra.mxu0 %v1919_v47 }
 0x130   : > { %v1921_v59 = vpack.c.bf16 %v1625_v55, %v1624_v54  ;;  %2870 = vmatprep.subr.bf16.mxu0 %v5216_v41  ;;  %4978 = vmatmul.mubr.msk.bf16.gmra.mrb[120].mxu0 %vm872_vm0, %v5171_v51  ;;  %v4592_v51 = vcombine.low %v5581_v61, %v5586_v62 }
 0x131   : > { %v1920_v60 = vpack.c.bf16 %v1623_v58, %v1622_v57  ;;  %4981 = vmatprep.mubr.msk.bf16.mxu0 %vm872_vm0, %v5172_v53  ;;  %v1750_v53 = vld [vmem:[%s6832_s2 + $0x60] sm:$0xff] }
 0x132   : > { %v4601_v58 = vcombine.high %v1746_v52, %v1750_v53 }
 0x133   : > { %v4875_v63 = vpop.f32.mrb[16].mxu0  ;;  %2871 = vmatpush1.bf16.msra.mxu0 %v1920_v60 }
 0x134   : > { %v1163_v0 = vpop.f32.mrb[17].mxu0  ;;  %2872 = vmatprep.subr.bf16.mxu0 %v5216_v41  ;;  %v1628_v4 = vmax.f32 %v4875_v63, 0.0 }
 0x135   : > { %v4876_v2 = vpop.f32.mrb[18].mxu0  ;;  %v1626_v7 = vmax.f32 %v1163_v0, 0.0 }
 0x136   : > { %v1629_v5 = vmax.f32 %v4876_v2, 0.0  ;;  %v1166_v6 = vpop.f32.mrb[19].mxu0  ;;  %v1754_v2 = vld [vmem:[%s6832_s2 + $0x80] sm:$0xff] }
 0x137   : > { %v1627_v8 = vmax.f32 %v1166_v6, 0.0  ;;  %2873 = vmatpush1.bf16.msra.mxu0 %v1921_v59 }
 0x138   : > { %v1923_v9 = vpack.c.bf16 %v1629_v5, %v1628_v4  ;;  %2874 = vmatprep.subr.bf16.mxu0 %v5216_v41  ;;  %4982 = vmatmul.mubr.msk.bf16.gmra.mrb[124].mxu0 %vm872_vm0, %v5173_v1  ;;  %v4600_v1 = vcombine.low %v1746_v52, %v1750_v53 }
 0x139   : > { %v1922_v10 = vpack.c.bf16 %v1627_v8, %v1626_v7  ;;  %2890 = vmatprep.mubr.bf16.mxu0 %v4593_v3  ;;  %v1758_v3 = vld [vmem:[%s6832_s2 + $0xa0] sm:$0xff] }
 0x13a   : > { %v4609_v8 = vcombine.high %v1754_v2, %v1758_v3 }
 0x13b   : > { %v4879_v11 = vpop.f32.mrb[20].mxu0  ;;  %2875 = vmatpush1.bf16.msra.mxu0 %v1922_v10 }
 0x13c   : > { %v1179_v12 = vpop.f32.mrb[21].mxu0  ;;  %2876 = vmatprep.subr.bf16.mxu0 %v5216_v41  ;;  %v1632_v14 = vmax.f32 %v4879_v11, 0.0 }
 0x13d   : > { %v4880_v13 = vpop.f32.mrb[22].mxu0  ;;  %v1630_v18 = vmax.f32 %v1179_v12, 0.0 }
 0x13e   : > { %v1633_v15 = vmax.f32 %v4880_v13, 0.0  ;;  %v1182_v17 = vpop.f32.mrb[23].mxu0 }
 0x13f   : > { %v1631_v20 = vmax.f32 %v1182_v17, 0.0  ;;  %2877 = vmatpush1.bf16.msra.mxu0 %v1923_v9  ;;  %v1762_v17 = vld [vmem:[%s6832_s2 + $0xc0] sm:$0xff] }
 0x140   : > { %v1925_v22 = vpack.c.bf16 %v1633_v15, %v1632_v14  ;;  %2878 = vmatprep.subr.bf16.mxu0 %v5216_v41  ;;  %v4608_v15 = vcombine.low %v1754_v2, %v1758_v3 }
 0x141   : > { %v1924_v23 = vpack.c.bf16 %v1631_v20, %v1630_v18  ;;  %v1766_v18 = vld [vmem:[%s6832_s2 + $0xe0] sm:$0xff] }
 0x143   : > { %v4883_v24 = vpop.f32.mrb[24].mxu0  ;;  %2879 = vmatpush1.bf16.msra.mxu0 %v1924_v23 }
 0x144   : > { %v1195_v25 = vpop.f32.mrb[25].mxu0  ;;  %2880 = vmatprep.subr.bf16.mxu0 %v5216_v41  ;;  %v1636_v27 = vmax.f32 %v4883_v24, 0.0 }
 0x145   : > { %v4884_v26 = vpop.f32.mrb[26].mxu0  ;;  %v1634_v30 = vmax.f32 %v1195_v25, 0.0  ;;  %v4617_v25 = vcombine.high %v1762_v17, %v1766_v18 }
 0x146   : > { %v1637_v28 = vmax.f32 %v4884_v26, 0.0  ;;  %v1198_v29 = vpop.f32.mrb[27].mxu0 }
 0x147   : > { %v1635_v31 = vmax.f32 %v1198_v29, 0.0  ;;  %2881 = vmatpush1.bf16.msra.mxu0 %v1925_v22 }
 0x148   : > { %v1927_v32 = vpack.c.bf16 %v1637_v28, %v1636_v27  ;;  %2882 = vmatprep.subr.bf16.mxu0 %v5216_v41 }
 0x149   : > { %v1926_v33 = vpack.c.bf16 %v1635_v31, %v1634_v30 }
 0x14b   : > { %v4887_v34 = vpop.f32.mrb[28].mxu0  ;;  %2883 = vmatpush1.bf16.msra.mxu0 %v1926_v33  ;;  %v1770_v33 = vld [vmem:[%s6832_s2 + $0x100] sm:$0xff] }
 0x14c   : > { %v1211_v35 = vpop.f32.mrb[29].mxu0  ;;  %2884 = vmatprep.subr.bf16.mxu0 %v5216_v41  ;;  %v1640_v37 = vmax.f32 %v4887_v34, 0.0  ;;  %v1774_v34 = vld [vmem:[%s6832_s2 + $0x120] sm:$0xff] }
 0x14d   : > { %v4888_v36 = vpop.f32.mrb[30].mxu0  ;;  %v1638_v40 = vmax.f32 %v1211_v35, 0.0 }
 0x14e   : > { %v1641_v38 = vmax.f32 %v4888_v36, 0.0  ;;  %v1214_v39 = vpop.f32.mrb[31].mxu0 }
 0x14f   : > { %v1639_v42 = vmax.f32 %v1214_v39, 0.0  ;;  %2885 = vmatpush1.bf16.msra.mxu0 %v1927_v32  ;;  %v4616_v32 = vcombine.low %v1762_v17, %v1766_v18  ;;  %v4625_v39 = vcombine.high %v1770_v33, %v1774_v34 }
 0x150   : > { %v1929_v43 = vpack.c.bf16 %v1641_v38, %v1640_v37  ;;  %2886 = vmatprep.subr.bf16.mxu0 %v5216_v41 }
 0x151   : > { %v1928_v44 = vpack.c.bf16 %v1639_v42, %v1638_v40 }
 0x153   : > { %v4891_v45 = vpop.f32.mrb[32].mxu0  ;;  %2887 = vmatpush1.bf16.msra.mxu0 %v1928_v44 }
 0x154   : > { %v1227_v46 = vpop.f32.mrb[33].mxu0  ;;  %2888 = vmatprep.subr.bf16.mxu0 %v5216_v41  ;;  %v1644_v48 = vmax.f32 %v4891_v45, 0.0 }
 0x155   : > { %v4892_v47 = vpop.f32.mrb[34].mxu0  ;;  %v1642_v54 = vmax.f32 %v1227_v46, 0.0 }
 0x156   : > { %v1645_v49 = vmax.f32 %v4892_v47, 0.0  ;;  %v1230_v50 = vpop.f32.mrb[35].mxu0  ;;  %v4624_v47 = vcombine.low %v1770_v33, %v1774_v34 }
 0x157   : > { %v1643_v55 = vmax.f32 %v1230_v50, 0.0  ;;  %2889 = vmatpush1.bf16.msra.mxu0 %v1929_v43 }
 0x158   : > { %v1931_v56 = vpack.c.bf16 %v1645_v49, %v1644_v48  ;;  %3067 = vmatprep.subr.bf16.mxu0 %v5216_v41  ;;  %v1778_v48 = vld [vmem:[%s6832_s2 + $0x140] sm:$0xff] }
 0x159   : > { %v1930_v57 = vpack.c.bf16 %v1643_v55, %v1642_v54  ;;  %v1782_v49 = vld [vmem:[%s6832_s2 + $0x160] sm:$0xff] }
 0x15a   : > { %2891 = vmatmul.mubr.bf16.vlgmr.msra.gmra.mrb[128].mxu0 %v4592_v51  ;;  %v4633_v54 = vcombine.high %v1778_v48, %v1782_v49 }
 0x15b   : > { %v4895_v59 = vpop.f32.mrb[36].mxu0  ;;  %3068 = vmatpush1.bf16.msra.mxu0 %v1930_v57  ;;  %5020 = vmatpush1.bf16.msra.mxu1 %v1930_v57 }
 0x15c   : > { %v1243_v60 = vpop.f32.mrb[37].mxu0  ;;  %3069 = vmatprep.subr.bf16.mxu0 %v5216_v41  ;;  %5005 = vmatprep.subr.bf16.mxu1 %v5216_v41  ;;  %v1648_v62 = vmax.f32 %v4895_v59, 0.0 }
 0x15d   : > { %v4896_v61 = vpop.f32.mrb[38].mxu0  ;;  %2898 = vmatprep.mubr.bf16.mxu0 %v4601_v58  ;;  %v1646_v4 = vmax.f32 %v1243_v60, 0.0 }
 0x15e   : > { %v1649_v63 = vmax.f32 %v4896_v61, 0.0  ;;  %v1246_v0 = vpop.f32.mrb[39].mxu0  ;;  %v4632_v61 = vcombine.low %v1778_v48, %v1782_v49 }
 0x15f   : > { %v1647_v5 = vmax.f32 %v1246_v0, 0.0  ;;  %3070 = vmatpush1.bf16.msra.mxu0 %v1931_v56  ;;  %5021 = vmatpush1.bf16.msra.mxu1 %v1931_v56 }
 0x160   : > { %v1933_v6 = vpack.c.bf16 %v1649_v63, %v1648_v62  ;;  %3071 = vmatprep.subr.bf16.mxu0 %v5216_v41  ;;  %5006 = vmatprep.subr.bf16.mxu1 %v5216_v41  ;;  %v1786_v62 = vld [vmem:[%s6832_s2 + $0x180] sm:$0xff] }
 0x161   : > { %v1932_v7 = vpack.c.bf16 %v1647_v5, %v1646_v4  ;;  %v1790_v63 = vld [vmem:[%s6832_s2 + $0x1a0] sm:$0xff] }
 0x162   : > { %2899 = vmatmul.mubr.bf16.gmra.mrb[132].mxu0 %v4600_v1  ;;  %v4641_v4 = vcombine.high %v1786_v62, %v1790_v63 }
 0x163   : > { %v4899_v9 = vpop.f32.mrb[40].mxu0  ;;  %3072 = vmatpush1.bf16.msra.mxu0 %v1932_v7  ;;  %5022 = vmatpush1.bf16.msra.mxu1 %v1932_v7 }
 0x164   : > { %v1259_v10 = vpop.f32.mrb[41].mxu0  ;;  %3073 = vmatprep.subr.bf16.mxu0 %v5216_v41  ;;  %5007 = vmatprep.subr.bf16.mxu1 %v5216_v41  ;;  %v1652_v12 = vmax.f32 %v4899_v9, 0.0 }
 0x165   : > { %v4900_v11 = vpop.f32.mrb[42].mxu0  ;;  %2906 = vmatprep.mubr.bf16.mxu0 %v4609_v8  ;;  %v1650_v20 = vmax.f32 %v1259_v10, 0.0 }
 0x166   : > { %v1653_v13 = vmax.f32 %v4900_v11, 0.0  ;;  %v1262_v14 = vpop.f32.mrb[43].mxu0  ;;  %v4640_v11 = vcombine.low %v1786_v62, %v1790_v63 }
 0x167   : > { %v1651_v22 = vmax.f32 %v1262_v14, 0.0  ;;  %3074 = vmatpush1.bf16.msra.mxu0 %v1933_v6  ;;  %5023 = vmatpush1.bf16.msra.mxu1 %v1933_v6 }
 0x168   : > { %v1935_v23 = vpack.c.bf16 %v1653_v13, %v1652_v12  ;;  %3075 = vmatprep.subr.bf16.mxu0 %v5216_v41  ;;  %5008 = vmatprep.subr.bf16.mxu1 %v5216_v41  ;;  %v1794_v12 = vld [vmem:[%s6832_s2 + $0x1c0] sm:$0xff] }
 0x169   : > { %v1934_v24 = vpack.c.bf16 %v1651_v22, %v1650_v20  ;;  %v1798_v13 = vld [vmem:[%s6832_s2 + $0x1e0] sm:$0xff] }
 0x16a   : > { %2907 = vmatmul.mubr.bf16.gmra.mrb[136].mxu0 %v4608_v15  ;;  %v4649_v20 = vcombine.high %v1794_v12, %v1798_v13 }
 0x16b   : > { %v4903_v26 = vpop.f32.mrb[44].mxu0  ;;  %3076 = vmatpush1.bf16.msra.mxu0 %v1934_v24  ;;  %5024 = vmatpush1.bf16.msra.mxu1 %v1934_v24 }
 0x16c   : > { %v1275_v27 = vpop.f32.mrb[45].mxu0  ;;  %3077 = vmatprep.subr.bf16.mxu0 %v5216_v41  ;;  %5009 = vmatprep.subr.bf16.mxu1 %v5216_v41  ;;  %v1656_v29 = vmax.f32 %v4903_v26, 0.0 }
 0x16d   : > { %v4904_v28 = vpop.f32.mrb[46].mxu0  ;;  %2914 = vmatprep.mubr.bf16.mxu0 %v4617_v25  ;;  %v1654_v35 = vmax.f32 %v1275_v27, 0.0 }
 0x16e   : > { %v1657_v30 = vmax.f32 %v4904_v28, 0.0  ;;  %v1278_v31 = vpop.f32.mrb[47].mxu0  ;;  %v4648_v28 = vcombine.low %v1794_v12, %v1798_v13 }
 0x16f   : > { %v1655_v36 = vmax.f32 %v1278_v31, 0.0  ;;  %3078 = vmatpush1.bf16.msra.mxu0 %v1935_v23  ;;  %5025 = vmatpush1.bf16.msra.mxu1 %v1935_v23 }
 0x170   : > { %v1937_v37 = vpack.c.bf16 %v1657_v30, %v1656_v29  ;;  %3079 = vmatprep.subr.bf16.mxu0 %v5216_v41  ;;  %5010 = vmatprep.subr.bf16.mxu1 %v5216_v41  ;;  %v1802_v29 = vld [vmem:[%s6832_s2 + $0x200] sm:$0xff] }
 0x171   : > { %v1936_v38 = vpack.c.bf16 %v1655_v36, %v1654_v35  ;;  %v1806_v30 = vld [vmem:[%s6832_s2 + $0x220] sm:$0xff] }
 0x172   : > { %2915 = vmatmul.mubr.bf16.gmra.mrb[140].mxu0 %v4616_v32  ;;  %v4657_v35 = vcombine.high %v1802_v29, %v1806_v30  ;;  %v1810_v36 = vld [vmem:[%s6832_s2 + $0x240] sm:$0xff] }
 0x173   : > { %v4907_v40 = vpop.f32.mrb[48].mxu0  ;;  %3080 = vmatpush1.bf16.msra.mxu0 %v1936_v38  ;;  %5026 = vmatpush1.bf16.msra.mxu1 %v1936_v38  ;;  %v1814_v38 = vld [vmem:[%s6832_s2 + $0x260] sm:$0xff] }
 0x174   : > { %v1291_v42 = vpop.f32.mrb[49].mxu0  ;;  %3081 = vmatprep.subr.bf16.mxu0 %v5216_v41  ;;  %5011 = vmatprep.subr.bf16.mxu1 %v5216_v41  ;;  %v1660_v44 = vmax.f32 %v4907_v40, 0.0  ;;  %v1815_v40 = vld [vmem:[%s6832_s2 + $0x268] sm:$0xff]  ;;  %v4665_v49 = vcombine.high %v1810_v36, %v1814_v38 }
 0x175   : > { %v4908_v43 = vpop.f32.mrb[50].mxu0  ;;  %2922 = vmatprep.mubr.bf16.mxu0 %v4625_v39  ;;  %v1658_v50 = vmax.f32 %v1291_v42, 0.0  ;;  %v1811_v39 = vld [vmem:[%s6832_s2 + $0x248] sm:$0xff] }
 0x176   : > { %v1661_v45 = vmax.f32 %v4908_v43, 0.0  ;;  %v1294_v46 = vpop.f32.mrb[51].mxu0 }
 0x177   : > { %v1659_v51 = vmax.f32 %v1294_v46, 0.0  ;;  %3082 = vmatpush1.bf16.msra.mxu0 %v1937_v37  ;;  %5027 = vmatpush1.bf16.msra.mxu1 %v1937_v37  ;;  %v4656_v46 = vcombine.low %v1802_v29, %v1806_v30  ;;  %v1835_v29 = vld [vmem:[%s6832_s2 + $0x308] sm:$0xff] }
 0x178   : > { %v1939_v52 = vpack.c.bf16 %v1661_v45, %v1660_v44  ;;  %3083 = vmatprep.subr.bf16.mxu0 %v5216_v41  ;;  %5012 = vmatprep.subr.bf16.mxu1 %v5216_v41  ;;  %v1839_v30 = vld [vmem:[%s6832_s2 + $0x328] sm:$0xff] }
 0x179   : > { %v1938_v53 = vpack.c.bf16 %v1659_v51, %v1658_v50  ;;  %v4667_v50 = vcombine.high %v1811_v39, %v1815_v40 }
 0x17a   : > { %2923 = vmatmul.mubr.bf16.gmra.mrb[144].mxu0 %v4624_v47 }
 0x17b   : > { %v4911_v55 = vpop.f32.mrb[52].mxu0  ;;  %3084 = vmatpush1.bf16.msra.mxu0 %v1938_v53  ;;  %5028 = vmatpush1.bf16.msra.mxu1 %v1938_v53 }
 0x17c   : > { %v1307_v56 = vpop.f32.mrb[53].mxu0  ;;  %3085 = vmatprep.subr.bf16.mxu0 %v5216_v41  ;;  %5013 = vmatprep.subr.bf16.mxu1 %v5216_v41  ;;  %v1664_v58 = vmax.f32 %v4911_v55, 0.0 }
 0x17d   : > { %v4912_v57 = vpop.f32.mrb[54].mxu0  ;;  %2930 = vmatprep.mubr.bf16.mxu0 %v4633_v54  ;;  %v1662_v0 = vmax.f32 %v1307_v56, 0.0  ;;  %v1818_v54 = vld [vmem:[%s6832_s2 + $0x280] sm:$0xff] }
 0x17e   : > { %v1665_v59 = vmax.f32 %v4912_v57, 0.0  ;;  %v1310_v60 = vpop.f32.mrb[55].mxu0  ;;  %v1822_v56 = vld [vmem:[%s6832_s2 + $0x2a0] sm:$0xff]  ;;  %v1819_v57 = vld [vmem:[%s6832_s2 + $0x288] sm:$0xff] }
 0x17f   : > { %v1663_v1 = vmax.f32 %v1310_v60, 0.0  ;;  %3086 = vmatpush1.bf16.msra.mxu0 %v1939_v52  ;;  %5029 = vmatpush1.bf16.msra.mxu1 %v1939_v52  ;;  %v4664_v60 = vcombine.low %v1810_v36, %v1814_v38 }
 0x180   : > { %v1941_v2 = vpack.c.bf16 %v1665_v59, %v1664_v58  ;;  %3087 = vmatprep.subr.bf16.mxu0 %v5216_v41  ;;  %5014 = vmatprep.subr.bf16.mxu1 %v5216_v41 }
 0x181   : > { %v1940_v3 = vpack.c.bf16 %v1663_v1, %v1662_v0  ;;  %v4673_v0 = vcombine.high %v1818_v54, %v1822_v56  ;;  %v4675_v1 = vcombine.high %v1819_v57, %v1823_v16 }
 0x182   : > { %2931 = vmatmul.mubr.bf16.gmra.mrb[148].mxu0 %v4632_v61  ;;  %v4666_v61 = vcombine.low %v1811_v39, %v1815_v40  ;;  %v4691_v40 = vcombine.high %v1835_v29, %v1839_v30 }
 0x183   : > { %v4915_v5 = vpop.f32.mrb[56].mxu0  ;;  %3088 = vmatpush1.bf16.msra.mxu0 %v1940_v3  ;;  %5030 = vmatpush1.bf16.msra.mxu1 %v1940_v3 }
 0x184   : > { %v1323_v6 = vpop.f32.mrb[57].mxu0  ;;  %3089 = vmatprep.subr.bf16.mxu0 %v5216_v41  ;;  %5015 = vmatprep.subr.bf16.mxu1 %v5216_v41  ;;  %v1668_v8 = vmax.f32 %v4915_v5, 0.0  ;;  %v1826_v5 = vld [vmem:[%s6832_s2 + $0x2c0] sm:$0xff] }
 0x185   : > { %v4916_v7 = vpop.f32.mrb[58].mxu0  ;;  %2938 = vmatprep.mubr.bf16.mxu0 %v4641_v4  ;;  %v1666_v14 = vmax.f32 %v1323_v6, 0.0 }
 0x186   : > { %v1669_v9 = vmax.f32 %v4916_v7, 0.0  ;;  %v1326_v10 = vpop.f32.mrb[59].mxu0  ;;  %v1830_v7 = vld [vmem:[%s6832_s2 + $0x2e0] sm:$0xff] }
 0x187   : > { %v1667_v15 = vmax.f32 %v1326_v10, 0.0  ;;  %3090 = vmatpush1.bf16.msra.mxu0 %v1941_v2  ;;  %5031 = vmatpush1.bf16.msra.mxu1 %v1941_v2 }
 0x188   : > { %v1943_v17 = vpack.c.bf16 %v1669_v9, %v1668_v8  ;;  %3091 = vmatprep.subr.bf16.mxu0 %v5216_v41  ;;  %5016 = vmatprep.subr.bf16.mxu1 %v5216_v41  ;;  %v1827_v8 = vld [vmem:[%s6832_s2 + $0x2c8] sm:$0xff] }
 0x189   : > { %v1942_v18 = vpack.c.bf16 %v1667_v15, %v1666_v14  ;;  %v1831_v9 = vld [vmem:[%s6832_s2 + $0x2e8] sm:$0xff]  ;;  %v4672_v14 = vcombine.low %v1818_v54, %v1822_v56  ;;  %v4674_v15 = vcombine.low %v1819_v57, %v1823_v16 }
 0x18a   : > { %2939 = vmatmul.mubr.bf16.gmra.mrb[152].mxu0 %v4640_v11  ;;  %v4682_v36 = vcombine.low %v1827_v8, %v1831_v9 }
 0x18b   : > { %v4919_v22 = vpop.f32.mrb[60].mxu0  ;;  %3092 = vmatpush1.bf16.msra.mxu0 %v1942_v18  ;;  %5032 = vmatpush1.bf16.msra.mxu1 %v1942_v18 }
 0x18c   : > { %v1339_v23 = vpop.f32.mrb[61].mxu0  ;;  %3093 = vmatprep.subr.bf16.mxu0 %v5216_v41  ;;  %5017 = vmatprep.subr.bf16.mxu1 %v5216_v41  ;;  %v1672_v25 = vmax.f32 %v4919_v22, 0.0  ;;  %v4683_v22 = vcombine.high %v1827_v8, %v1831_v9 }
 0x18d   : > { %v4920_v24 = vpop.f32.mrb[62].mxu0  ;;  %2946 = vmatprep.mubr.bf16.mxu0 %v4649_v20  ;;  %v1670_v31 = vmax.f32 %v1339_v23, 0.0  ;;  %v4681_v20 = vcombine.high %v1826_v5, %v1830_v7 }
 0x18e   : > { %v1673_v26 = vmax.f32 %v4920_v24, 0.0  ;;  %v1342_v27 = vpop.f32.mrb[63].mxu0 }
 0x18f   : > { %v1671_v32 = vmax.f32 %v1342_v27, 0.0  ;;  %3094 = vmatpush1.bf16.msra.mxu0 %v1943_v17  ;;  %5033 = vmatpush1.bf16.msra.mxu1 %v1943_v17 }
 0x190   : > { %v1945_v33 = vpack.c.bf16 %v1673_v26, %v1672_v25  ;;  %3095 = vmatprep.subr.bf16.mxu0 %v5216_v41  ;;  %5018 = vmatprep.subr.bf16.mxu1 %v5216_v41  ;;  %v1834_v26 = vld [vmem:[%s6832_s2 + $0x300] sm:$0xff] }
 0x191   : > { %v1944_v34 = vpack.c.bf16 %v1671_v32, %v1670_v31 }
 0x192   : > { %2947 = vmatmul.mubr.bf16.gmra.mrb[156].mxu0 %v4648_v28  ;;  %v1838_v28 = vld [vmem:[%s6832_s2 + $0x320] sm:$0xff] }
 0x193   : > { %3096 = vmatpush1.bf16.msra.mxu0 %v1944_v34  ;;  %5034 = vmatpush1.bf16.msra.mxu1 %v1944_v34  ;;  %v4923_v37 = vpop.f32.mrb[64].mxu0  ;;  %v4689_v39 = vcombine.high %v1834_v26, %v1838_v28  ;;  %v4688_v54 = vcombine.low %v1834_v26, %v1838_v28 }
 0x194   : > { %3097 = vmatprep.subr.bf16.mxu0 %v5216_v41  ;;  %5019 = vmatprep.subr.bf16.mxu1 %v5216_v41  ;;  %v1676_v42 = vmax.f32 %v4923_v37, 0.0  ;;  %v1355_v43 = vpop.f32.mrb[65].mxu0 }
 0x195   : > { %2954 = vmatprep.mubr.bf16.mxu0 %v4657_v35  ;;  %v1674_v44 = vmax.f32 %v1355_v43, 0.0  ;;  %v4924_v45 = vpop.f32.mrb[66].mxu0  ;;  %v4680_v35 = vcombine.low %v1826_v5, %v1830_v7 }
 0x196   : > { %v1677_v47 = vmax.f32 %v4924_v45, 0.0  ;;  %v1358_v48 = vpop.f32.mrb[67].mxu0  ;;  %v1842_v45 = vld [vmem:[%s6832_s2 + $0x340] sm:$0xff] }
 0x197   : > { %3098 = vmatpush1.bf16.msra.mxu0 %v1945_v33  ;;  %5035 = vmatpush1.bf16.msra.mxu1 %v1945_v33  ;;  %v1675_v51 = vmax.f32 %v1358_v48, 0.0  ;;  %v1843_v48 = vld [vmem:[%s6832_s2 + $0x348] sm:$0xff] }
 0x198   : > { %v1947_v52 = vpack.c.bf16 %v1677_v47, %v1676_v42  ;;  %3276 = vmatprep.subr.bf16.mxu1 %v5216_v41  ;;  %v1846_v47 = vld [vmem:[%s6832_s2 + $0x360] sm:$0xff] }
 0x199   : > { %v1946_v53 = vpack.c.bf16 %v1675_v51, %v1674_v44  ;;  %v4697_v16 = vcombine.high %v1842_v45, %v1846_v47  ;;  %v4696_v5 = vcombine.low %v1842_v45, %v1846_v47 }
 0x19a   : > { %2955 = vmatmul.mubr.bf16.gmra.mrb[160].mxu0 %v4656_v46  ;;  %3164 = vmatmul.mubr.bf16.vlgmr.msra.gmra.mrb[0].mxu1 %v4658_v21 }
 0x19b   : > { %2962 = vmatprep.mubr.bf16.mxu0 %v4665_v49  ;;  %3171 = vmatprep.mubr.bf16.mxu1 %v4667_v50  ;;  %v4927_v55 = vpop.f32.mrb[68].mxu0  ;;  %v1847_v49 = vld [vmem:[%s6832_s2 + $0x368] sm:$0xff] }
 0x19c   : > { %v1680_v19 = vmax.f32 %v4927_v55, 0.0  ;;  %3277 = vmatpush1.bf16.msra.mxu1 %v1946_v53  ;;  %v1371_v21 = vpop.f32.mrb[69].mxu0  ;;  %v4690_v55 = vcombine.low %v1835_v29, %v1839_v30 }
 0x19d   : > { %v1678_v58 = vmax.f32 %v1371_v21, 0.0  ;;  %v4928_v59 = vpop.f32.mrb[70].mxu0  ;;  %3278 = vmatprep.subr.bf16.mxu1 %v5216_v41 }
 0x19e   : > { %v1681_v62 = vmax.f32 %v4928_v59, 0.0  ;;  %v1374_v63 = vpop.f32.mrb[71].mxu0 }
 0x19f   : > { %v1679_v2 = vmax.f32 %v1374_v63, 0.0  ;;  %v1851_v63 = vld [vmem:[%s6832_s2 + $0x388] sm:$0xff] }
 0x1a0   : > { %v1949_v3 = vpack.c.bf16 %v1681_v62, %v1680_v19  ;;  %3279 = vmatpush1.bf16.msra.mxu1 %v1947_v52  ;;  %v4699_v19 = vcombine.high %v1843_v48, %v1847_v49  ;;  %v1854_v62 = vld [vmem:[%s6832_s2 + $0x3a0] sm:$0xff] }
 0x1a1   : > { %v1948_v4 = vpack.c.bf16 %v1679_v2, %v1678_v58  ;;  %3280 = vmatprep.subr.bf16.mxu1 %v5216_v41 }
 0x1a2   : > { %2963 = vmatmul.mubr.bf16.gmra.mrb[164].mxu0 %v4664_v60  ;;  %3172 = vmatmul.mubr.bf16.gmra.mrb[4].mxu1 %v4666_v61  ;;  %v1850_v60 = vld [vmem:[%s6832_s2 + $0x380] sm:$0xff] }
 0x1a3   : > { %2970 = vmatprep.mubr.bf16.mxu0 %v4673_v0  ;;  %3179 = vmatprep.mubr.bf16.mxu1 %v4675_v1  ;;  %v4931_v6 = vpop.f32.mrb[72].mxu0  ;;  %v1855_v0 = vld [vmem:[%s6832_s2 + $0x3a8] sm:$0xff]  ;;  %v4705_v9 = vcombine.high %v1850_v60, %v1854_v62  ;;  %v4704_v26 = vcombine.low %v1850_v60, %v1854_v62 }
 0x1a4   : > { %v1684_v10 = vmax.f32 %v4931_v6, 0.0  ;;  %3281 = vmatpush1.bf16.msra.mxu1 %v1948_v4  ;;  %v1387_v11 = vpop.f32.mrb[73].mxu0  ;;  %v4698_v6 = vcombine.low %v1843_v48, %v1847_v49 }
 0x1a5   : > { %v1682_v12 = vmax.f32 %v1387_v11, 0.0  ;;  %v4932_v13 = vpop.f32.mrb[74].mxu0  ;;  %3282 = vmatprep.subr.bf16.mxu1 %v5216_v41 }
 0x1a6   : > { %v1685_v17 = vmax.f32 %v4932_v13, 0.0  ;;  %v1390_v18 = vpop.f32.mrb[75].mxu0 }
 0x1a7   : > { %v1683_v23 = vmax.f32 %v1390_v18, 0.0  ;;  %v1859_v18 = vld [vmem:[%s6832_s2 + $0x3c8] sm:$0xff] }
 0x1a8   : > { %v1951_v24 = vpack.c.bf16 %v1685_v17, %v1684_v10  ;;  %3283 = vmatpush1.bf16.msra.mxu1 %v1949_v3  ;;  %v4707_v10 = vcombine.high %v1851_v63, %v1855_v0  ;;  %v1862_v17 = vld [vmem:[%s6832_s2 + $0x3e0] sm:$0xff] }
 0x1a9   : > { %v1950_v25 = vpack.c.bf16 %v1683_v23, %v1682_v12  ;;  %3284 = vmatprep.subr.bf16.mxu1 %v5216_v41 }
 0x1aa   : > { %2971 = vmatmul.mubr.bf16.gmra.mrb[168].mxu0 %v4672_v14  ;;  %3180 = vmatmul.mubr.bf16.gmra.mrb[8].mxu1 %v4674_v15  ;;  %v1858_v14 = vld [vmem:[%s6832_s2 + $0x3c0] sm:$0xff] }
 0x1ab   : > { %2978 = vmatprep.mubr.bf16.mxu0 %v4681_v20  ;;  %3187 = vmatprep.mubr.bf16.mxu1 %v4683_v22  ;;  %v4935_v27 = vpop.f32.mrb[76].mxu0  ;;  %v1863_v20 = vld [vmem:[%s6832_s2 + $0x3e8] sm:$0xff]  ;;  %v4713_v30 = vcombine.high %v1858_v14, %v1862_v17  ;;  %v4712_v45 = vcombine.low %v1858_v14, %v1862_v17 }
 0x1ac   : > { %v1688_v31 = vmax.f32 %v4935_v27, 0.0  ;;  %3285 = vmatpush1.bf16.msra.mxu1 %v1950_v25  ;;  %v1403_v32 = vpop.f32.mrb[77].mxu0  ;;  %v4706_v27 = vcombine.low %v1851_v63, %v1855_v0 }
 0x1ad   : > { %v1686_v33 = vmax.f32 %v1403_v32, 0.0  ;;  %v4936_v34 = vpop.f32.mrb[78].mxu0  ;;  %3286 = vmatprep.subr.bf16.mxu1 %v5216_v41 }
 0x1ae   : > { %v1689_v37 = vmax.f32 %v4936_v34, 0.0  ;;  %v1406_v38 = vpop.f32.mrb[79].mxu0 }
 0x1af   : > { %v1687_v42 = vmax.f32 %v1406_v38, 0.0  ;;  %v1867_v38 = vld [vmem:[%s6832_s2 + $0x408] sm:$0xff] }
 0x1b0   : > { %v1953_v43 = vpack.c.bf16 %v1689_v37, %v1688_v31  ;;  %3287 = vmatpush1.bf16.msra.mxu1 %v1951_v24  ;;  %v4715_v31 = vcombine.high %v1859_v18, %v1863_v20  ;;  %v1870_v37 = vld [vmem:[%s6832_s2 + $0x420] sm:$0xff] }
 0x1b1   : > { %v1952_v44 = vpack.c.bf16 %v1687_v42, %v1686_v33  ;;  %3288 = vmatprep.subr.bf16.mxu1 %v5216_v41 }
 0x1b2   : > { %2979 = vmatmul.mubr.bf16.gmra.mrb[172].mxu0 %v4680_v35  ;;  %3188 = vmatmul.mubr.bf16.gmra.mrb[12].mxu1 %v4682_v36  ;;  %v1866_v35 = vld [vmem:[%s6832_s2 + $0x400] sm:$0xff] }
 0x1b3   : > { %2986 = vmatprep.mubr.bf16.mxu0 %v4689_v39  ;;  %3195 = vmatprep.mubr.bf16.mxu1 %v4691_v40  ;;  %v4939_v46 = vpop.f32.mrb[80].mxu0  ;;  %v1871_v39 = vld [vmem:[%s6832_s2 + $0x428] sm:$0xff]  ;;  %v4721_v49 = vcombine.high %v1866_v35, %v1870_v37  ;;  %v4720_v60 = vcombine.low %v1866_v35, %v1870_v37 }
 0x1b4   : > { %v1692_v50 = vmax.f32 %v4939_v46, 0.0  ;;  %3289 = vmatpush1.bf16.msra.mxu1 %v1952_v44  ;;  %v1419_v51 = vpop.f32.mrb[81].mxu0  ;;  %v4714_v46 = vcombine.low %v1859_v18, %v1863_v20 }
 0x1b5   : > { %v1690_v52 = vmax.f32 %v1419_v51, 0.0  ;;  %v4940_v53 = vpop.f32.mrb[82].mxu0  ;;  %3290 = vmatprep.subr.bf16.mxu1 %v5216_v41 }
 0x1b6   : > { %v1693_v56 = vmax.f32 %v4940_v53, 0.0  ;;  %v1422_v57 = vpop.f32.mrb[83].mxu0 }
 0x1b7   : > { %v1691_v21 = vmax.f32 %v1422_v57, 0.0  ;;  %v1875_v57 = vld [vmem:[%s6832_s2 + $0x448] sm:$0xff] }
 0x1b8   : > { %v1955_v58 = vpack.c.bf16 %v1693_v56, %v1692_v50  ;;  %3291 = vmatpush1.bf16.msra.mxu1 %v1953_v43  ;;  %v4723_v50 = vcombine.high %v1867_v38, %v1871_v39  ;;  %v1878_v56 = vld [vmem:[%s6832_s2 + $0x460] sm:$0xff] }
 0x1b9   : > { %v1954_v59 = vpack.c.bf16 %v1691_v21, %v1690_v52  ;;  %3292 = vmatprep.subr.bf16.mxu1 %v5216_v41 }
 0x1ba   : > { %2987 = vmatmul.mubr.bf16.gmra.mrb[176].mxu0 %v4688_v54  ;;  %3196 = vmatmul.mubr.bf16.gmra.mrb[16].mxu1 %v4690_v55  ;;  %v1874_v54 = vld [vmem:[%s6832_s2 + $0x440] sm:$0xff] }
 0x1bb   : > { %2994 = vmatprep.mubr.bf16.mxu0 %v4697_v16  ;;  %3203 = vmatprep.mubr.bf16.mxu1 %v4699_v19  ;;  %v4943_v61 = vpop.f32.mrb[84].mxu0  ;;  %v1879_v16 = vld [vmem:[%s6832_s2 + $0x468] sm:$0xff]  ;;  %v4729_v0 = vcombine.high %v1874_v54, %v1878_v56  ;;  %v4728_v14 = vcombine.low %v1874_v54, %v1878_v56 }
 0x1bc   : > { %v1696_v1 = vmax.f32 %v4943_v61, 0.0  ;;  %3293 = vmatpush1.bf16.msra.mxu1 %v1954_v59  ;;  %v1435_v2 = vpop.f32.mrb[85].mxu0  ;;  %v4722_v61 = vcombine.low %v1867_v38, %v1871_v39 }
 0x1bd   : > { %v1694_v3 = vmax.f32 %v1435_v2, 0.0  ;;  %v4944_v4 = vpop.f32.mrb[86].mxu0  ;;  %3294 = vmatprep.subr.bf16.mxu1 %v5216_v41 }
 0x1be   : > { %v1697_v7 = vmax.f32 %v4944_v4, 0.0  ;;  %v1438_v8 = vpop.f32.mrb[87].mxu0 }
 0x1bf   : > { %v1695_v11 = vmax.f32 %v1438_v8, 0.0  ;;  %v1883_v8 = vld [vmem:[%s6832_s2 + $0x488] sm:$0xff] }
 0x1c0   : > { %v1957_v12 = vpack.c.bf16 %v1697_v7, %v1696_v1  ;;  %3295 = vmatpush1.bf16.msra.mxu1 %v1955_v58  ;;  %v4731_v1 = vcombine.high %v1875_v57, %v1879_v16  ;;  %v1886_v7 = vld [vmem:[%s6832_s2 + $0x4a0] sm:$0xff] }
 0x1c1   : > { %v1956_v13 = vpack.c.bf16 %v1695_v11, %v1694_v3  ;;  %3296 = vmatprep.subr.bf16.mxu1 %v5216_v41 }
 0x1c2   : > { %2995 = vmatmul.mubr.bf16.gmra.mrb[180].mxu0 %v4696_v5  ;;  %3204 = vmatmul.mubr.bf16.gmra.mrb[20].mxu1 %v4698_v6  ;;  %v1882_v5 = vld [vmem:[%s6832_s2 + $0x480] sm:$0xff] }
 0x1c3   : > { %3002 = vmatprep.mubr.bf16.mxu0 %v4705_v9  ;;  %3211 = vmatprep.mubr.bf16.mxu1 %v4707_v10  ;;  %v4947_v15 = vpop.f32.mrb[88].mxu0  ;;  %v1887_v9 = vld [vmem:[%s6832_s2 + $0x4a8] sm:$0xff]  ;;  %v4737_v20 = vcombine.high %v1882_v5, %v1886_v7  ;;  %v4736_v35 = vcombine.low %v1882_v5, %v1886_v7 }
 0x1c4   : > { %v1700_v22 = vmax.f32 %v4947_v15, 0.0  ;;  %3297 = vmatpush1.bf16.msra.mxu1 %v1956_v13  ;;  %v1451_v23 = vpop.f32.mrb[89].mxu0  ;;  %v4730_v15 = vcombine.low %v1875_v57, %v1879_v16 }
 0x1c5   : > { %v1698_v24 = vmax.f32 %v1451_v23, 0.0  ;;  %v4948_v25 = vpop.f32.mrb[90].mxu0  ;;  %3298 = vmatprep.subr.bf16.mxu1 %v5216_v41 }
 0x1c6   : > { %v1701_v28 = vmax.f32 %v4948_v25, 0.0  ;;  %v1454_v29 = vpop.f32.mrb[91].mxu0 }
 0x1c7   : > { %v1699_v32 = vmax.f32 %v1454_v29, 0.0  ;;  %v1891_v29 = vld [vmem:[%s6832_s2 + $0x4c8] sm:$0xff] }
 0x1c8   : > { %v1959_v33 = vpack.c.bf16 %v1701_v28, %v1700_v22  ;;  %3299 = vmatpush1.bf16.msra.mxu1 %v1957_v12  ;;  %v4739_v22 = vcombine.high %v1883_v8, %v1887_v9  ;;  %v1894_v28 = vld [vmem:[%s6832_s2 + $0x4e0] sm:$0xff] }
 0x1c9   : > { %v1958_v34 = vpack.c.bf16 %v1699_v32, %v1698_v24  ;;  %3300 = vmatprep.subr.bf16.mxu1 %v5216_v41 }
 0x1ca   : > { %3003 = vmatmul.mubr.bf16.gmra.mrb[184].mxu0 %v4704_v26  ;;  %3212 = vmatmul.mubr.bf16.gmra.mrb[24].mxu1 %v4706_v27  ;;  %v1890_v26 = vld [vmem:[%s6832_s2 + $0x4c0] sm:$0xff] }
 0x1cb   : > { %3010 = vmatprep.mubr.bf16.mxu0 %v4713_v30  ;;  %3219 = vmatprep.mubr.bf16.mxu1 %v4715_v31  ;;  %v4951_v36 = vpop.f32.mrb[92].mxu0  ;;  %v1895_v30 = vld [vmem:[%s6832_s2 + $0x4e8] sm:$0xff]  ;;  %v4745_v39 = vcombine.high %v1890_v26, %v1894_v28  ;;  %v4744_v54 = vcombine.low %v1890_v26, %v1894_v28 }
 0x1cc   : > { %v1704_v40 = vmax.f32 %v4951_v36, 0.0  ;;  %3301 = vmatpush1.bf16.msra.mxu1 %v1958_v34  ;;  %v1467_v42 = vpop.f32.mrb[93].mxu0  ;;  %v4738_v36 = vcombine.low %v1883_v8, %v1887_v9 }
 0x1cd   : > { %v1702_v43 = vmax.f32 %v1467_v42, 0.0  ;;  %v4952_v44 = vpop.f32.mrb[94].mxu0  ;;  %3302 = vmatprep.subr.bf16.mxu1 %v5216_v41 }
 0x1ce   : > { %v1705_v47 = vmax.f32 %v4952_v44, 0.0  ;;  %v1470_v48 = vpop.f32.mrb[95].mxu0 }
 0x1cf   : > { %v1703_v51 = vmax.f32 %v1470_v48, 0.0  ;;  %v1899_v48 = vld [vmem:[%s6832_s2 + $0x508] sm:$0xff] }
 0x1d0   : > { %v1961_v52 = vpack.c.bf16 %v1705_v47, %v1704_v40  ;;  %3303 = vmatpush1.bf16.msra.mxu1 %v1959_v33  ;;  %v4747_v40 = vcombine.high %v1891_v29, %v1895_v30  ;;  %v1902_v47 = vld [vmem:[%s6832_s2 + $0x520] sm:$0xff] }
 0x1d1   : > { %v1960_v53 = vpack.c.bf16 %v1703_v51, %v1702_v43  ;;  %3304 = vmatprep.subr.bf16.mxu1 %v5216_v41 }
 0x1d2   : > { %3011 = vmatmul.mubr.bf16.gmra.mrb[188].mxu0 %v4712_v45  ;;  %3220 = vmatmul.mubr.bf16.gmra.mrb[28].mxu1 %v4714_v46  ;;  %v1898_v45 = vld [vmem:[%s6832_s2 + $0x500] sm:$0xff] }
 0x1d3   : > { %3018 = vmatprep.mubr.bf16.mxu0 %v4721_v49  ;;  %3227 = vmatprep.mubr.bf16.mxu1 %v4723_v50  ;;  %v4955_v55 = vpop.f32.mrb[96].mxu0  ;;  %v1903_v49 = vld [vmem:[%s6832_s2 + $0x528] sm:$0xff]  ;;  %v4753_v16 = vcombine.high %v1898_v45, %v1902_v47  ;;  %v4752_v7 = vcombine.low %v1898_v45, %v1902_v47  ;;  %v1748_v45 = vld [vmem:[%s6832_s2 + $0x50] sm:$0xff] }
 0x1d4   : > { %3305 = vmatpush1.bf16.msra.mxu1 %v1960_v53  ;;  %v1708_v19 = vmax.f32 %v4955_v55, 0.0  ;;  %v1483_v21 = vpop.f32.mrb[97].mxu0  ;;  %v4746_v55 = vcombine.low %v1891_v29, %v1895_v30  ;;  %v4754_v8 = vcombine.low %v1899_v48, %v1903_v49 }
 0x1d5   : > { %3306 = vmatprep.subr.bf16.mxu1 %v5216_v41  ;;  %v1706_v58 = vmax.f32 %v1483_v21, 0.0  ;;  %v4956_v59 = vpop.f32.mrb[98].mxu0 }
 0x1d6   : > { %v1709_v62 = vmax.f32 %v4956_v59, 0.0  ;;  %v1486_v63 = vpop.f32.mrb[99].mxu0 }
 0x1d7   : > { %v1707_v2 = vmax.f32 %v1486_v63, 0.0  ;;  %v1907_v63 = vld [vmem:[%s6832_s2 + $0x548] sm:$0xff] }
 0x1d8   : > { %3307 = vmatpush1.bf16.msra.mxu1 %v1961_v52  ;;  %v5811_v3 = vpack.c.bf16 %v1709_v62, %v1708_v19  ;;  %v4755_v19 = vcombine.high %v1899_v48, %v1903_v49  ;;  %v1910_v62 = vld [vmem:[%s6832_s2 + $0x560] sm:$0xff] }
 0x1d9   : > { %v5813_v4 = vpack.c.bf16 %v1707_v2, %v1706_v58  ;;  %3485 = vmatprep.subr.bf16.mxu1 %v5216_v41 }
 0x1da   : > { %3019 = vmatmul.mubr.bf16.gmra.mrb[192].mxu0 %v4720_v60  ;;  %3228 = vmatmul.mubr.bf16.gmra.mrb[32].mxu1 %v4722_v61  ;;  %v1906_v60 = vld [vmem:[%s6832_s2 + $0x540] sm:$0xff] }
 0x1db   : > { %3026 = vmatprep.mubr.bf16.mxu0 %v4729_v0  ;;  %3235 = vmatprep.mubr.bf16.mxu1 %v4731_v1  ;;  %v4959_v6 = vpop.f32.mrb[100].mxu0  ;;  %v1911_v0 = vld [vmem:[%s6832_s2 + $0x568] sm:$0xff]  ;;  %v4760_v30 = vcombine.low %v1906_v60, %v1910_v62 }
 0x1dc   : > { %v1712_v10 = vmax.f32 %v4959_v6, 0.0  ;;  %v1499_v11 = vpop.f32.mrb[101].mxu0 }
 0x1dd   : > { %v1710_v12 = vmax.f32 %v1499_v11, 0.0  ;;  %v4960_v13 = vpop.f32.mrb[102].mxu0  ;;  %v4761_v11 = vcombine.high %v1906_v60, %v1910_v62  ;;  %v1756_v62 = vld [vmem:[%s6832_s2 + $0x90] sm:$0xff] }
 0x1de   : > { %v1713_v17 = vmax.f32 %v4960_v13, 0.0  ;;  %v1502_v18 = vpop.f32.mrb[103].mxu0 }
 0x1df   : > { %v1711_v23 = vmax.f32 %v1502_v18, 0.0 }
 0x1e0   : > { %v5828_v24 = vpack.c.bf16 %v1713_v17, %v1712_v10  ;;  %v1739_v17 = vld [vmem:[%s6832_s2 + $0x8] sm:$0xff] }
 0x1e1   : > { %v5830_v25 = vpack.c.bf16 %v1711_v23, %v1710_v12  ;;  %v4763_v12 = vcombine.high %v1907_v63, %v1911_v0  ;;  %v1744_v23 = vld [vmem:[%s6832_s2 + $0x30] sm:$0xff] }
 0x1e2   : > { %3027 = vmatmul.mubr.bf16.gmra.mrb[196].mxu0 %v4728_v14  ;;  %3236 = vmatmul.mubr.bf16.gmra.mrb[36].mxu1 %v4730_v15 }
 0x1e3   : > { %3034 = vmatprep.mubr.bf16.mxu0 %v4737_v20  ;;  %3243 = vmatprep.mubr.bf16.mxu1 %v4739_v22  ;;  %v4963_v27 = vpop.f32.mrb[104].mxu0  ;;  %v1743_v20 = vld [vmem:[%s6832_s2 + $0x28] sm:$0xff]  ;;  %v1740_v22 = vld [vmem:[%s6832_s2 + $0x10] sm:$0xff] }
 0x1e4   : > { %v1716_v31 = vmax.f32 %v4963_v27, 0.0  ;;  %v1515_v32 = vpop.f32.mrb[105].mxu0 }
 0x1e5   : > { %v1714_v33 = vmax.f32 %v1515_v32, 0.0  ;;  %v4964_v34 = vpop.f32.mrb[106].mxu0 }
 0x1e6   : > { %v1717_v37 = vmax.f32 %v4964_v34, 0.0  ;;  %v1518_v38 = vpop.f32.mrb[107].mxu0  ;;  %v4595_v34 = vcombine.high %v1739_v17, %v1743_v20 }
 0x1e7   : > { %v1715_v42 = vmax.f32 %v1518_v38, 0.0 }
 0x1e8   : > { %v5844_v43 = vpack.c.bf16 %v1717_v37, %v1716_v31  ;;  %v4762_v31 = vcombine.low %v1907_v63, %v1911_v0  ;;  %v1760_v63 = vld [vmem:[%s6832_s2 + $0xb0] sm:$0xff] }
 0x1e9   : > { %v5846_v44 = vpack.c.bf16 %v1715_v42, %v1714_v33  ;;  %v1751_v42 = vld [vmem:[%s6832_s2 + $0x68] sm:$0xff] }
 0x1ea   : > { %3035 = vmatmul.mubr.bf16.gmra.mrb[200].mxu0 %v4736_v35  ;;  %3244 = vmatmul.mubr.bf16.gmra.mrb[40].mxu1 %v4738_v36  ;;  %v4597_v35 = vcombine.high %v1740_v22, %v1744_v23 }
 0x1eb   : > { %3042 = vmatprep.mubr.bf16.mxu0 %v4745_v39  ;;  %3251 = vmatprep.mubr.bf16.mxu1 %v4747_v40  ;;  %v4967_v46 = vpop.f32.mrb[108].mxu0  ;;  %v1747_v39 = vld [vmem:[%s6832_s2 + $0x48] sm:$0xff] }
 0x1ec   : > { %v1720_v50 = vmax.f32 %v4967_v46, 0.0  ;;  %v1531_v51 = vpop.f32.mrb[109].mxu0  ;;  %v1752_v46 = vld [vmem:[%s6832_s2 + $0x70] sm:$0xff] }
 0x1ed   : > { %v1718_v52 = vmax.f32 %v1531_v51, 0.0  ;;  %v4968_v53 = vpop.f32.mrb[110].mxu0  ;;  %v4594_v51 = vcombine.low %v1739_v17, %v1743_v20  ;;  %v1768_v20 = vld [vmem:[%s6832_s2 + $0xf0] sm:$0xff] }
 0x1ee   : > { %v1721_v56 = vmax.f32 %v4968_v53, 0.0  ;;  %v1534_v57 = vpop.f32.mrb[111].mxu0 }
 0x1ef   : > { %v1719_v21 = vmax.f32 %v1534_v57, 0.0 }
 0x1f0   : > { %v5860_v58 = vpack.c.bf16 %v1721_v56, %v1720_v50  ;;  %v4605_v56 = vcombine.high %v1748_v45, %v1752_v46 }
 0x1f1   : > { %v5862_v59 = vpack.c.bf16 %v1719_v21, %v1718_v52  ;;  %v4596_v52 = vcombine.low %v1740_v22, %v1744_v23  ;;  %v1755_v21 = vld [vmem:[%s6832_s2 + $0x88] sm:$0xff]  ;;  %v4612_v23 = vcombine.low %v1756_v62, %v1760_v63 }
 0x1f2   : > { %3043 = vmatmul.mubr.bf16.gmra.mrb[204].mxu0 %v4744_v54  ;;  %3252 = vmatmul.mubr.bf16.gmra.mrb[44].mxu1 %v4746_v55  ;;  %v4603_v55 = vcombine.high %v1747_v39, %v1751_v42 }
 0x1f3   : > { %3050 = vmatprep.mubr.bf16.mxu0 %v4753_v16  ;;  %3259 = vmatprep.mubr.bf16.mxu1 %v4755_v19  ;;  %v4971_v61 = vpop.f32.mrb[112].mxu0 }
 0x1f4   : > { %v1724_v1 = vmax.f32 %v4971_v61, 0.0  ;;  %v1547_v2 = vpop.f32.mrb[113].mxu0  ;;  %v1759_v61 = vld [vmem:[%s6832_s2 + $0xa8] sm:$0xff] }
 0x1f5   : > { %v1722_v5 = vmax.f32 %v1547_v2, 0.0  ;;  %v4972_v6 = vpop.f32.mrb[114].mxu0  ;;  %v4610_v22 = vcombine.low %v1755_v21, %v1759_v61 }
 0x1f6   : > { %v1725_v9 = vmax.f32 %v4972_v6, 0.0  ;;  %v1550_v10 = vpop.f32.mrb[115].mxu0  ;;  %v4602_v6 = vcombine.low %v1747_v39, %v1751_v42 }
 0x1f7   : > { %v1723_v13 = vmax.f32 %v1550_v10, 0.0  ;;  %v4611_v10 = vcombine.high %v1755_v21, %v1759_v61 }
 0x1f8   : > { %v5876_v14 = vpack.c.bf16 %v1725_v9, %v1724_v1 }
 0x1f9   : > { %v5878_v15 = vpack.c.bf16 %v1723_v13, %v1722_v5 }
 0x1fa   : > { %3051 = vmatmul.mubr.bf16.gmra.mrb[208].mxu0 %v4752_v7  ;;  %3260 = vmatmul.mubr.bf16.gmra.mrb[48].mxu1 %v4754_v8  ;;  %v4604_v7 = vcombine.low %v1748_v45, %v1752_v46  ;;  %v1787_v45 = vld [vmem:[%s6832_s2 + $0x188] sm:$0xff]  ;;  %v1788_v46 = vld [vmem:[%s6832_s2 + $0x190] sm:$0xff] }
 0x1fb   : > { %3058 = vmatprep.mubr.bf16.mxu0 %v4761_v11  ;;  %3267 = vmatprep.mubr.bf16.mxu1 %v4763_v12  ;;  %v4975_v18 = vpop.f32.mrb[116].mxu0  ;;  %v4613_v11 = vcombine.high %v1756_v62, %v1760_v63 }
 0x1fc   : > { %v1728_v26 = vmax.f32 %v4975_v18, 0.0  ;;  %v1563_v27 = vpop.f32.mrb[117].mxu0  ;;  %v1767_v18 = vld [vmem:[%s6832_s2 + $0xe8] sm:$0xff] }
 0x1fd   : > { %v1726_v28 = vmax.f32 %v1563_v27, 0.0  ;;  %v4976_v29 = vpop.f32.mrb[118].mxu0 }
 0x1fe   : > { %v1729_v32 = vmax.f32 %v4976_v29, 0.0  ;;  %v1566_v33 = vpop.f32.mrb[119].mxu0  ;;  %v1772_v29 = vld [vmem:[%s6832_s2 + $0x110] sm:$0xff] }
 0x1ff   : > { %v1727_v36 = vmax.f32 %v1566_v33, 0.0 }
 0x200   : > { %v5892_v37 = vpack.c.bf16 %v1729_v32, %v1728_v26 }
 0x201   : > { %v5894_v38 = vpack.c.bf16 %v1727_v36, %v1726_v28  ;;  %v1771_v28 = vld [vmem:[%s6832_s2 + $0x108] sm:$0xff] }
 0x202   : > { %3059 = vmatmul.mubr.bf16.gmra.mrb[212].mxu0 %v4760_v30  ;;  %3268 = vmatmul.mubr.bf16.gmra.mrb[52].mxu1 %v4762_v31 }
 0x203   : > { %3099 = vmatprep.mubr.bf16.mxu0 %v4595_v34  ;;  %3308 = vmatprep.mubr.bf16.mxu1 %v4597_v35  ;;  %v4979_v40 = vpop.f32.mrb[120].mxu0  ;;  %v1779_v34 = vld [vmem:[%s6832_s2 + $0x148] sm:$0xff]  ;;  %v1780_v35 = vld [vmem:[%s6832_s2 + $0x150] sm:$0xff] }
 0x204   : > { %v1732_v47 = vmax.f32 %v4979_v40, 0.0  ;;  %v1579_v48 = vpop.f32.mrb[121].mxu0 }
 0x205   : > { %v1730_v49 = vmax.f32 %v1579_v48, 0.0  ;;  %v4980_v50 = vpop.f32.mrb[122].mxu0 }
 0x206   : > { %v1733_v53 = vmax.f32 %v4980_v50, 0.0  ;;  %v1582_v54 = vpop.f32.mrb[123].mxu0 }
 0x207   : > { %v1731_v57 = vmax.f32 %v1582_v54, 0.0 }
 0x208   : > { %v5908_v16 = vpack.c.bf16 %v1733_v53, %v1732_v47 }
 0x209   : > { %v5910_v19 = vpack.c.bf16 %v1731_v57, %v1730_v49 }
 0x20a   : > { %3100 = vmatmul.mubr.bf16.vlgmr.msra.gmra.mrb[216].mxu0 %v4594_v51  ;;  %3309 = vmatmul.mubr.bf16.vlgmr.msra.gmra.mrb[56].mxu1 %v4596_v52 }
 0x20b   : > { %3107 = vmatprep.mubr.bf16.mxu0 %v4603_v55  ;;  %3316 = vmatprep.mubr.bf16.mxu1 %v4605_v56  ;;  %v4983_v60 = vpop.f32.mrb[124].mxu0  ;;  %v1799_v55 = vld [vmem:[%s6832_s2 + $0x1e8] sm:$0xff]  ;;  %v1796_v56 = vld [vmem:[%s6832_s2 + $0x1d0] sm:$0xff] }
 0x20c   : > { %3486 = vmatpush1.bf16.msra.mxu1 %v5813_v4  ;;  %v1736_v0 = vmax.f32 %v4983_v60, 0.0  ;;  %v1595_v1 = vpop.f32.mrb[125].mxu0  ;;  %v1763_v4 = vld [vmem:[%s6832_s2 + $0xc8] sm:$0xff] }
 0x20d   : > { %3487 = vmatprep.subr.bf16.mxu1 %v5216_v41  ;;  %v1734_v2 = vmax.f32 %v1595_v1, 0.0  ;;  %v4984_v5 = vpop.f32.mrb[126].mxu0  ;;  %v4619_v26 = vcombine.high %v1763_v4, %v1767_v18  ;;  %v4618_v30 = vcombine.low %v1763_v4, %v1767_v18 }
 0x20e   : > { %v1737_v8 = vmax.f32 %v4984_v5, 0.0  ;;  %v1598_v9 = vpop.f32.mrb[127].mxu0 }
 0x20f   : > { %v1735_v12 = vmax.f32 %v1598_v9, 0.0 }
 0x210   : > { %3488 = vmatpush1.bf16.msra.mxu1 %v5811_v3  ;;  %v5927_v13 = vpack.c.bf16 %v1737_v8, %v1736_v0  ;;  %v1764_v3 = vld [vmem:[%s6832_s2 + $0xd0] sm:$0xff] }
 0x211   : > { %v5929_v17 = vpack.c.bf16 %v1735_v12, %v1734_v2  ;;  %3489 = vmatprep.subr.bf16.mxu1 %v5216_v41  ;;  %v4621_v27 = vcombine.high %v1764_v3, %v1768_v20  ;;  %v4620_v31 = vcombine.low %v1764_v3, %v1768_v20  ;;  %v1808_v2 = vld [vmem:[%s6832_s2 + $0x230] sm:$0xff] }
 0x212   : > { %3108 = vmatmul.mubr.bf16.gmra.mrb[220].mxu0 %v4602_v6  ;;  %3317 = vmatmul.mubr.bf16.gmra.mrb[60].mxu1 %v4604_v7 }
 0x213   : > { %3115 = vmatprep.mubr.bf16.mxu0 %v4611_v10  ;;  %3324 = vmatprep.mubr.bf16.mxu1 %v4613_v11  ;;  %v1816_v11 = vld [vmem:[%s6832_s2 + $0x270] sm:$0xff] }
 0x214   : > { %3490 = vmatpush1.bf16.msra.mxu1 %v5830_v25  ;;  %v1775_v25 = vld [vmem:[%s6832_s2 + $0x128] sm:$0xff] }
 0x215   : > { %3491 = vmatprep.subr.bf16.mxu1 %v5216_v41  ;;  %v4627_v32 = vcombine.high %v1771_v28, %v1775_v25  ;;  %v4626_v36 = vcombine.low %v1771_v28, %v1775_v25 }
 0x218   : > { %3492 = vmatpush1.bf16.msra.mxu1 %v5828_v24  ;;  %v1776_v24 = vld [vmem:[%s6832_s2 + $0x130] sm:$0xff] }
 0x219   : > { %3493 = vmatprep.subr.bf16.mxu1 %v5216_v41  ;;  %v4629_v33 = vcombine.high %v1772_v29, %v1776_v24  ;;  %v4628_v39 = vcombine.low %v1772_v29, %v1776_v24  ;;  %v1832_v29 = vld [vmem:[%s6832_s2 + $0x2f0] sm:$0xff] }
 0x21a   : > { %3116 = vmatmul.mubr.bf16.gmra.mrb[224].mxu0 %v4610_v22  ;;  %3325 = vmatmul.mubr.bf16.gmra.mrb[64].mxu1 %v4612_v23  ;;  %v1820_v22 = vld [vmem:[%s6832_s2 + $0x290] sm:$0xff] }
 0x21b   : > { %3123 = vmatprep.mubr.bf16.mxu0 %v4619_v26  ;;  %3332 = vmatprep.mubr.bf16.mxu1 %v4621_v27 }
 0x21c   : > { %3494 = vmatpush1.bf16.msra.mxu1 %v5846_v44  ;;  %v1783_v44 = vld [vmem:[%s6832_s2 + $0x168] sm:$0xff] }
 0x21d   : > { %3495 = vmatprep.subr.bf16.mxu1 %v5216_v41  ;;  %v4635_v40 = vcombine.high %v1779_v34, %v1783_v44  ;;  %v4634_v48 = vcombine.low %v1779_v34, %v1783_v44  ;;  %v1836_v44 = vld [vmem:[%s6832_s2 + $0x310] sm:$0xff] }
 0x220   : > { %3496 = vmatpush1.bf16.msra.mxu1 %v5844_v43  ;;  %v1784_v43 = vld [vmem:[%s6832_s2 + $0x170] sm:$0xff] }
 0x221   : > { %3497 = vmatprep.subr.bf16.mxu1 %v5216_v41  ;;  %v4637_v42 = vcombine.high %v1780_v35, %v1784_v43  ;;  %v4636_v49 = vcombine.low %v1780_v35, %v1784_v43  ;;  %v1840_v35 = vld [vmem:[%s6832_s2 + $0x330] sm:$0xff] }
 0x222   : > { %3124 = vmatmul.mubr.bf16.gmra.mrb[228].mxu0 %v4618_v30  ;;  %3333 = vmatmul.mubr.bf16.gmra.mrb[68].mxu1 %v4620_v31 }
 0x223   : > { %3131 = vmatprep.mubr.bf16.mxu0 %v4627_v32  ;;  %3340 = vmatprep.mubr.bf16.mxu1 %v4629_v33 }
 0x224   : > { %3498 = vmatpush1.bf16.msra.mxu1 %v5862_v59  ;;  %v1791_v59 = vld [vmem:[%s6832_s2 + $0x1a8] sm:$0xff] }
 0x225   : > { %3499 = vmatprep.subr.bf16.mxu1 %v5216_v41  ;;  %v4643_v51 = vcombine.high %v1787_v45, %v1791_v59  ;;  %v4642_v21 = vcombine.low %v1787_v45, %v1791_v59  ;;  %v1844_v59 = vld [vmem:[%s6832_s2 + $0x350] sm:$0xff] }
 0x228   : > { %3500 = vmatpush1.bf16.msra.mxu1 %v5860_v58  ;;  %v1792_v58 = vld [vmem:[%s6832_s2 + $0x1b0] sm:$0xff] }
 0x229   : > { %3501 = vmatprep.subr.bf16.mxu1 %v5216_v41  ;;  %v4645_v52 = vcombine.high %v1788_v46, %v1792_v58  ;;  %v4644_v60 = vcombine.low %v1788_v46, %v1792_v58  ;;  %v1848_v46 = vld [vmem:[%s6832_s2 + $0x370] sm:$0xff] }
 0x22a   : > { %3132 = vmatmul.mubr.bf16.gmra.mrb[232].mxu0 %v4626_v36  ;;  %3341 = vmatmul.mubr.bf16.gmra.mrb[72].mxu1 %v4628_v39 }
 0x22b   : > { %3139 = vmatprep.mubr.bf16.mxu0 %v4635_v40  ;;  %3348 = vmatprep.mubr.bf16.mxu1 %v4637_v42  ;;  %v4693_v42 = vcombine.high %v1836_v44, %v1840_v35 }
 0x22c   : > { %3502 = vmatpush1.bf16.msra.mxu1 %v5878_v15  ;;  %v1795_v15 = vld [vmem:[%s6832_s2 + $0x1c8] sm:$0xff] }
 0x22d   : > { %v5993_v47 = vpop.f32.mrb[128].mxu0  ;;  %3503 = vmatprep.subr.bf16.mxu1 %v5216_v41  ;;  %v4651_v62 = vcombine.high %v1795_v15, %v1799_v55 }
 0x22e   : > { %v2894_v50 = vpop.f32.mrb[129].mxu0 }
 0x22f   : > { %v5996_v53 = vpop.f32.mrb[130].mxu0 }
 0x230   : > { %v2897_v54 = vpop.f32.mrb[131].mxu0  ;;  %3504 = vmatpush1.bf16.msra.mxu1 %v5876_v14  ;;  %v1800_v14 = vld [vmem:[%s6832_s2 + $0x1f0] sm:$0xff] }
 0x231   : > { %3505 = vmatprep.subr.bf16.mxu1 %v5216_v41  ;;  %v4653_v63 = vcombine.high %v1796_v56, %v1800_v14  ;;  %v4652_v6 = vcombine.low %v1796_v56, %v1800_v14  ;;  %v1852_v54 = vld [vmem:[%s6832_s2 + $0x390] sm:$0xff] }
 0x232   : > { %3140 = vmatmul.mubr.bf16.gmra.mrb[236].mxu0 %v4634_v48  ;;  %3349 = vmatmul.mubr.bf16.gmra.mrb[76].mxu1 %v4636_v49  ;;  %v4692_v49 = vcombine.low %v1836_v44, %v1840_v35 }
 0x233   : > { %3147 = vmatprep.mubr.bf16.mxu0 %v4643_v51  ;;  %3356 = vmatprep.mubr.bf16.mxu1 %v4645_v52  ;;  %v4701_v51 = vcombine.high %v1844_v59, %v1848_v46 }
 0x234   : > { %3506 = vmatpush1.bf16.msra.mxu1 %v5894_v38  ;;  %v1804_v38 = vld [vmem:[%s6832_s2 + $0x210] sm:$0xff] }
 0x235   : > { %v6013_v57 = vpop.f32.mrb[132].mxu0  ;;  %3507 = vmatprep.subr.bf16.mxu1 %v5216_v41  ;;  %v4661_v8 = vcombine.high %v1804_v38, %v1808_v2 }
 0x236   : > { %v2902_v61 = vpop.f32.mrb[133].mxu0 }
 0x237   : > { %v6016_v0 = vpop.f32.mrb[134].mxu0  ;;  %v4700_v61 = vcombine.low %v1844_v59, %v1848_v46  ;;  %v1876_v59 = vld [vmem:[%s6832_s2 + $0x450] sm:$0xff] }
 0x238   : > { %v2905_v1 = vpop.f32.mrb[135].mxu0  ;;  %3508 = vmatpush1.bf16.msra.mxu1 %v5892_v37  ;;  %v4650_v37 = vcombine.low %v1795_v15, %v1799_v55  ;;  %v1856_v15 = vld [vmem:[%s6832_s2 + $0x3b0] sm:$0xff] }
 0x239   : > { %3509 = vmatprep.subr.bf16.mxu1 %v5216_v41  ;;  %v4709_v1 = vcombine.high %v1852_v54, %v1856_v15  ;;  %v1880_v46 = vld [vmem:[%s6832_s2 + $0x470] sm:$0xff] }
 0x23a   : > { %3148 = vmatmul.mubr.bf16.gmra.mrb[240].mxu0 %v4642_v21  ;;  %3357 = vmatmul.mubr.bf16.gmra.mrb[80].mxu1 %v4644_v60 }
 0x23b   : > { %3155 = vmatprep.mubr.bf16.mxu0 %v4651_v62  ;;  %3364 = vmatprep.mubr.bf16.mxu1 %v4653_v63 }
 0x23c   : > { %3510 = vmatpush1.bf16.msra.mxu1 %v5910_v19  ;;  %v1812_v19 = vld [vmem:[%s6832_s2 + $0x250] sm:$0xff] }
 0x23d   : > { %v6027_v5 = vpop.f32.mrb[136].mxu0  ;;  %3511 = vmatprep.subr.bf16.mxu1 %v5216_v41  ;;  %v4669_v18 = vcombine.high %v1812_v19, %v1816_v11 }
 0x23e   : > { %v2910_v7 = vpop.f32.mrb[137].mxu0 }
 0x23f   : > { %v6030_v9 = vpop.f32.mrb[138].mxu0  ;;  %v1864_v7 = vld [vmem:[%s6832_s2 + $0x3f0] sm:$0xff] }
 0x240   : > { %v2913_v10 = vpop.f32.mrb[139].mxu0  ;;  %3512 = vmatpush1.bf16.msra.mxu1 %v5908_v16  ;;  %v4660_v16 = vcombine.low %v1804_v38, %v1808_v2 }
 0x241   : > { %3513 = vmatprep.subr.bf16.mxu1 %v5216_v41 }
 0x242   : > { %3156 = vmatmul.mubr.bf16.gmra.mrb[244].mxu0 %v4650_v37  ;;  %3365 = vmatmul.mubr.bf16.gmra.mrb[84].mxu1 %v4652_v6  ;;  %v1860_v6 = vld [vmem:[%s6832_s2 + $0x3d0] sm:$0xff] }
 0x243   : > { %3372 = vmatprep.mubr.bf16.mxu1 %v4661_v8 }
 0x244   : > { %3514 = vmatpush1.bf16.msra.mxu1 %v5929_v17  ;;  %v1824_v17 = vld [vmem:[%s6832_s2 + $0x2b0] sm:$0xff] }
 0x245   : > { %v6041_v12 = vpop.f32.mrb[140].mxu0  ;;  %3515 = vmatprep.subr.bf16.mxu1 %v5216_v41  ;;  %v4668_v41 = vcombine.low %v1812_v19, %v1816_v11  ;;  %v4677_v27 = vcombine.high %v1820_v22, %v1824_v17  ;;  %v4676_v30 = vcombine.low %v1820_v22, %v1824_v17  ;;  %v4717_v22 = vcombine.high %v1860_v6, %v1864_v7 }
 0x246   : > { %v2918_v4 = vpop.f32.mrb[141].mxu0 }
 0x247   : > { %v6044_v3 = vpop.f32.mrb[142].mxu0  ;;  %v4708_v4 = vcombine.low %v1852_v54, %v1856_v15 }
 0x248   : > { %v2921_v20 = vpop.f32.mrb[143].mxu0  ;;  %3516 = vmatpush1.bf16.msra.mxu1 %v5927_v13  ;;  %v1828_v13 = vld [vmem:[%s6832_s2 + $0x2d0] sm:$0xff] }
 0x249   : > { %v4685_v32 = vcombine.high %v1828_v13, %v1832_v29  ;;  %v4684_v36 = vcombine.low %v1828_v13, %v1832_v29 }
 0x24a   : > { %3373 = vmatmul.mubr.bf16.gmra.mrb[88].mxu1 %v4660_v16 }
 0x24b   : > { %3380 = vmatprep.mubr.bf16.mxu1 %v4669_v18 }
 0x24d   : > { %v6053_v23 = vpop.f32.mrb[144].mxu0 }
 0x24e   : > { %v2926_v26 = vpop.f32.mrb[145].mxu0 }
 0x24f   : > { %v6055_v28 = vpop.f32.mrb[146].mxu0 }
 0x250   : > { %v2929_v25 = vpop.f32.mrb[147].mxu0 }
 0x251   : > { %v1872_v25 = vld [vmem:[%s6832_s2 + $0x430] sm:$0xff] }
 0x252   : > { %3381 = vmatmul.mubr.bf16.gmra.mrb[92].mxu1 %v4668_v41 }
 0x253   : > { %3388 = vmatprep.mubr.bf16.mxu1 %v4677_v27  ;;  %v1868_v27 = vld [vmem:[%s6832_s2 + $0x410] sm:$0xff] }
 0x255   : > { %v6063_v24 = vpop.f32.mrb[148].mxu0 }
 0x256   : > { %v2934_v31 = vpop.f32.mrb[149].mxu0 }
 0x257   : > { %v6065_v33 = vpop.f32.mrb[150].mxu0 }
 0x258   : > { %v2937_v34 = vpop.f32.mrb[151].mxu0 }
 0x259   : > { %v4716_v34 = vcombine.low %v1860_v6, %v1864_v7  ;;  %v1888_v6 = vld [vmem:[%s6832_s2 + $0x4b0] sm:$0xff] }
 0x25a   : > { %3389 = vmatmul.mubr.bf16.gmra.mrb[96].mxu1 %v4676_v30 }
 0x25b   : > { %3396 = vmatprep.mubr.bf16.mxu1 %v4685_v32 }
 0x25d   : > { %v6073_v43 = vpop.f32.mrb[152].mxu0 }
 0x25e   : > { %v2942_v39 = vpop.f32.mrb[153].mxu0 }
 0x25f   : > { %v6075_v40 = vpop.f32.mrb[154].mxu0 }
 0x260   : > { %v2945_v45 = vpop.f32.mrb[155].mxu0 }
 0x262   : > { %3397 = vmatmul.mubr.bf16.gmra.mrb[100].mxu1 %v4684_v36  ;;  %v4725_v36 = vcombine.high %v1868_v27, %v1872_v25 }
 0x263   : > { %3404 = vmatprep.mubr.bf16.mxu1 %v4693_v42 }
 0x265   : > { %v6083_v58 = vpop.f32.mrb[156].mxu0 }
 0x266   : > { %v2950_v48 = vpop.f32.mrb[157].mxu0 }
 0x267   : > { %v6085_v50 = vpop.f32.mrb[158].mxu0 }
 0x268   : > { %v2953_v52 = vpop.f32.mrb[159].mxu0 }
 0x26a   : > { %3405 = vmatmul.mubr.bf16.gmra.mrb[104].mxu1 %v4692_v49 }
 0x26b   : > { %3412 = vmatprep.mubr.bf16.mxu1 %v4701_v51  ;;  %v3694_v51 = vld [vmem:[%s6833_s3] sm:$0xff] }
 0x26c   : > { %3732 = vperm.xlu0 %5103, %v3694_v51  }
 0x26d   : > { %v2956_v55 = vpop.f32.mrb[160].mxu0  ;;  %v3165_v56 = vpop.f32.mrb[0].mxu1 }
 0x26e   : > { %v6093_v14 = vadd.f32 %v3165_v56, %v2956_v55  ;;  %v2958_v21 = vpop.f32.mrb[161].mxu0  ;;  %v3167_v60 = vpop.f32.mrb[1].mxu1  ;;  %v4724_v55 = vcombine.low %v1868_v27, %v1872_v25 }
 0x26f   : > { %v2959_v62 = vpop.f32.mrb[162].mxu0  ;;  %v3168_v63 = vpop.f32.mrb[2].mxu1  ;;  %v4733_v60 = vcombine.high %v1876_v59, %v1880_v46 }
 0x270   : > { %v6095_v38 = vadd.f32 %v3168_v63, %v2959_v62  ;;  %v3170_v2 = vpop.f32.mrb[3].mxu1  ;;  %v2961_v37 = vpop.f32.mrb[163].mxu0 }
 0x271   : > { %v3695_v2 = vld [vmem:[%s6833_s3 + $0x8] sm:$0xff]  ;;  %v1884_v37 = vld [vmem:[%s6832_s2 + $0x490] sm:$0xff] }
 0x272   : > { %3413 = vmatmul.mubr.bf16.gmra.mrb[108].mxu1 %v4700_v61  ;;  %3737 = vperm.xlu0 %5103, %v3695_v2  }
 0x273   : > { %3420 = vmatprep.mubr.bf16.mxu1 %v4709_v1  ;;  %v3698_v1 = vld [vmem:[%s6833_s3 + $0x20] sm:$0xff] }
 0x274   : > { %3752 = vperm.xlu1 %5104, %v3698_v1  }
 0x275   : > { %v2964_v8 = vpop.f32.mrb[164].mxu0  ;;  %v3173_v10 = vpop.f32.mrb[4].mxu1 }
 0x276   : > { %v6103_v19 = vadd.f32 %v3173_v10, %v2964_v8  ;;  %v2966_v11 = vpop.f32.mrb[165].mxu0  ;;  %v3175_v16 = vpop.f32.mrb[5].mxu1  ;;  %v3699_v10 = vld [vmem:[%s6833_s3 + $0x28] sm:$0xff] }
 0x277   : > { %v2967_v18 = vpop.f32.mrb[166].mxu0  ;;  %v3176_v20 = vpop.f32.mrb[6].mxu1  ;;  %v3702_v11 = vld [vmem:[%s6833_s3 + $0x40] sm:$0xff] }
 0x278   : > { %v6105_v17 = vadd.f32 %v3176_v20, %v2967_v18  ;;  %v3178_v41 = vpop.f32.mrb[7].mxu1  ;;  %v2969_v26 = vpop.f32.mrb[167].mxu0  ;;  %v4732_v20 = vcombine.low %v1876_v59, %v1880_v46  ;;  %3757 = vperm.xlu1 %5104, %v3699_v10   ;;  %3772 = vperm.xlu0 %5103, %v3702_v11  }
 0x279   : > { %v4741_v26 = vcombine.high %v1884_v37, %v1888_v6 }
 0x27a   : > { %3421 = vmatmul.mubr.bf16.gmra.mrb[112].mxu1 %v4708_v4 }
 0x27b   : > { %3428 = vmatprep.mubr.bf16.mxu1 %v4717_v22 }
 0x27d   : > { %v2972_v13 = vpop.f32.mrb[168].mxu0  ;;  %v3181_v29 = vpop.f32.mrb[8].mxu1 }
 0x27e   : > { %v6113_v30 = vadd.f32 %v3181_v29, %v2972_v13  ;;  %v2974_v31 = vpop.f32.mrb[169].mxu0  ;;  %v3183_v32 = vpop.f32.mrb[9].mxu1  ;;  %v3703_v29 = vld [vmem:[%s6833_s3 + $0x48] sm:$0xff] }
 0x27f   : > { %v2975_v44 = vpop.f32.mrb[170].mxu0  ;;  %v3184_v35 = vpop.f32.mrb[10].mxu1  ;;  %v3696_v31 = vld [vmem:[%s6833_s3 + $0x10] sm:$0xff]  ;;  %3777 = vperm.xlu1 %5104, %v3703_v29  }
 0x280   : > { %v6115_v39 = vadd.f32 %v3184_v35, %v2975_v44  ;;  %v3186_v42 = vpop.f32.mrb[11].mxu1  ;;  %v2977_v45 = vpop.f32.mrb[171].mxu0  ;;  %3742 = vperm.xlu0 %5103, %v3696_v31   ;;  %v1892_v32 = vld [vmem:[%s6832_s2 + $0x4d0] sm:$0xff] }
 0x281   : > { %v3700_v42 = vld [vmem:[%s6833_s3 + $0x30] sm:$0xff] }
 0x282   : > { %3429 = vmatmul.mubr.bf16.gmra.mrb[116].mxu1 %v4716_v34  ;;  %v1896_v34 = vld [vmem:[%s6832_s2 + $0x4f0] sm:$0xff] }
 0x283   : > { %3436 = vmatprep.mubr.bf16.mxu1 %v4725_v36  ;;  %v3697_v36 = vld [vmem:[%s6833_s3 + $0x18] sm:$0xff]  ;;  %v4748_v11 = vcombine.low %v1892_v32, %v1896_v34  ;;  %v1908_v29 = vld [vmem:[%s6832_s2 + $0x550] sm:$0xff] }
 0x284   : > { %3747 = vperm.xlu1 %5104, %v3697_v36   ;;  %3762 = vperm.xlu0 %5103, %v3700_v42   ;;  %v1912_v31 = vld [vmem:[%s6832_s2 + $0x570] sm:$0xff] }
 0x285   : > { %v2980_v48 = vpop.f32.mrb[172].mxu0  ;;  %v3189_v49 = vpop.f32.mrb[12].mxu1 }
 0x286   : > { %v6126_v52 = vadd.f32 %v3189_v49, %v2980_v48  ;;  %v2982_v54 = vpop.f32.mrb[173].mxu0  ;;  %v3191_v15 = vpop.f32.mrb[13].mxu1  ;;  %v4740_v48 = vcombine.low %v1884_v37, %v1888_v6  ;;  %v3707_v37 = vld [vmem:[%s6833_s3 + $0x68] sm:$0xff]  ;;  %v3704_v6 = vld [vmem:[%s6833_s3 + $0x50] sm:$0xff] }
 0x287   : > { %v2983_v56 = vpop.f32.mrb[174].mxu0  ;;  %v3192_v21 = vpop.f32.mrb[14].mxu1  ;;  %v4749_v54 = vcombine.high %v1892_v32, %v1896_v34 }
 0x288   : > { %v6128_v61 = vadd.f32 %v3192_v21, %v2983_v56  ;;  %v3194_v62 = vpop.f32.mrb[15].mxu1  ;;  %v2985_v63 = vpop.f32.mrb[175].mxu0  ;;  %v3701_v21 = vld [vmem:[%s6833_s3 + $0x38] sm:$0xff] }
 0x289   : > { %3767 = vperm.xlu1 %5104, %v3701_v21   ;;  %v1900_v62 = vld [vmem:[%s6832_s2 + $0x510] sm:$0xff]  ;;  %v3709_v21 = vld [vmem:[%s6833_s3 + $0x78] sm:$0xff] }
 0x28a   : > { %3437 = vmatmul.mubr.bf16.gmra.mrb[120].mxu1 %v4724_v55  ;;  %v1904_v63 = vld [vmem:[%s6832_s2 + $0x530] sm:$0xff] }
 0x28b   : > { %3444 = vmatprep.mubr.bf16.mxu1 %v4733_v60  ;;  %v3706_v60 = vld [vmem:[%s6833_s3 + $0x60] sm:$0xff] }
 0x28c   : > { %3792 = vperm.xlu0 %5103, %v3706_v60   ;;  %v3714_v60 = vld [vmem:[%s6833_s3 + $0xa0] sm:$0xff] }
 0x28d   : > { %v2988_v7 = vpop.f32.mrb[176].mxu0  ;;  %v3197_v8 = vpop.f32.mrb[16].mxu1  ;;  %3797 = vperm.xlu1 %5104, %v3707_v37   ;;  %v3715_v37 = vld [vmem:[%s6833_s3 + $0xa8] sm:$0xff] }
 0x28e   : > { %v6148_v16 = vadd.f32 %v3197_v8, %v2988_v7  ;;  %v2990_v4 = vpop.f32.mrb[177].mxu0  ;;  %v3199_v18 = vpop.f32.mrb[17].mxu1 }
 0x28f   : > { %v2991_v22 = vpop.f32.mrb[178].mxu0  ;;  %v3200_v41 = vpop.f32.mrb[18].mxu1 }
 0x290   : > { %v6150_v27 = vadd.f32 %v3200_v41, %v2991_v22  ;;  %v3202_v25 = vpop.f32.mrb[19].mxu1  ;;  %v2993_v13 = vpop.f32.mrb[179].mxu0  ;;  %3782 = vperm.xlu0 %5103, %v3704_v6   ;;  %v3712_v6 = vld [vmem:[%s6833_s3 + $0x90] sm:$0xff] }
 0x291   : > { %v3705_v25 = vld [vmem:[%s6833_s3 + $0x58] sm:$0xff]  ;;  %v3710_v13 = vld [vmem:[%s6833_s3 + $0x80] sm:$0xff] }
 0x292   : > { %3445 = vmatmul.mubr.bf16.gmra.mrb[124].mxu1 %v4732_v20  ;;  %v4757_v20 = vcombine.high %v1900_v62, %v1904_v63  ;;  %3787 = vperm.xlu1 %5104, %v3705_v25  }
 0x293   : > { %3452 = vmatprep.mubr.bf16.mxu1 %v4741_v26 }
 0x294   : > { %3812 = vperm.xlu0 %5103, %v3710_v13  }
 0x295   : > { %v2996_v44 = vpop.f32.mrb[180].mxu0  ;;  %v3205_v35 = vpop.f32.mrb[20].mxu1 }
 0x296   : > { %v6170_v45 = vadd.f32 %v3205_v35, %v2996_v44  ;;  %v2998_v59 = vpop.f32.mrb[181].mxu0  ;;  %v3207_v46 = vpop.f32.mrb[21].mxu1  ;;  %v3711_v44 = vld [vmem:[%s6833_s3 + $0x88] sm:$0xff]  ;;  %v3708_v35 = vld [vmem:[%s6833_s3 + $0x70] sm:$0xff] }
 0x297   : > { %v2999_v49 = vpop.f32.mrb[182].mxu0  ;;  %v3208_v51 = vpop.f32.mrb[22].mxu1  ;;  %v4756_v46 = vcombine.low %v1900_v62, %v1904_v63  ;;  %3817 = vperm.xlu1 %5104, %v3711_v44   ;;  %v1741_v62 = vld [vmem:[%s6832_s2 + $0x18] sm:$0xff] }
 0x298   : > { %v6172_v15 = vadd.f32 %v3208_v51, %v2999_v49  ;;  %v3210_v55 = vpop.f32.mrb[23].mxu1  ;;  %v3001_v56 = vpop.f32.mrb[183].mxu0  ;;  %v4765_v51 = vcombine.high %v1908_v29, %v1912_v31  ;;  %3802 = vperm.xlu0 %5103, %v3708_v35   ;;  %v1745_v63 = vld [vmem:[%s6832_s2 + $0x38] sm:$0xff] }
 0x29a   : > { %3453 = vmatmul.mubr.bf16.gmra.mrb[40].mxu1 %v4740_v48 }
 0x29b   : > { %3460 = vmatprep.mubr.bf16.mxu1 %v4749_v54  ;;  %3807 = vperm.xlu1 %5104, %v3709_v21  }
 0x29c   : > { %3832 = vperm.xlu0 %5103, %v3714_v60  }
 0x29d   : > { %v3004_v1 = vpop.f32.mrb[184].mxu0  ;;  %v3213_v2 = vpop.f32.mrb[24].mxu1 }
 0x29e   : > { %v6192_v7 = vadd.f32 %v3213_v2, %v3004_v1  ;;  %v3006_v8 = vpop.f32.mrb[185].mxu0  ;;  %v3215_v10 = vpop.f32.mrb[25].mxu1 }
 0x29f   : > { %v3007_v4 = vpop.f32.mrb[186].mxu0  ;;  %v3216_v18 = vpop.f32.mrb[26].mxu1  ;;  %3837 = vperm.xlu1 %5104, %v3715_v37   ;;  %v3717_v37 = vld [vmem:[%s6833_s3 + $0xb8] sm:$0xff] }
 0x2a0   : > { %v6194_v22 = vadd.f32 %v3216_v18, %v3007_v4  ;;  %v3218_v41 = vpop.f32.mrb[27].mxu1  ;;  %v3009_v26 = vpop.f32.mrb[187].mxu0  ;;  %v4764_v4 = vcombine.low %v1908_v29, %v1912_v31  ;;  %3822 = vperm.xlu0 %5103, %v3712_v6   ;;  %v1749_v29 = vld [vmem:[%s6832_s2 + $0x58] sm:$0xff]  ;;  %v3722_v6 = vld [vmem:[%s6833_s3 + $0xe0] sm:$0xff] }
 0x2a1   : > { %v4599_v41 = vcombine.high %v1741_v62, %v1745_v63  ;;  %v1753_v31 = vld [vmem:[%s6832_s2 + $0x78] sm:$0xff] }
 0x2a2   : > { %3461 = vmatmul.mubr.bf16.gmra.mrb[44].mxu1 %v4748_v11  ;;  %v4607_v21 = vcombine.high %v1749_v29, %v1753_v31 }
 0x2a3   : > { %3468 = vmatprep.mubr.bf16.mxu1 %v4757_v20 }
 0x2a5   : > { %v3012_v32 = vpop.f32.mrb[188].mxu0  ;;  %v3221_v34 = vpop.f32.mrb[28].mxu1 }
 0x2a6   : > { %v6214_v36 = vadd.f32 %v3221_v34, %v3012_v32  ;;  %v3014_v42 = vpop.f32.mrb[189].mxu0  ;;  %v3223_v59 = vpop.f32.mrb[29].mxu1  ;;  %v3713_v32 = vld [vmem:[%s6833_s3 + $0x98] sm:$0xff]  ;;  %v3718_v34 = vld [vmem:[%s6833_s3 + $0xc0] sm:$0xff] }
 0x2a7   : > { %v3015_v48 = vpop.f32.mrb[190].mxu0  ;;  %v3224_v49 = vpop.f32.mrb[30].mxu1  ;;  %3827 = vperm.xlu1 %5104, %v3713_v32   ;;  %3852 = vperm.xlu0 %5103, %v3718_v34   ;;  %v3719_v42 = vld [vmem:[%s6833_s3 + $0xc8] sm:$0xff]  ;;  %v3716_v59 = vld [vmem:[%s6833_s3 + $0xb0] sm:$0xff]  ;;  %v3721_v32 = vld [vmem:[%s6833_s3 + $0xd8] sm:$0xff] }
 0x2a8   : > { %v6216_v54 = vadd.f32 %v3224_v49, %v3015_v48  ;;  %v3226_v55 = vpop.f32.mrb[31].mxu1  ;;  %v3017_v56 = vpop.f32.mrb[191].mxu0  ;;  %v3726_v34 = vld [vmem:[%s6833_s3 + $0x100] sm:$0xff] }
 0x2aa   : > { %3469 = vmatmul.mubr.bf16.gmra.mrb[48].mxu1 %v4756_v46 }
 0x2ab   : > { %3476 = vmatprep.mubr.bf16.mxu1 %v4765_v51  ;;  %v4598_v51 = vcombine.low %v1741_v62, %v1745_v63  ;;  %3857 = vperm.xlu1 %5104, %v3719_v42   ;;  %v1757_v62 = vld [vmem:[%s6832_s2 + $0x98] sm:$0xff]  ;;  %v3724_v42 = vld [vmem:[%s6833_s3 + $0xf0] sm:$0xff] }
 0x2ac   : > { %3842 = vperm.xlu0 %5103, %v3716_v59   ;;  %v1761_v63 = vld [vmem:[%s6832_s2 + $0xb8] sm:$0xff] }
 0x2ad   : > { %v3020_v1 = vpop.f32.mrb[192].mxu0  ;;  %v3229_v2 = vpop.f32.mrb[32].mxu1  ;;  %v4614_v59 = vcombine.low %v1757_v62, %v1761_v63 }
 0x2ae   : > { %v6236_v8 = vadd.f32 %v3229_v2, %v3020_v1  ;;  %v3022_v10 = vpop.f32.mrb[193].mxu0  ;;  %v3231_v11 = vpop.f32.mrb[33].mxu1 }
 0x2af   : > { %v3023_v18 = vpop.f32.mrb[194].mxu0  ;;  %v3232_v20 = vpop.f32.mrb[34].mxu1  ;;  %3847 = vperm.xlu1 %5104, %v3717_v37   ;;  %v3723_v11 = vld [vmem:[%s6833_s3 + $0xe8] sm:$0xff] }
 0x2b0   : > { %v6238_v26 = vadd.f32 %v3232_v20, %v3023_v18  ;;  %v3234_v25 = vpop.f32.mrb[35].mxu1  ;;  %v3025_v13 = vpop.f32.mrb[195].mxu0  ;;  %3872 = vperm.xlu0 %5103, %v3722_v6   ;;  %v4606_v18 = vcombine.low %v1749_v29, %v1753_v31  ;;  %v1765_v29 = vld [vmem:[%s6832_s2 + $0xd8] sm:$0xff] }
 0x2b1   : > { %v1769_v31 = vld [vmem:[%s6832_s2 + $0xf8] sm:$0xff] }
 0x2b2   : > { %3477 = vmatmul.mubr.bf16.gmra.mrb[52].mxu1 %v4764_v4  ;;  %v3720_v4 = vld [vmem:[%s6833_s3 + $0xd0] sm:$0xff]  ;;  %v3729_v6 = vld [vmem:[%s6833_s3 + $0x118] sm:$0xff] }
 0x2b3   : > { %3517 = vmatprep.mubr.bf16.mxu1 %v4599_v41  ;;  %3877 = vperm.xlu1 %5104, %v3723_v11   ;;  %v4615_v41 = vcombine.high %v1757_v62, %v1761_v63  ;;  %v4016_v62 = vld [vmem:[%s6835_s5] sm:$0xff]  ;;  %v4622_v63 = vcombine.low %v1765_v29, %v1769_v31 }
 0x2b4   : > { %3862 = vperm.xlu0 %5103, %v3720_v4  }
 0x2b5   : > { %v3028_v44 = vpop.f32.mrb[196].mxu0  ;;  %v3237_v35 = vpop.f32.mrb[36].mxu1 }
 0x2b6   : > { %v6258_v46 = vadd.f32 %v3237_v35, %v3028_v44  ;;  %v3030_v48 = vpop.f32.mrb[197].mxu0  ;;  %v3239_v49 = vpop.f32.mrb[37].mxu1  ;;  %v3727_v35 = vld [vmem:[%s6833_s3 + $0x108] sm:$0xff] }
 0x2b7   : > { %v3031_v55 = vpop.f32.mrb[198].mxu0  ;;  %v3240_v56 = vpop.f32.mrb[38].mxu1  ;;  %3867 = vperm.xlu1 %5104, %v3721_v32   ;;  %v4623_v49 = vcombine.high %v1765_v29, %v1769_v31  ;;  %v1781_v32 = vld [vmem:[%s6832_s2 + $0x158] sm:$0xff]  ;;  %v4113_v31 = vld [vmem:[%s6836_s6 + $0x8] sm:$0xff] }
 0x2b8   : > { %v6260_v60 = vadd.f32 %v3240_v56, %v3031_v55  ;;  %v3242_v1 = vpop.f32.mrb[39].mxu1  ;;  %v3033_v2 = vpop.f32.mrb[199].mxu0  ;;  %3892 = vperm.xlu0 %5103, %v3726_v34   ;;  %v3725_v56 = vld [vmem:[%s6833_s3 + $0xf8] sm:$0xff] }
 0x2b9   : > { %v1773_v1 = vld [vmem:[%s6832_s2 + $0x118] sm:$0xff] }
 0x2ba   : > { %3518 = vmatmul.mubr.bf16.vlgmr.msra.gmra.mrb[128].mxu1 %v4598_v51  ;;  %v1777_v2 = vld [vmem:[%s6832_s2 + $0x138] sm:$0xff] }
 0x2bb   : > { %3525 = vmatprep.mubr.bf16.mxu1 %v4607_v21  ;;  %3897 = vperm.xlu1 %5104, %v3727_v35   ;;  %v3728_v21 = vld [vmem:[%s6833_s3 + $0x110] sm:$0xff]  ;;  %v1785_v34 = vld [vmem:[%s6832_s2 + $0x178] sm:$0xff]  ;;  %v4133_v35 = vld [vmem:[#allocation2] sm:$0x1] }
 0x2bc   : > { %3882 = vperm.xlu0 %5103, %v3724_v42  }
 0x2bd   : > { %v6274_v10 = vpop.f32.mrb[200].mxu0 }
 0x2be   : > { %v3038_v20 = vpop.f32.mrb[201].mxu0 }
 0x2bf   : > { %v6282_v25 = vpop.f32.mrb[202].mxu0  ;;  %3887 = vperm.xlu1 %5104, %v3725_v56   ;;  %v1789_v56 = vld [vmem:[%s6832_s2 + $0x198] sm:$0xff] }
 0x2c0   : > { %v3041_v13 = vpop.f32.mrb[203].mxu0  ;;  %3902 = vperm.xlu0 %5103, %v3728_v21   ;;  %v1793_v21 = vld [vmem:[%s6832_s2 + $0x1b8] sm:$0xff] }
 0x2c1   : > { %v4112_v13 = vld [vmem:[%s6836_s6] sm:$0xff] }
 0x2c2   : > { %3526 = vmatmul.mubr.bf16.gmra.mrb[132].mxu1 %v4606_v18  ;;  %v4631_v18 = vcombine.high %v1773_v1, %v1777_v2 }
 0x2c3   : > { %3533 = vmatprep.mubr.bf16.mxu1 %v4615_v41  ;;  %3907 = vperm.xlu1 %5104, %v3729_v6   ;;  %v4017_v41 = vld [vmem:[%s6835_s5 + $0x8] sm:$0xff] }
 0x2c4   : > { %4020 = vperm.xlu0 %5103, %v4016_v62  }
 0x2c5   : > { %v6296_v44 = vpop.f32.mrb[204].mxu0 }
 0x2c6   : > { %v3046_v48 = vpop.f32.mrb[205].mxu0 }
 0x2c7   : > { %v6304_v51 = vpop.f32.mrb[206].mxu0  ;;  %4025 = vperm.xlu1 %5104, %v4017_v41   ;;  %v4647_v41 = vcombine.high %v1789_v56, %v1793_v21 }
 0x2c8   : > { %v3049_v55 = vpop.f32.mrb[207].mxu0  ;;  %4116 = vperm.xlu0 %5103, %v4112_v13  }
 0x2ca   : > { %3534 = vmatmul.mubr.bf16.gmra.mrb[136].mxu1 %v4614_v59  ;;  %v4630_v59 = vcombine.low %v1773_v1, %v1777_v2 }
 0x2cb   : > { %3541 = vmatprep.mubr.bf16.mxu1 %v4623_v49  ;;  %4121 = vperm.xlu1 %5104, %v4113_v31   ;;  %v4639_v49 = vcombine.high %v1781_v32, %v1785_v34 }
 0x2cc   : > { %4136 = vperm.xlu0 %5103, %v4133_v35  }
 0x2cd   : > { %v6318_v37 = vpop.f32.mrb[208].mxu0 }
 0x2ce   : > { %v3054_v11 = vpop.f32.mrb[209].mxu0 }
 0x2cf   : > { %v6326_v4 = vpop.f32.mrb[210].mxu0  ;;  %v4638_v11 = vcombine.low %v1781_v32, %v1785_v34  ;;  %v1801_v32 = vld [vmem:[%s6832_s2 + $0x1f8] sm:$0xff] }
 0x2d0   : > { %6839 = vst [vmem:[#allocation4_spill] sm:$0xff] %v6326_v4  ;;  %v3057_v20 = vpop.f32.mrb[211].mxu0 }
 0x2d2   : > { %3542 = vmatmul.mubr.bf16.gmra.mrb[140].mxu1 %v4622_v63 }
 0x2d3   : > { %3549 = vmatprep.mubr.bf16.mxu1 %v4631_v18 }
 0x2d5   : > { %v6340_v29 = vpop.f32.mrb[212].mxu0 }
 0x2d6   : > { %6840 = vst [vmem:[#allocation5_spill] sm:$0xff] %v6340_v29  ;;  %v3062_v42 = vpop.f32.mrb[213].mxu0 }
 0x2d7   : > { %v6345_v48 = vpop.f32.mrb[214].mxu0 }
 0x2d8   : > { %6841 = vst [vmem:[#allocation6_spill] sm:$0xff] %v6345_v48  ;;  %v3065_v55 = vpop.f32.mrb[215].mxu0 }
 0x2da   : > { %3550 = vmatmul.mubr.bf16.gmra.mrb[144].mxu1 %v4630_v59 }
 0x2db   : > { %3557 = vmatprep.mubr.bf16.mxu1 %v4639_v49 }
 0x2dd   : > { %v3101_v6 = vpop.f32.mrb[216].mxu0  ;;  %v3310_v62 = vpop.f32.mrb[56].mxu1 }
 0x2de   : > { %v3102_v1 = vadd.f32 %v3101_v6, %v5993_v47  ;;  %v3103_v2 = vpop.f32.mrb[217].mxu0  ;;  %v3312_v63 = vpop.f32.mrb[57].mxu1  ;;  %v1797_v47 = vld [vmem:[%s6832_s2 + $0x1d8] sm:$0xff] }
 0x2df   : > { %v3104_v18 = vpop.f32.mrb[218].mxu0  ;;  %v3313_v20 = vpop.f32.mrb[58].mxu1  ;;  %v4655_v63 = vcombine.high %v1797_v47, %v1801_v32 }
 0x2e0   : > { %v6354_v13 = vadd.f32 %v3310_v62, %v3102_v1  ;;  %v3105_v31 = vadd.f32 %v3104_v18, %v5996_v53  ;;  %v3315_v35 = vpop.f32.mrb[59].mxu1  ;;  %v3106_v42 = vpop.f32.mrb[219].mxu0  ;;  %v4646_v62 = vcombine.low %v1789_v56, %v1793_v21  ;;  %v1809_v56 = vld [vmem:[%s6832_s2 + $0x238] sm:$0xff] }
 0x2e2   : > { %v6357_v59 = vadd.f32 %v3313_v20, %v3105_v31  ;;  %3558 = vmatmul.mubr.bf16.gmra.mrb[148].mxu1 %v4638_v11 }
 0x2e3   : > { %3565 = vmatprep.mubr.bf16.mxu1 %v4647_v41 }
 0x2e5   : > { %v3109_v34 = vpop.f32.mrb[220].mxu0  ;;  %v3318_v49 = vpop.f32.mrb[60].mxu1 }
 0x2e6   : > { %v3110_v55 = vadd.f32 %v3109_v34, %v6013_v57  ;;  %v3111_v6 = vpop.f32.mrb[221].mxu0  ;;  %v3320_v53 = vpop.f32.mrb[61].mxu1  ;;  %v1805_v57 = vld [vmem:[%s6832_s2 + $0x218] sm:$0xff] }
 0x2e7   : > { %v3112_v1 = vpop.f32.mrb[222].mxu0  ;;  %v3321_v2 = vpop.f32.mrb[62].mxu1  ;;  %v4663_v53 = vcombine.high %v1805_v57, %v1809_v56 }
 0x2e8   : > { %v6366_v11 = vadd.f32 %v3318_v49, %v3110_v55  ;;  %v3113_v18 = vadd.f32 %v3112_v1, %v6016_v0  ;;  %v3323_v20 = vpop.f32.mrb[63].mxu1  ;;  %v3114_v41 = vpop.f32.mrb[223].mxu0  ;;  %v4654_v49 = vcombine.low %v1797_v47, %v1801_v32  ;;  %v1817_v47 = vld [vmem:[%s6832_s2 + $0x278] sm:$0xff] }
 0x2ea   : > { %v6369_v31 = vadd.f32 %v3321_v2, %v3113_v18  ;;  %3566 = vmatmul.mubr.bf16.gmra.mrb[152].mxu1 %v4646_v62 }
 0x2eb   : > { %3573 = vmatprep.mubr.bf16.mxu1 %v4655_v63 }
 0x2ed   : > { %v3117_v21 = vpop.f32.mrb[224].mxu0  ;;  %v3326_v35 = vpop.f32.mrb[64].mxu1 }
 0x2ee   : > { %v3118_v42 = vadd.f32 %v3117_v21, %v6027_v5  ;;  %v3119_v34 = vpop.f32.mrb[225].mxu0  ;;  %v3328_v0 = vpop.f32.mrb[65].mxu1  ;;  %v1813_v5 = vld [vmem:[%s6832_s2 + $0x258] sm:$0xff] }
 0x2ef   : > { %v3120_v55 = vpop.f32.mrb[226].mxu0  ;;  %v3329_v6 = vpop.f32.mrb[66].mxu1  ;;  %v4671_v0 = vcombine.high %v1813_v5, %v1817_v47 }
 0x2f0   : > { %v6378_v62 = vadd.f32 %v3326_v35, %v3118_v42  ;;  %v3121_v1 = vadd.f32 %v3120_v55, %v6030_v9  ;;  %v3331_v2 = vpop.f32.mrb[67].mxu1  ;;  %v3122_v63 = vpop.f32.mrb[227].mxu0  ;;  %v4662_v35 = vcombine.low %v1805_v57, %v1809_v56  ;;  %v1825_v57 = vld [vmem:[%s6832_s2 + $0x2b8] sm:$0xff] }
 0x2f2   : > { %v6381_v18 = vadd.f32 %v3329_v6, %v3121_v1  ;;  %3574 = vmatmul.mubr.bf16.gmra.mrb[156].mxu1 %v4654_v49 }
 0x2f3   : > { %3581 = vmatprep.mubr.bf16.mxu1 %v4663_v53 }
 0x2f5   : > { %v3125_v32 = vpop.f32.mrb[228].mxu0  ;;  %v3334_v20 = vpop.f32.mrb[68].mxu1 }
 0x2f6   : > { %v3126_v41 = vadd.f32 %v3125_v32, %v6041_v12  ;;  %v3127_v21 = vpop.f32.mrb[229].mxu0  ;;  %v3336_v9 = vpop.f32.mrb[69].mxu1  ;;  %v1821_v12 = vld [vmem:[%s6832_s2 + $0x298] sm:$0xff] }
 0x2f7   : > { %v3128_v42 = vpop.f32.mrb[230].mxu0  ;;  %v3337_v34 = vpop.f32.mrb[70].mxu1  ;;  %v4679_v9 = vcombine.high %v1821_v12, %v1825_v57 }
 0x2f8   : > { %v6390_v49 = vadd.f32 %v3334_v20, %v3126_v41  ;;  %v3129_v55 = vadd.f32 %v3128_v42, %v6044_v3  ;;  %v3339_v6 = vpop.f32.mrb[71].mxu1  ;;  %v3130_v53 = vpop.f32.mrb[231].mxu0  ;;  %v4670_v20 = vcombine.low %v1813_v5, %v1817_v47  ;;  %v1833_v5 = vld [vmem:[%s6832_s2 + $0x2f8] sm:$0xff] }
 0x2fa   : > { %v6393_v1 = vadd.f32 %v3337_v34, %v3129_v55  ;;  %3582 = vmatmul.mubr.bf16.gmra.mrb[160].mxu1 %v4662_v35 }
 0x2fb   : > { %3589 = vmatprep.mubr.bf16.mxu1 %v4671_v0 }
 0x2fd   : > { %v3133_v56 = vpop.f32.mrb[232].mxu0  ;;  %v3342_v2 = vpop.f32.mrb[72].mxu1 }
 0x2fe   : > { %v3134_v63 = vadd.f32 %v3133_v56, %v6053_v23  ;;  %v3135_v32 = vpop.f32.mrb[233].mxu0  ;;  %v3344_v3 = vpop.f32.mrb[73].mxu1  ;;  %v1829_v23 = vld [vmem:[%s6832_s2 + $0x2d8] sm:$0xff] }
 0x2ff   : > { %v3136_v41 = vpop.f32.mrb[234].mxu0  ;;  %v3345_v21 = vpop.f32.mrb[74].mxu1  ;;  %v4687_v3 = vcombine.high %v1829_v23, %v1833_v5 }
 0x300   : > { %v6402_v35 = vadd.f32 %v3342_v2, %v3134_v63  ;;  %v3137_v42 = vadd.f32 %v3136_v41, %v6055_v28  ;;  %v3347_v34 = vpop.f32.mrb[75].mxu1  ;;  %v3138_v0 = vpop.f32.mrb[235].mxu0  ;;  %v4678_v2 = vcombine.low %v1821_v12, %v1825_v57  ;;  %v1841_v12 = vld [vmem:[%s6832_s2 + $0x338] sm:$0xff] }
 0x302   : > { %v6405_v55 = vadd.f32 %v3345_v21, %v3137_v42  ;;  %3590 = vmatmul.mubr.bf16.gmra.mrb[164].mxu1 %v4670_v20 }
 0x303   : > { %3597 = vmatprep.mubr.bf16.mxu1 %v4679_v9 }
 0x305   : > { %v3141_v47 = vpop.f32.mrb[236].mxu0  ;;  %v3350_v6 = vpop.f32.mrb[76].mxu1 }
 0x306   : > { %v3142_v53 = vadd.f32 %v3141_v47, %v6063_v24  ;;  %v3143_v56 = vpop.f32.mrb[237].mxu0  ;;  %v3352_v28 = vpop.f32.mrb[77].mxu1  ;;  %v1837_v24 = vld [vmem:[%s6832_s2 + $0x318] sm:$0xff] }
 0x307   : > { %v3144_v63 = vpop.f32.mrb[238].mxu0  ;;  %v3353_v32 = vpop.f32.mrb[78].mxu1  ;;  %v4695_v28 = vcombine.high %v1837_v24, %v1841_v12 }
 0x308   : > { %v6414_v20 = vadd.f32 %v3350_v6, %v3142_v53  ;;  %v3145_v41 = vadd.f32 %v3144_v63, %v6065_v33  ;;  %v3355_v21 = vpop.f32.mrb[79].mxu1  ;;  %v3146_v9 = vpop.f32.mrb[239].mxu0  ;;  %v4686_v6 = vcombine.low %v1829_v23, %v1833_v5  ;;  %v1849_v23 = vld [vmem:[%s6832_s2 + $0x378] sm:$0xff] }
 0x30a   : > { %v6417_v42 = vadd.f32 %v3353_v32, %v3145_v41  ;;  %3598 = vmatmul.mubr.bf16.gmra.mrb[168].mxu1 %v4678_v2 }
 0x30b   : > { %3605 = vmatprep.mubr.bf16.mxu1 %v4687_v3 }
 0x30d   : > { %v3149_v57 = vpop.f32.mrb[240].mxu0  ;;  %v3358_v34 = vpop.f32.mrb[80].mxu1 }
 0x30e   : > { %v3150_v0 = vadd.f32 %v3149_v57, %v6073_v43  ;;  %v3151_v47 = vpop.f32.mrb[241].mxu0  ;;  %v3360_v33 = vpop.f32.mrb[81].mxu1  ;;  %v1845_v43 = vld [vmem:[%s6832_s2 + $0x358] sm:$0xff] }
 0x30f   : > { %v3152_v53 = vpop.f32.mrb[242].mxu0  ;;  %v3361_v56 = vpop.f32.mrb[82].mxu1  ;;  %v4703_v33 = vcombine.high %v1845_v43, %v1849_v23 }
 0x310   : > { %v6426_v2 = vadd.f32 %v3358_v34, %v3150_v0  ;;  %v3153_v63 = vadd.f32 %v3152_v53, %v6075_v40  ;;  %v3363_v32 = vpop.f32.mrb[83].mxu1  ;;  %v3154_v3 = vpop.f32.mrb[243].mxu0  ;;  %v4694_v34 = vcombine.low %v1837_v24, %v1841_v12  ;;  %v1857_v24 = vld [vmem:[%s6832_s2 + $0x3b8] sm:$0xff] }
 0x312   : > { %v6429_v41 = vadd.f32 %v3361_v56, %v3153_v63  ;;  %3606 = vmatmul.mubr.bf16.gmra.mrb[172].mxu1 %v4686_v6 }
 0x313   : > { %3613 = vmatprep.mubr.bf16.mxu1 %v4695_v28 }
 0x315   : > { %v3157_v5 = vpop.f32.mrb[244].mxu0  ;;  %v3366_v21 = vpop.f32.mrb[84].mxu1 }
 0x316   : > { %v3158_v9 = vadd.f32 %v3157_v5, %v6083_v58  ;;  %v3159_v57 = vpop.f32.mrb[245].mxu0  ;;  %v3368_v40 = vpop.f32.mrb[85].mxu1  ;;  %v1853_v58 = vld [vmem:[%s6832_s2 + $0x398] sm:$0xff] }
 0x317   : > { %v3160_v0 = vpop.f32.mrb[246].mxu0  ;;  %v3369_v47 = vpop.f32.mrb[86].mxu1  ;;  %v1861_v40 = vld [vmem:[%s6832_s2 + $0x3d8] sm:$0xff] }
 0x318   : > { %v6438_v6 = vadd.f32 %v3366_v21, %v3158_v9  ;;  %v3161_v53 = vadd.f32 %v3160_v0, %v6085_v50  ;;  %v3371_v56 = vpop.f32.mrb[87].mxu1  ;;  %v3162_v28 = vpop.f32.mrb[247].mxu0  ;;  %v4702_v50 = vcombine.low %v1845_v43, %v1849_v23  ;;  %v4711_v21 = vcombine.high %v1853_v58, %v1857_v24 }
 0x319   : > { %v4710_v23 = vcombine.low %v1853_v58, %v1857_v24  ;;  %v1869_v56 = vld [vmem:[%s6832_s2 + $0x418] sm:$0xff] }
 0x31a   : > { %v6441_v63 = vadd.f32 %v3369_v47, %v3161_v53  ;;  %3614 = vmatmul.mubr.bf16.gmra.mrb[176].mxu1 %v4694_v34  ;;  %v1865_v34 = vld [vmem:[%s6832_s2 + $0x3f8] sm:$0xff] }
 0x31b   : > { %3621 = vmatprep.mubr.bf16.mxu1 %v4703_v33  ;;  %v1873_v28 = vld [vmem:[%s6832_s2 + $0x438] sm:$0xff]  ;;  %v4718_v24 = vcombine.low %v1861_v40, %v1865_v34 }
 0x31d   : > { %v3374_v12 = vpop.f32.mrb[88].mxu1 }
 0x31e   : > { %v6450_v32 = vadd.f32 %v3374_v12, %v6093_v14  ;;  %v3376_v3 = vpop.f32.mrb[89].mxu1 }
 0x31f   : > { %v3377_v5 = vpop.f32.mrb[90].mxu1 }
 0x320   : > { %v6453_v9 = vadd.f32 %v3377_v5, %v6095_v38  ;;  %v3379_v57 = vpop.f32.mrb[91].mxu1  ;;  %v4719_v38 = vcombine.high %v1861_v40, %v1865_v34  ;;  %v4726_v34 = vcombine.low %v1869_v56, %v1873_v28 }
 0x321   : > { %v1881_v57 = vld [vmem:[%s6832_s2 + $0x478] sm:$0xff] }
 0x322   : > { %3622 = vmatmul.mubr.bf16.gmra.mrb[180].mxu1 %v4702_v50 }
 0x323   : > { %3629 = vmatprep.mubr.bf16.mxu1 %v4711_v21  ;;  %v1877_v21 = vld [vmem:[%s6832_s2 + $0x458] sm:$0xff] }
 0x325   : > { %v3382_v14 = vpop.f32.mrb[92].mxu1 }
 0x326   : > { %v6462_v0 = vadd.f32 %v3382_v14, %v6103_v19  ;;  %v3384_v43 = vpop.f32.mrb[93].mxu1 }
 0x327   : > { %v3385_v47 = vpop.f32.mrb[94].mxu1 }
 0x328   : > { %v6465_v33 = vadd.f32 %v3385_v47, %v6105_v17  ;;  %v3387_v53 = vpop.f32.mrb[95].mxu1  ;;  %v4727_v17 = vcombine.high %v1869_v56, %v1873_v28  ;;  %v4734_v28 = vcombine.low %v1877_v21, %v1881_v57 }
 0x329   : > { %v1889_v53 = vld [vmem:[%s6832_s2 + $0x4b8] sm:$0xff] }
 0x32a   : > { %3630 = vmatmul.mubr.bf16.gmra.mrb[184].mxu1 %v4710_v23 }
 0x32b   : > { %3637 = vmatprep.mubr.bf16.mxu1 %v4719_v38  ;;  %v1885_v38 = vld [vmem:[%s6832_s2 + $0x498] sm:$0xff] }
 0x32d   : > { %v3390_v19 = vpop.f32.mrb[96].mxu1 }
 0x32e   : > { %v6474_v12 = vadd.f32 %v3390_v19, %v6113_v30  ;;  %v3392_v58 = vpop.f32.mrb[97].mxu1 }
 0x32f   : > { %v3393_v3 = vpop.f32.mrb[98].mxu1 }
 0x330   : > { %v6477_v50 = vadd.f32 %v3393_v3, %v6115_v39  ;;  %v3395_v5 = vpop.f32.mrb[99].mxu1  ;;  %v4735_v39 = vcombine.high %v1877_v21, %v1881_v57  ;;  %v4742_v57 = vcombine.low %v1885_v38, %v1889_v53 }
 0x331   : > { %v1897_v5 = vld [vmem:[%s6832_s2 + $0x4f8] sm:$0xff] }
 0x332   : > { %3638 = vmatmul.mubr.bf16.gmra.mrb[188].mxu1 %v4718_v24 }
 0x333   : > { %3645 = vmatprep.mubr.bf16.mxu1 %v4727_v17  ;;  %v1893_v17 = vld [vmem:[%s6832_s2 + $0x4d8] sm:$0xff] }
 0x335   : > { %v3398_v30 = vpop.f32.mrb[100].mxu1 }
 0x336   : > { %v6486_v14 = vadd.f32 %v3398_v30, %v6126_v52  ;;  %v3400_v40 = vpop.f32.mrb[101].mxu1 }
 0x337   : > { %v3401_v43 = vpop.f32.mrb[102].mxu1 }
 0x338   : > { %v6489_v23 = vadd.f32 %v3401_v43, %v6128_v61  ;;  %v3403_v47 = vpop.f32.mrb[103].mxu1  ;;  %v4743_v61 = vcombine.high %v1885_v38, %v1889_v53  ;;  %v4750_v53 = vcombine.low %v1893_v17, %v1897_v5 }
 0x339   : > { %v1905_v47 = vld [vmem:[%s6832_s2 + $0x538] sm:$0xff] }
 0x33a   : > { %3646 = vmatmul.mubr.bf16.gmra.mrb[192].mxu1 %v4726_v34 }
 0x33b   : > { %3653 = vmatprep.mubr.bf16.mxu1 %v4735_v39  ;;  %v1901_v39 = vld [vmem:[%s6832_s2 + $0x518] sm:$0xff] }
 0x33d   : > { %v3406_v52 = vpop.f32.mrb[104].mxu1 }
 0x33e   : > { %v6498_v19 = vadd.f32 %v3406_v52, %v6148_v16  ;;  %v3408_v56 = vpop.f32.mrb[105].mxu1 }
 0x33f   : > { %v3409_v58 = vpop.f32.mrb[106].mxu1 }
 0x340   : > { %v6501_v24 = vadd.f32 %v3409_v58, %v6150_v27  ;;  %v3411_v3 = vpop.f32.mrb[107].mxu1  ;;  %v4751_v27 = vcombine.high %v1893_v17, %v1897_v5  ;;  %v4758_v5 = vcombine.low %v1901_v39, %v1905_v47 }
 0x341   : > { %v1913_v3 = vld [vmem:[%s6832_s2 + $0x578] sm:$0xff] }
 0x342   : > { %3654 = vmatmul.mubr.bf16.gmra.mrb[196].mxu1 %v4734_v28 }
 0x343   : > { %3661 = vmatprep.mubr.bf16.mxu1 %v4743_v61  ;;  %v1909_v61 = vld [vmem:[%s6832_s2 + $0x558] sm:$0xff] }
 0x345   : > { %v3414_v16 = vpop.f32.mrb[108].mxu1 }
 0x346   : > { %v6510_v30 = vadd.f32 %v3414_v16, %v6170_v45  ;;  %v3416_v21 = vpop.f32.mrb[109].mxu1 }
 0x347   : > { %v3417_v40 = vpop.f32.mrb[110].mxu1 }
 0x348   : > { %v6513_v34 = vadd.f32 %v3417_v40, %v6172_v15  ;;  %v3419_v43 = vpop.f32.mrb[111].mxu1  ;;  %v4759_v15 = vcombine.high %v1901_v39, %v1905_v47 }
 0x34a   : > { %3662 = vmatmul.mubr.bf16.gmra.mrb[40].mxu1 %v4742_v57 }
 0x34b   : > { %3669 = vmatprep.mubr.bf16.mxu1 %v4751_v27 }
 0x34d   : > { %v3422_v45 = vpop.f32.mrb[112].mxu1 }
 0x34e   : > { %v6522_v52 = vadd.f32 %v3422_v45, %v6192_v7  ;;  %v3424_v38 = vpop.f32.mrb[113].mxu1 }
 0x34f   : > { %v3425_v56 = vpop.f32.mrb[114].mxu1  ;;  %v4766_v38 = vcombine.low %v1909_v61, %v1913_v3 }
 0x350   : > { %v6525_v28 = vadd.f32 %v3425_v56, %v6194_v22  ;;  %v3427_v58 = vpop.f32.mrb[115].mxu1  ;;  %v4767_v22 = vcombine.high %v1909_v61, %v1913_v3  ;;  %v3733_v3 = vpop.permute.xlu0 %3732 }
 0x352   : > { %3670 = vmatmul.mubr.bf16.gmra.mrb[44].mxu1 %v4750_v53 }
 0x353   : > { %3677 = vmatprep.mubr.bf16.mxu1 %v4759_v15 }
 0x355   : > { %v3430_v7 = vpop.f32.mrb[116].mxu1 }
 0x356   : > { %v6534_v16 = vadd.f32 %v3430_v7, %v6214_v36  ;;  %v3432_v17 = vpop.f32.mrb[117].mxu1 }
 0x357   : > { %v3433_v21 = vpop.f32.mrb[118].mxu1 }
 0x358   : > { %v6537_v57 = vadd.f32 %v3433_v21, %v6216_v54  ;;  %v3435_v40 = vpop.f32.mrb[119].mxu1 }
 0x359   : > { %v3738_v40 = vpop.permute.xlu0 %3737 }
 0x35a   : > { %3678 = vmatmul.mubr.bf16.gmra.mrb[48].mxu1 %v4758_v5 }
 0x35b   : > { %3685 = vmatprep.mubr.bf16.mxu1 %v4767_v22  ;;  %v3753_v22 = vpop.permute.xlu1 %3752 }
 0x35d   : > { %v3438_v27 = vpop.f32.mrb[120].mxu1 }
 0x35e   : > { %v6540_v43 = vadd.f32 %v3438_v27, %v6236_v8  ;;  %v3440_v45 = vpop.f32.mrb[121].mxu1 }
 0x35f   : > { %v3441_v53 = vpop.f32.mrb[122].mxu1 }
 0x360   : > { %v6543_v36 = vadd.f32 %v3441_v53, %v6238_v26  ;;  %v3443_v56 = vpop.f32.mrb[123].mxu1 }
 0x362   : > { %3686 = vmatmul.mubr.bf16.gmra.mrb[52].mxu1 %v4766_v38  ;;  %v3758_v38 = vpop.permute.xlu1 %3757 }
 0x365   : > { %v3446_v39 = vpop.f32.mrb[124].mxu1 }
 0x366   : > { %v6546_v47 = vadd.f32 %v3446_v39, %v6258_v46  ;;  %v3448_v54 = vpop.f32.mrb[125].mxu1  ;;  %v3773_v39 = vpop.permute.xlu0 %3772 }
 0x367   : > { %v3449_v15 = vpop.f32.mrb[126].mxu1  ;;  %v3778_v54 = vpop.permute.xlu1 %3777 }
 0x368   : > { %v6549_v58 = vadd.f32 %v3449_v15, %v6260_v60  ;;  %v3451_v7 = vpop.f32.mrb[127].mxu1 }
 0x36b   : > { %v3748_v4 = vpop.permute.xlu1 %3747 }
 0x38d   : > { %v3519_v8 = vpop.f32.mrb[128].mxu1 }
 0x38e   : > { %v3520_v17 = vadd.f32 %v3519_v8, %v6354_v13  ;;  %v3521_v61 = vpop.f32.mrb[129].mxu1 }
 0x38f   : > { %v3522_v5 = vpop.f32.mrb[130].mxu1 }
 0x390   : > { %v3523_v26 = vadd.f32 %v3522_v5, %v6357_v59  ;;  %v3524_v21 = vpop.f32.mrb[131].mxu1  ;;  %v3910_v15 = vadd.f32 %v3733_v3, %v3520_v17  ;;  %v4014_v17 = vld [vmem:[%s6834_s4] sm:$0xff] }
 0x391   : > { %4993 = vmatprep.mubr.msk.f32.mxu0 %vm4028_vm1, %v4014_v17 }
 0x392   : > { %v3911_v61 = vadd.f32 %v3738_v40, %v3523_v26 }
 0x395   : > { %v3527_v27 = vpop.f32.mrb[132].mxu1 }
 0x396   : > { %v3528_v46 = vadd.f32 %v3527_v27, %v6366_v11  ;;  %v3529_v45 = vpop.f32.mrb[133].mxu1  ;;  %v3743_v11 = vpop.permute.xlu0 %3742  ;;  %v3946_v27 = vmax.f32 %v3910_v15, 0.0 }
 0x397   : > { %v3530_v53 = vpop.f32.mrb[134].mxu1 }
 0x398   : > { %v3531_v60 = vadd.f32 %v3530_v53, %v6369_v31  ;;  %v3532_v56 = vpop.f32.mrb[135].mxu1  ;;  %v3947_v31 = vmax.f32 %v3911_v61, 0.0  ;;  %v3912_v3 = vadd.f32 %v3743_v11, %v3528_v46 }
 0x39d   : > { %v3535_v13 = vpop.f32.mrb[136].mxu1 }
 0x39e   : > { %v3536_v7 = vadd.f32 %v3535_v13, %v6378_v62  ;;  %v3537_v8 = vpop.f32.mrb[137].mxu1 }
 0x39f   : > { %v3538_v59 = vpop.f32.mrb[138].mxu1  ;;  %v3948_v8 = vmax.f32 %v3912_v3, 0.0 }
 0x3a0   : > { %v3914_v5 = vadd.f32 %v3753_v22, %v3536_v7  ;;  %v3539_v21 = vadd.f32 %v3538_v59, %v6381_v18  ;;  %v3540_v48 = vpop.f32.mrb[139].mxu1  ;;  %v3763_v22 = vpop.permute.xlu0 %3762 }
 0x3a1   : > { %v3768_v7 = vpop.permute.xlu1 %3767 }
 0x3a2   : > { %v3950_v45 = vmax.f32 %v3914_v5, 0.0  ;;  %v3915_v29 = vadd.f32 %v3758_v38, %v3539_v21  ;;  %v3913_v38 = vadd.f32 %v3748_v4, %v3531_v60 }
 0x3a4   : > { %v3982_v53 = vadd.f32 %v3950_v45, %v3946_v27  ;;  %v3951_v56 = vmax.f32 %v3915_v29, 0.0  ;;  %v3949_v5 = vmax.f32 %v3913_v38, 0.0  ;;  %v3793_v17 = vpop.permute.xlu0 %3792 }
 0x3a5   : > { %v3543_v62 = vpop.f32.mrb[140].mxu1 }
 0x3a6   : > { %v3983_v26 = vadd.f32 %v3951_v56, %v3947_v31  ;;  %v3544_v48 = vadd.f32 %v3543_v62, %v6390_v49  ;;  %v3545_v18 = vpop.f32.mrb[141].mxu1 }
 0x3a7   : > { %v3546_v40 = vpop.f32.mrb[142].mxu1 }
 0x3a8   : > { %v3916_v13 = vadd.f32 %v3763_v22, %v3544_v48  ;;  %v3547_v15 = vadd.f32 %v3546_v40, %v6393_v1  ;;  %v3548_v29 = vpop.f32.mrb[143].mxu1  ;;  %v3798_v48 = vpop.permute.xlu1 %3797 }
 0x3aa   : > { %v3952_v59 = vmax.f32 %v3916_v13, 0.0  ;;  %v3917_v61 = vadd.f32 %v3768_v7, %v3547_v15  ;;  %v3783_v15 = vpop.permute.xlu0 %3782 }
 0x3ac   : > { %v3984_v21 = vadd.f32 %v3952_v59, %v3948_v8  ;;  %v3953_v27 = vmax.f32 %v3917_v61, 0.0  ;;  %v3788_v8 = vpop.permute.xlu1 %3787 }
 0x3ad   : > { %v3551_v45 = vpop.f32.mrb[144].mxu1 }
 0x3ae   : > { %v3985_v46 = vadd.f32 %v3953_v27, %v3949_v5  ;;  %v3552_v11 = vadd.f32 %v3551_v45, %v6402_v35  ;;  %v3553_v49 = vpop.f32.mrb[145].mxu1 }
 0x3af   : > { %v3554_v31 = vpop.f32.mrb[146].mxu1 }
 0x3b0   : > { %v3918_v56 = vadd.f32 %v3773_v39, %v3552_v11  ;;  %v3555_v4 = vadd.f32 %v3554_v31, %v6405_v55  ;;  %v3556_v60 = vpop.f32.mrb[147].mxu1  ;;  %v3813_v31 = vpop.permute.xlu0 %3812 }
 0x3b2   : > { %v3954_v1 = vmax.f32 %v3918_v56, 0.0  ;;  %v3919_v62 = vadd.f32 %v3778_v54, %v3555_v4 }
 0x3b4   : > { %v3986_v3 = vadd.f32 %v3982_v53, %v3954_v1  ;;  %v3955_v18 = vmax.f32 %v3919_v62, 0.0 }
 0x3b5   : > { %v3559_v22 = vpop.f32.mrb[148].mxu1 }
 0x3b6   : > { %v3987_v40 = vadd.f32 %v3983_v26, %v3955_v18  ;;  %v3560_v38 = vadd.f32 %v3559_v22, %v6414_v20  ;;  %v3561_v13 = vpop.f32.mrb[149].mxu1 }
 0x3b7   : > { %v3562_v29 = vpop.f32.mrb[150].mxu1 }
 0x3b8   : > { %v3920_v35 = vadd.f32 %v3783_v15, %v3560_v38  ;;  %v3563_v7 = vadd.f32 %v3562_v29, %v6417_v42  ;;  %v3564_v39 = vpop.f32.mrb[151].mxu1  ;;  %v3818_v42 = vpop.permute.xlu1 %3817 }
 0x3ba   : > { %v3956_v55 = vmax.f32 %v3920_v35, 0.0  ;;  %v3921_v59 = vadd.f32 %v3788_v8, %v3563_v7 }
 0x3bc   : > { %v3988_v61 = vadd.f32 %v3984_v21, %v3956_v55  ;;  %v3957_v5 = vmax.f32 %v3921_v59, 0.0  ;;  %v3808_v15 = vpop.permute.xlu1 %3807 }
 0x3bd   : > { %v3567_v54 = vpop.f32.mrb[152].mxu1 }
 0x3be   : > { %v3989_v27 = vadd.f32 %v3985_v46, %v3957_v5  ;;  %v3568_v53 = vadd.f32 %v3567_v54, %v6426_v2  ;;  %v3569_v45 = vpop.f32.mrb[153].mxu1  ;;  %v3803_v46 = vpop.permute.xlu0 %3802 }
 0x3bf   : > { %v3570_v26 = vpop.f32.mrb[154].mxu1 }
 0x3c0   : > { %v3922_v11 = vadd.f32 %v3793_v17, %v3568_v53  ;;  %v3571_v20 = vadd.f32 %v3570_v26, %v6429_v41  ;;  %v3572_v49 = vpop.f32.mrb[155].mxu1 }
 0x3c2   : > { %v3958_v56 = vmax.f32 %v3922_v11, 0.0  ;;  %v3923_v4 = vadd.f32 %v3798_v48, %v3571_v20  ;;  %v3833_v5 = vpop.permute.xlu0 %3832 }
 0x3c4   : > { %v3990_v60 = vadd.f32 %v3986_v3, %v3958_v56  ;;  %v3959_v1 = vmax.f32 %v3923_v4, 0.0 }
 0x3c5   : > { %v3575_v62 = vpop.f32.mrb[156].mxu1 }
 0x3c6   : > { %v3991_v18 = vadd.f32 %v3987_v40, %v3959_v1  ;;  %v3576_v21 = vadd.f32 %v3575_v62, %v6438_v6  ;;  %v3577_v22 = vpop.f32.mrb[157].mxu1 }
 0x3c7   : > { %v3578_v38 = vpop.f32.mrb[158].mxu1 }
 0x3c8   : > { %v3924_v2 = vadd.f32 %v3803_v46, %v3576_v21  ;;  %v3579_v13 = vadd.f32 %v3578_v38, %v6441_v63  ;;  %v3580_v17 = vpop.f32.mrb[159].mxu1  ;;  %v3838_v63 = vpop.permute.xlu1 %3837 }
 0x3ca   : > { %v3960_v41 = vmax.f32 %v3924_v2, 0.0  ;;  %v3925_v29 = vadd.f32 %v3808_v15, %v3579_v13 }
 0x3cc   : > { %v3992_v35 = vadd.f32 %v3988_v61, %v3960_v41  ;;  %v3961_v7 = vmax.f32 %v3925_v29, 0.0  ;;  %v3828_v1 = vpop.permute.xlu1 %3827 }
 0x3cd   : > { %v3583_v48 = vpop.f32.mrb[160].mxu1 }
 0x3ce   : > { %v3993_v39 = vadd.f32 %v3989_v27, %v3961_v7  ;;  %v3584_v3 = vadd.f32 %v3583_v48, %v6450_v32  ;;  %v3585_v8 = vpop.f32.mrb[161].mxu1  ;;  %v3823_v27 = vpop.permute.xlu0 %3822 }
 0x3cf   : > { %v3586_v40 = vpop.f32.mrb[162].mxu1 }
 0x3d0   : > { %v3926_v55 = vadd.f32 %v3813_v31, %v3584_v3  ;;  %v3587_v6 = vadd.f32 %v3586_v40, %v6453_v9  ;;  %v3588_v59 = vpop.f32.mrb[163].mxu1 }
 0x3d2   : > { %v3962_v54 = vmax.f32 %v3926_v55, 0.0  ;;  %v3927_v53 = vadd.f32 %v3818_v42, %v3587_v6  ;;  %v3853_v17 = vpop.permute.xlu0 %3852 }
 0x3d4   : > { %v3994_v45 = vadd.f32 %v3990_v60, %v3962_v54  ;;  %v3963_v26 = vmax.f32 %v3927_v53, 0.0 }
 0x3d5   : > { %v3591_v11 = vpop.f32.mrb[164].mxu1 }
 0x3d6   : > { %v3995_v20 = vadd.f32 %v3991_v18, %v3963_v26  ;;  %v3592_v61 = vadd.f32 %v3591_v11, %v6462_v0  ;;  %v3593_v49 = vpop.f32.mrb[165].mxu1 }
 0x3d7   : > { %v3594_v56 = vpop.f32.mrb[166].mxu1 }
 0x3d8   : > { %v3928_v32 = vadd.f32 %v3823_v27, %v3592_v61  ;;  %v3595_v4 = vadd.f32 %v3594_v56, %v6465_v33  ;;  %v3596_v31 = vpop.f32.mrb[167].mxu1  ;;  %v3858_v33 = vpop.permute.xlu1 %3857 }
 0x3da   : > { %v3964_v9 = vmax.f32 %v3928_v32, 0.0  ;;  %v3929_v62 = vadd.f32 %v3828_v1, %v3595_v4 }
 0x3dc   : > { %v3996_v21 = vadd.f32 %v3992_v35, %v3964_v9  ;;  %v3965_v22 = vmax.f32 %v3929_v62, 0.0  ;;  %v3848_v59 = vpop.permute.xlu1 %3847 }
 0x3dd   : > { %v3599_v42 = vpop.f32.mrb[168].mxu1 }
 0x3de   : > { %v3997_v46 = vadd.f32 %v3993_v39, %v3965_v22  ;;  %v3600_v60 = vadd.f32 %v3599_v42, %v6474_v12  ;;  %v3601_v38 = vpop.f32.mrb[169].mxu1  ;;  %v3843_v39 = vpop.permute.xlu0 %3842 }
 0x3df   : > { %v3602_v18 = vpop.f32.mrb[170].mxu1 }
 0x3e0   : > { %v3930_v2 = vadd.f32 %v3833_v5, %v3600_v60  ;;  %v3603_v0 = vadd.f32 %v3602_v18, %v6477_v50  ;;  %v3604_v13 = vpop.f32.mrb[171].mxu1 }
 0x3e2   : > { %v3966_v15 = vmax.f32 %v3930_v2, 0.0  ;;  %v3931_v41 = vadd.f32 %v3838_v63, %v3603_v0  ;;  %v3873_v27 = vpop.permute.xlu0 %3872 }
 0x3e4   : > { %v3998_v29 = vadd.f32 %v3994_v45, %v3966_v15  ;;  %v3967_v7 = vmax.f32 %v3931_v41, 0.0 }
 0x3e5   : > { %v3607_v48 = vpop.f32.mrb[172].mxu1 }
 0x3e6   : > { %v3999_v3 = vadd.f32 %v3995_v20, %v3967_v7  ;;  %v3608_v35 = vadd.f32 %v3607_v48, %v6486_v14  ;;  %v3609_v8 = vpop.f32.mrb[173].mxu1  ;;  %v3863_v22 = vpop.permute.xlu0 %3862 }
 0x3e7   : > { %v3610_v40 = vpop.f32.mrb[174].mxu1 }
 0x3e8   : > { %v3932_v12 = vadd.f32 %v3843_v39, %v3608_v35  ;;  %v3611_v55 = vadd.f32 %v3610_v40, %v6489_v23  ;;  %v3612_v6 = vpop.f32.mrb[175].mxu1  ;;  %v3878_v23 = vpop.permute.xlu1 %3877 }
 0x3ea   : > { %v3968_v50 = vmax.f32 %v3932_v12, 0.0  ;;  %v3933_v5 = vadd.f32 %v3848_v59, %v3611_v55  ;;  %v3893_v48 = vpop.permute.xlu0 %3892 }
 0x3ec   : > { %v4000_v54 = vadd.f32 %v3996_v21, %v3968_v50  ;;  %v3969_v53 = vmax.f32 %v3933_v5, 0.0  ;;  %v3868_v38 = vpop.permute.xlu1 %3867 }
 0x3ed   : > { %v3615_v63 = vpop.f32.mrb[176].mxu1 }
 0x3ee   : > { %v4001_v26 = vadd.f32 %v3997_v46, %v3969_v53  ;;  %v3616_v45 = vadd.f32 %v3615_v63, %v6498_v19  ;;  %v3617_v11 = vpop.f32.mrb[177].mxu1  ;;  %v3883_v59 = vpop.permute.xlu0 %3882 }
 0x3ef   : > { %v3618_v20 = vpop.f32.mrb[178].mxu1 }
 0x3f0   : > { %v3934_v61 = vadd.f32 %v3853_v17, %v3616_v45  ;;  %v3619_v14 = vadd.f32 %v3618_v20, %v6501_v24  ;;  %v3620_v49 = vpop.f32.mrb[179].mxu1 }
 0x3f2   : > { %v3970_v56 = vmax.f32 %v3934_v61, 0.0  ;;  %v3935_v32 = vadd.f32 %v3858_v33, %v3619_v14 }
 0x3f4   : > { %v4002_v4 = vadd.f32 %v3998_v29, %v3970_v56  ;;  %v3971_v31 = vmax.f32 %v3935_v32, 0.0 }
 0x3f5   : > { %v3623_v1 = vpop.f32.mrb[180].mxu1 }
 0x3f6   : > { %v4003_v9 = vadd.f32 %v3999_v3, %v3971_v31  ;;  %v3624_v62 = vadd.f32 %v3623_v1, %v6510_v30  ;;  %v3625_v21 = vpop.f32.mrb[181].mxu1 }
 0x3f7   : > { %v3626_v42 = vpop.f32.mrb[182].mxu1  ;;  %v3903_v21 = vpop.permute.xlu0 %3902 }
 0x3f8   : > { %v3936_v19 = vadd.f32 %v3863_v22, %v3624_v62  ;;  %v3627_v46 = vadd.f32 %v3626_v42, %v6513_v34  ;;  %v3628_v60 = vpop.f32.mrb[183].mxu1  ;;  %v3898_v34 = vpop.permute.xlu1 %3897 }
 0x3fa   : > { %v3972_v24 = vmax.f32 %v3936_v19, 0.0  ;;  %v3937_v18 = vadd.f32 %v3868_v38, %v3627_v46 }
 0x3fc   : > { %v4004_v2 = vadd.f32 %v4000_v54, %v3972_v24  ;;  %v3973_v0 = vmax.f32 %v3937_v18, 0.0  ;;  %v3888_v53 = vpop.permute.xlu1 %3887 }
 0x3fd   : > { %v3631_v13 = vpop.f32.mrb[184].mxu1 }
 0x3fe   : > { %v4005_v17 = vadd.f32 %v4001_v26, %v3973_v0  ;;  %v3632_v15 = vadd.f32 %v3631_v13, %v6522_v52  ;;  %v3633_v41 = vpop.f32.mrb[185].mxu1 }
 0x3ff   : > { %v3634_v33 = vpop.f32.mrb[186].mxu1 }
 0x400   : > { %v3938_v29 = vadd.f32 %v3873_v27, %v3632_v15  ;;  %v3635_v30 = vadd.f32 %v3634_v33, %v6525_v28  ;;  %v3636_v7 = vpop.f32.mrb[187].mxu1  ;;  %v3908_v60 = vpop.permute.xlu1 %3907  ;;  %v4015_v33 = vld [vmem:[%s6834_s4 + $0x8] sm:$0xff] }
 0x402   : > { %v3974_v3 = vmax.f32 %v3938_v29, 0.0  ;;  %v3939_v35 = vadd.f32 %v3878_v23, %v3635_v30 }
 0x404   : > { %v4006_v8 = vadd.f32 %v4002_v4, %v3974_v3  ;;  %v3975_v39 = vmax.f32 %v3939_v35, 0.0 }
 0x405   : > { %v3639_v40 = vpop.f32.mrb[188].mxu1 }
 0x406   : > { %v4007_v12 = vadd.f32 %v4003_v9, %v3975_v39  ;;  %v3640_v55 = vadd.f32 %v3639_v40, %v6534_v16  ;;  %v3641_v6 = vpop.f32.mrb[189].mxu1  ;;  %v6842_v40 = vld [vmem:[#allocation4_spill] sm:$0xff] }
 0x407   : > { %v3642_v50 = vpop.f32.mrb[190].mxu1 }
 0x408   : > { %v3940_v52 = vadd.f32 %v3883_v59, %v3640_v55  ;;  %v3643_v5 = vadd.f32 %v3642_v50, %v6537_v57  ;;  %v3644_v54 = vpop.f32.mrb[191].mxu1  ;;  %v6843_v59 = vld [vmem:[#allocation5_spill] sm:$0xff] }
 0x409   : > { %v6844_v54 = vld [vmem:[#allocation6_spill] sm:$0xff] }
 0x40a   : > { %v3976_v28 = vmax.f32 %v3940_v52, 0.0  ;;  %v3941_v63 = vadd.f32 %v3888_v53, %v3643_v5 }
 0x40c   : > { %v4008_v26 = vadd.f32 %v4004_v2, %v3976_v28  ;;  %v3977_v45 = vmax.f32 %v3941_v63, 0.0 }
 0x40d   : > { %v3647_v11 = vpop.f32.mrb[192].mxu1 }
 0x40e   : > { %v4009_v20 = vadd.f32 %v4005_v17, %v3977_v45  ;;  %v3648_v61 = vadd.f32 %v3647_v11, %v6540_v43  ;;  %v3649_v14 = vpop.f32.mrb[193].mxu1 }
 0x40f   : > { %v3650_v49 = vpop.f32.mrb[194].mxu1 }
 0x410   : > { %v3942_v27 = vadd.f32 %v3893_v48, %v3648_v61  ;;  %v3651_v16 = vadd.f32 %v3650_v49, %v6543_v36  ;;  %v3652_v56 = vpop.f32.mrb[195].mxu1  ;;  %v4139_v61 = vlaneseq }
 0x412   : > { %v3978_v32 = vmax.f32 %v3942_v27, 0.0  ;;  %v3943_v23 = vadd.f32 %v3898_v34, %v3651_v16  ;;  %v6627_v27 = vshrl.u32 %v4139_v61, 7 }
 0x414   : > { %v4010_v4 = vadd.f32 %v4006_v8, %v3978_v32  ;;  %v3979_v57 = vmax.f32 %v3943_v23, 0.0  ;;  %v4183_v32 = vadd.s32 8, %v6627_v27  ;;  %v4184_v23 = vadd.s32 16, %v6627_v27 }
 0x415   : > { %v3655_v31 = vpop.f32.mrb[196].mxu1 }
 0x416   : > { %v4011_v1 = vadd.f32 %v4007_v12, %v3979_v57  ;;  %v3656_v9 = vadd.f32 %v3655_v31, %v6546_v47  ;;  %v3657_v62 = vpop.f32.mrb[197].mxu1  ;;  %v4186_v57 = vadd.s32 32, %v6627_v27  ;;  %v4187_v31 = vadd.s32 40, %v6627_v27 }
 0x417   : > { %v3658_v22 = vpop.f32.mrb[198].mxu1 }
 0x418   : > { %v3944_v42 = vadd.f32 %v3903_v21, %v3656_v9  ;;  %v3659_v43 = vadd.f32 %v3658_v22, %v6549_v58  ;;  %v4996_v19 = vpack.c.bf16 %v4011_v1, %v4010_v4  ;;  %v3660_v46 = vpop.f32.mrb[199].mxu1  ;;  %v4185_v4 = vadd.s32 24, %v6627_v27 }
 0x419   : > { %v4188_v1 = vadd.s32 48, %v6627_v27  ;;  %v4189_v9 = vadd.s32 56, %v6627_v27 }
 0x41a   : > { %v3980_v38 = vmax.f32 %v3944_v42, 0.0  ;;  %v3945_v36 = vadd.f32 %v3908_v60, %v3659_v43  ;;  %4997 = vmatprep.subr.bf16.mxu0 %v4996_v19 }
 0x41b   : > { %4999 = vmatpush3.bf16.msra.mxu0 %v4996_v19 }
 0x41c   : > { %v4012_v24 = vadd.f32 %v4008_v26, %v3980_v38  ;;  %v3981_v18 = vmax.f32 %v3945_v36, 0.0  ;;  %v6655_v38 = vcvt.s32.f32 %v6627_v27  ;;  %v6659_v36 = vcvt.s32.f32 %v4183_v32 }
 0x41d   : > { %v3663_v2 = vpop.f32.mrb[40].mxu1 }
 0x41e   : > { %v4013_v0 = vadd.f32 %v4009_v20, %v3981_v18  ;;  %v6592_v13 = vadd.f32 %v3663_v2, %v6274_v10  ;;  %v3665_v47 = vpop.f32.mrb[41].mxu1  ;;  %v6663_v18 = vcvt.s32.f32 %v4185_v4  ;;  %v6667_v2 = vcvt.s32.f32 %v4186_v57 }
 0x41f   : > { %v3666_v17 = vpop.f32.mrb[42].mxu1  ;;  %v6671_v47 = vcvt.s32.f32 %v4188_v1 }
 0x420   : > { %v6595_v15 = vadd.f32 %v3666_v17, %v6282_v25  ;;  %v3668_v58 = vpop.f32.mrb[43].mxu1  ;;  %v5000_v41 = vpack.c.bf16 %v4013_v0, %v4012_v24  ;;  %v6661_v24 = vcvt.s32.f32 %v4184_v23  ;;  %v6669_v0 = vcvt.s32.f32 %v4187_v31 }
 0x421   : > { %v6675_v17 = vcvt.s32.f32 %v4189_v9 }
 0x422   : > { %5001 = vmatprep.subr.bf16.mxu0 %v5000_v41 }
 0x423   : > { %5003 = vmatpush3.bf16.msra.mxu0 %v5000_v41 }
 0x425   : > { %v3671_v29 = vpop.f32.mrb[44].mxu1 }
 0x426   : > { %v6601_v30 = vadd.f32 %v3671_v29, %v6296_v44  ;;  %v3673_v7 = vpop.f32.mrb[45].mxu1  ;;  %4994 = vmatmul.mubr.msk.f32.vlgmr.msra.gmra.mrb[248].mxu0 %vm4028_vm1, %v4015_v33 }
 0x427   : > { %v3674_v10 = vpop.f32.mrb[46].mxu1 }
 0x428   : > { %v6605_v48 = vadd.f32 %v3674_v10, %v6304_v51  ;;  %v3676_v25 = vpop.f32.mrb[47].mxu1 }
 0x42d   : > { %v3679_v3 = vpop.f32.mrb[48].mxu1 }
 0x42e   : > { %v6608_v35 = vadd.f32 %v3679_v3, %v6318_v37  ;;  %v3681_v34 = vpop.f32.mrb[49].mxu1 }
 0x42f   : > { %v3682_v8 = vpop.f32.mrb[50].mxu1 }
 0x430   : > { %v4144_v39 = vmax.f32 %v6592_v13, %v6608_v35  ;;  %v6613_v44 = vadd.f32 %v3682_v8, %v6842_v40  ;;  %v3684_v12 = vpop.f32.mrb[51].mxu1 }
 0x432   : > { %v4145_v55 = vmax.f32 %v6595_v15, %v6613_v44 }
 0x434   : > { %v4148_v6 = vmax.f32 %v4144_v39, %v4145_v55 }
 0x435   : > { %v3687_v51 = vpop.f32.mrb[52].mxu1 }
 0x436   : > { %v6618_v50 = vadd.f32 %v3687_v51, %v6843_v59  ;;  %v3689_v52 = vpop.f32.mrb[53].mxu1  ;;  %v4198_v51 = vmul.f32 0.125, %v6655_v38  ;;  %v4199_v59 = vmul.f32 0.125, %v6659_v36 }
 0x437   : > { %v3690_v37 = vpop.f32.mrb[54].mxu1  ;;  %v4200_v52 = vmul.f32 0.125, %v6661_v24 }
 0x438   : > { %v4146_v5 = vmax.f32 %v6601_v30, %v6618_v50  ;;  %v6623_v53 = vadd.f32 %v3690_v37, %v6844_v54  ;;  %v3692_v28 = vpop.f32.mrb[55].mxu1  ;;  %v4201_v37 = vmul.f32 0.125, %v6663_v18  ;;  %v4202_v54 = vmul.f32 0.125, %v6667_v2 }
 0x439   : > { %v4203_v28 = vmul.f32 0.125, %v6669_v0  ;;  %v6707_v61 = vfloor.f32 %v4200_v52 }
 0x43a   : > { %v4147_v63 = vmax.f32 %v6605_v48, %v6623_v53 }
 0x43b   : > { %v6713_v32 = vfloor.f32 %v4203_v28 }
 0x43c   : > { %v4149_v26 = vmax.f32 %v4146_v5, %v4147_v63  ;;  %v4204_v63 = vmul.f32 0.125, %v6671_v47 }
 0x43e   : > { %v4150_v45 = vmax.f32 %v4148_v6, %v4149_v26  ;;  %v6715_v23 = vfloor.f32 %v4204_v63 }
 0x440   : > { %v4151_v11 = vrot.slane %v4150_v45, 4 }
 0x442   : > { %v4152_v20 = vmax.f32 %v4150_v45, %v4151_v11  ;;  %v4205_v45 = vmul.f32 0.125, %v6675_v17  ;;  %v6703_v11 = vfloor.f32 %v4198_v51 }
 0x444   : > { %v4153_v14 = vrot.slane %v4152_v20, 2  ;;  %v6717_v57 = vfloor.f32 %v4205_v45  ;;  %v4214_v31 = vmul.f32 8.0, %v6703_v11 }
 0x446   : > { %v4154_v49 = vmax.f32 %v4152_v20, %v4153_v14  ;;  %v6705_v20 = vfloor.f32 %v4199_v59  ;;  %v6709_v14 = vfloor.f32 %v4201_v37 }
 0x448   : > { %v4155_v16 = vrot.slane %v4154_v49, 1  ;;  %v4215_v1 = vmul.f32 8.0, %v6705_v20 }
 0x44a   : > { %v6629_v56 = vmax.f32 %v4154_v49, %v4155_v16  ;;  %v6711_v16 = vfloor.f32 %v4202_v54 }
 0x44c   : > { %v4157_v62 = vsub.f32 %v6592_v13, %v6629_v56  ;;  %v4158_v21 = vsub.f32 %v6595_v15, %v6629_v56  ;;  %v4159_v22 = vsub.f32 %v6601_v30, %v6629_v56  ;;  %v4160_v42 = vsub.f32 %v6605_v48, %v6629_v56 }
 0x44d   : > { %v4161_v43 = vsub.f32 %v6608_v35, %v6629_v56  ;;  %v4162_v19 = vsub.f32 %v6613_v44, %v6629_v56  ;;  %v4163_v46 = vsub.f32 %v6618_v50, %v6629_v56  ;;  %v4164_v60 = vsub.f32 %v6623_v53, %v6629_v56 }
 0x44e   : > { %vm4230_vm2 = vcmp.ge.f32.partialorder %v6592_v13, %v6629_v56  ;;  %vm4231_vm3 = vcmp.ge.f32.partialorder %v6595_v15, %v6629_v56  ;;  %vm4232_vm4 = vcmp.ge.f32.partialorder %v6601_v30, %v6629_v56  ;;  %vm4233_vm5 = vcmp.ge.f32.partialorder %v6605_v48, %v6629_v56 }
 0x44f   : > { %vm4234_vm6 = vcmp.ge.f32.partialorder %v6608_v35, %v6629_v56  ;;  %vm4235_vm7 = vcmp.ge.f32.partialorder %v6613_v44, %v6629_v56  ;;  %vm4236_vm8 = vcmp.ge.f32.partialorder %v6618_v50, %v6629_v56  ;;  %vm4237_vm9 = vcmp.ge.f32.partialorder %v6623_v53, %v6629_v56 }
 0x450   : > { %v4238_v13 = vsel %vm4230_vm2, %v6655_v38, 64.0  ;;  %v4239_v58 = vsel %vm4231_vm3, %v6659_v36, 64.0  ;;  %v4240_v41 = vsel %vm4232_vm4, %v6661_v24, 64.0  ;;  %v4241_v33 = vsel %vm4233_vm5, %v6663_v18, 64.0 }
 0x451   : > { %v4242_v29 = vsel %vm4234_vm6, %v6667_v2, 64.0  ;;  %v4243_v7 = vsel %vm4235_vm7, %v6669_v0, 64.0  ;;  %v4244_v10 = vsel %vm4236_vm8, %v6671_v47, 64.0  ;;  %v4245_v25 = vsel %vm4237_vm9, %v6675_v17, 64.0 }
 0x452   : > { %v4246_v3 = vmin.f32 %v4238_v13, %v4242_v29  ;;  %v4247_v34 = vmin.f32 %v4239_v58, %v4243_v7  ;;  %v4248_v8 = vmin.f32 %v4240_v41, %v4244_v10  ;;  %v4249_v39 = vmin.f32 %v4241_v33, %v4245_v25 }
 0x453   : > { %v4165_v9 = vmul.f32 1.442695, %v4157_v62  ;;  %v4216_v13 = vmul.f32 8.0, %v6707_v61  ;;  %v4217_v58 = vmul.f32 8.0, %v6709_v14  ;;  %v4167_v33 = vmul.f32 1.442695, %v4158_v21 }
 0x454   : > { %v4250_v40 = vmin.f32 %v4246_v3, %v4247_v34  ;;  %v4251_v12 = vmin.f32 %v4248_v8, %v4249_v39  ;;  %v4218_v29 = vmul.f32 8.0, %v6711_v16  ;;  %v4169_v7 = vmul.f32 1.442695, %v4159_v22 }
 0x455   : > { %v4219_v10 = vmul.f32 8.0, %v6713_v32  ;;  %v4220_v25 = vmul.f32 8.0, %v6715_v23  ;;  %v4171_v3 = vmul.f32 1.442695, %v4160_v42  ;;  %v4221_v34 = vmul.f32 8.0, %v6717_v57 }
 0x456   : > { %v4252_v55 = vmin.f32 %v4250_v40, %v4251_v12  ;;  %v6737_v15 = vsub.f32 %v6655_v38, %v4214_v31  ;;  %v6740_v21 = vsub.f32 %v6659_v36, %v4215_v1  ;;  %5174 = vpow2.f32 %v4165_v9 }
 0x457   : > { %v6743_v30 = vsub.f32 %v6661_v24, %v4216_v13  ;;  %v6746_v22 = vsub.f32 %v6663_v18, %v4217_v58  ;;  %5176 = vpow2.f32 %v4167_v33  ;;  %v4173_v48 = vmul.f32 1.442695, %v4161_v43 }
 0x458   : > { %v4253_v6 = vrot.slane %v4252_v55, 4  ;;  %v4175_v42 = vmul.f32 1.442695, %v4162_v19  ;;  %v6755_v38 = vsub.f32 %v6667_v2, %v4218_v29  ;;  %5178 = vpow2.f32 %v4169_v7 }
 0x459   : > { %v4177_v36 = vmul.f32 1.442695, %v4163_v46  ;;  %5180 = vpow2.f32 %v4171_v3  ;;  %v6768_v50 = vsub.f32 %v6669_v0, %v4219_v10  ;;  %v6771_v46 = vsub.f32 %v6671_v47, %v4220_v25 }
 0x45a   : > { %v4254_v5 = vmin.f32 %v4252_v55, %v4253_v6  ;;  %5182 = vpow2.f32 %v4173_v48  ;;  %v6774_v12 = vsub.f32 %v6675_v17, %v4221_v34  ;;  %v4179_v55 = vmul.f32 1.442695, %v4164_v60 }
 0x45b   : > { %5184 = vpow2.f32 %v4175_v42 }
 0x45c   : > { %v4255_v26 = vrot.slane %v4254_v5, 2  ;;  %5186 = vpow2.f32 %v4177_v36 }
 0x45d   : > { %5188 = vpow2.f32 %v4179_v55 }
 0x45e   : > { %v4256_v49 = vmin.f32 %v4254_v5, %v4255_v26 }
 0x460   : > { %v4257_v4 = vrot.slane %v4256_v49, 1  ;;  %v5175_v56 = vpop.eup %5174 }
 0x462   : > { %v4258_v41 = vmin.f32 %v4256_v49, %v4257_v4  ;;  %v5177_v4 = vpop.eup %5176 }
 0x463   : > { %v5179_v13 = vpop.eup %5178 }
 0x464   : > { %v4259_v62 = vmul.f32 0.125, %v4258_v41  ;;  %v5181_v33 = vpop.eup %5180 }
 0x465   : > { %v5183_v25 = vpop.eup %5182 }
 0x466   : > { %v4260_v8 = vfloor.f32 %v4259_v62  ;;  %v5185_v3 = vpop.eup %5184 }
 0x467   : > { %v5187_v48 = vpop.eup %5186 }
 0x468   : > { %v4261_v24 = vmul.f32 8.0, %v4260_v8  ;;  %v4263_v18 = vsub.f32 %v6703_v11, %v4260_v8  ;;  %v4264_v39 = vsub.f32 %v6705_v20, %v4260_v8  ;;  %v4265_v35 = vsub.f32 %v6707_v61, %v4260_v8 }
 0x469   : > { %v4266_v43 = vsub.f32 %v6709_v14, %v4260_v8  ;;  %v4267_v19 = vsub.f32 %v6711_v16, %v4260_v8  ;;  %v4268_v2 = vsub.f32 %v6713_v32, %v4260_v8  ;;  %v4269_v40 = vsub.f32 %v6715_v23, %v4260_v8 }
 0x46a   : > { %v4262_v44 = vsub.f32 %v4258_v41, %v4261_v24  ;;  %v4271_v6 = vand.u32 2147483647, %v4263_v18  ;;  %v4272_v59 = vand.u32 2147483647, %v4264_v39  ;;  %v4273_v52 = vand.u32 2147483647, %v4265_v35 }
 0x46b   : > { %v4274_v37 = vand.u32 2147483647, %v4266_v43  ;;  %v4270_v0 = vsub.f32 %v6717_v57, %v4260_v8  ;;  %v4275_v5 = vand.u32 2147483647, %v4267_v19  ;;  %v4276_v47 = vand.u32 2147483647, %v4268_v2  ;;  %v5189_v2 = vpop.eup %5188 }
 0x46c   : > { %v4287_v51 = vsub.f32 %v6737_v15, %v4262_v44  ;;  %v4277_v54 = vand.u32 2147483647, %v4269_v40  ;;  %v4288_v17 = vsub.f32 %v6740_v21, %v4262_v44  ;;  %v4289_v28 = vsub.f32 %v6743_v30, %v4262_v44 }
 0x46d   : > { %v4290_v63 = vsub.f32 %v6746_v22, %v4262_v44  ;;  %v4291_v53 = vsub.f32 %v6755_v38, %v4262_v44  ;;  %v4292_v60 = vsub.f32 %v6768_v50, %v4262_v44  ;;  %v4293_v26 = vsub.f32 %v6771_v46, %v4262_v44 }
 0x46e   : > { %v4294_v45 = vsub.f32 %v6774_v12, %v4262_v44  ;;  %v4295_v49 = vand.u32 2147483647, %v4287_v51  ;;  %v4296_v31 = vand.u32 2147483647, %v4288_v17  ;;  %v4297_v1 = vand.u32 2147483647, %v4289_v28 }
 0x46f   : > { %v4298_v9 = vand.u32 2147483647, %v4290_v63  ;;  %vm4279_vm10 = vcmp.le.f32.partialorder %v4271_v6, 4.0  ;;  %v4299_v58 = vand.u32 2147483647, %v4291_v53  ;;  %vm4280_vm14 = vcmp.le.f32.partialorder %v4272_v59, 4.0 }
 0x470   : > { %v4300_v41 = vand.u32 2147483647, %v4292_v60  ;;  %v4301_v29 = vand.u32 2147483647, %v4293_v26  ;;  %vm4303_vm11 = vcmp.le.f32.partialorder %v4295_v49, 4.0  ;;  %vm4304_vm12 = vcmp.le.f32.partialorder %v4296_v31, 4.0 }
 0x471   : > { %vm4305_vm13 = vcmp.le.f32.partialorder %v4297_v1, 4.0  ;;  %v4278_v7 = vand.u32 2147483647, %v4270_v0  ;;  %v4302_v10 = vand.u32 2147483647, %v4294_v45  ;;  %vm4306_vm15 = vcmp.le.f32.partialorder %v4298_v9, 4.0  ;;  %vm4311_vm0 = vmand %vm4279_vm10, %vm4303_vm11 }
 0x472   : > { %vm4281_vm1 = vcmp.le.f32.partialorder %v4273_v52, 4.0  ;;  %vm4282_vm2 = vcmp.le.f32.partialorder %v4274_v37, 4.0  ;;  %vm4307_vm3 = vcmp.le.f32.partialorder %v4299_v58, 4.0  ;;  %vm4312_vm4 = vmand %vm4280_vm14, %vm4304_vm12  ;;  %v4319_v62 = vsel %vm4311_vm0, %v5175_v56, 0.0 }
 0x473   : > { %vm4283_vm5 = vcmp.le.f32.partialorder %v4275_v5, 4.0  ;;  %vm4308_vm6 = vcmp.le.f32.partialorder %v4300_v41, 4.0  ;;  %vm4313_vm7 = vmand %vm4281_vm1, %vm4305_vm13  ;;  %v4320_v34 = vsel %vm4312_vm4, %v5177_v4, 0.0  ;;  %v4341_v8 = vmul.f32 %v4319_v62, %v6737_v15 }
 0x474   : > { %vm4309_vm8 = vcmp.le.f32.partialorder %v4301_v29, 4.0  ;;  %vm4314_vm9 = vmand %vm4282_vm2, %vm4306_vm15  ;;  %v4321_v42 = vsel %vm4313_vm7, %v5179_v13, 0.0  ;;  %v4327_v36 = vadd.f32 %v4320_v34, %v4319_v62  ;;  %v4342_v24 = vmul.f32 %v4320_v34, %v6740_v21 }
 0x475   : > { %vm4284_vm10 = vcmp.le.f32.partialorder %v4276_v47, 4.0  ;;  %vm4285_vm11 = vcmp.le.f32.partialorder %v4277_v54, 4.0  ;;  %vm4310_vm12 = vcmp.le.f32.partialorder %v4302_v10, 4.0  ;;  %vm4315_vm14 = vmand %vm4283_vm5, %vm4307_vm3  ;;  %v4322_v18 = vsel %vm4314_vm9, %v5181_v33, 0.0 }
 0x476   : > { %vm4316_vm0 = vmand %vm4284_vm10, %vm4308_vm6  ;;  %v4323_v39 = vsel %vm4315_vm14, %v5183_v25, 0.0  ;;  %v4328_v35 = vadd.f32 %v4327_v36, %v4321_v42  ;;  %v4343_v15 = vmul.f32 %v4321_v42, %v6743_v30  ;;  %v4349_v43 = vadd.f32 %v4342_v24, %v4341_v8 }
 0x477   : > { %vm4286_vm13 = vcmp.le.f32.partialorder %v4278_v7, 4.0  ;;  %vm4317_vm15 = vmand %vm4285_vm11, %vm4309_vm8  ;;  %v4324_v44 = vsel %vm4316_vm0, %v5185_v3, 0.0  ;;  %v4364_v19 = vmul.f32 %v4319_v62, %v6703_v11  ;;  %v4365_v21 = vmul.f32 %v4320_v34, %v6705_v20 }
 0x478   : > { %vm4318_vm1 = vmand %vm4286_vm13, %vm4310_vm12  ;;  %v4325_v40 = vsel %vm4317_vm15, %v5187_v48, 0.0  ;;  %v4329_v55 = vadd.f32 %v4328_v35, %v4322_v18  ;;  %v4344_v6 = vmul.f32 %v4322_v18, %v6746_v22  ;;  %v4350_v51 = vadd.f32 %v4349_v43, %v4343_v15  ;;  %v4021_v35 = vpop.permute.xlu0 %4020 }
 0x479   : > { %v4326_v59 = vsel %vm4318_vm1, %v5189_v2, 0.0  ;;  %v4345_v30 = vmul.f32 %v4323_v39, %v6755_v38  ;;  %v4366_v0 = vmul.f32 %v4321_v42, %v6707_v61  ;;  %v4372_v5 = vadd.f32 %v4365_v21, %v4364_v19 }
 0x47a   : > { %v4330_v52 = vadd.f32 %v4329_v55, %v4323_v39  ;;  %v4351_v37 = vadd.f32 %v4350_v51, %v4344_v6  ;;  %v4346_v11 = vmul.f32 %v4324_v44, %v6768_v50  ;;  %v4367_v20 = vmul.f32 %v4322_v18, %v6709_v14 }
 0x47b   : > { %v4373_v17 = vadd.f32 %v4372_v5, %v4366_v0  ;;  %v4347_v63 = vmul.f32 %v4325_v40, %v6771_v46  ;;  %v4368_v53 = vmul.f32 %v4323_v39, %v6711_v16  ;;  %v4348_v38 = vmul.f32 %v4326_v59, %v6774_v12  ;;  %v4026_v39 = vpop.permute.xlu1 %4025 }
 0x47c   : > { %v4331_v47 = vadd.f32 %v4330_v52, %v4324_v44  ;;  %v4352_v54 = vadd.f32 %v4351_v37, %v4345_v30  ;;  %v4369_v61 = vmul.f32 %v4324_v44, %v6713_v32  ;;  %v4370_v4 = vmul.f32 %v4325_v40, %v6715_v23  ;;  %v4117_v55 = vpop.permute.xlu0 %4116 }
 0x47d   : > { %v4374_v56 = vadd.f32 %v4373_v17, %v4367_v20  ;;  %v4371_v46 = vmul.f32 %v4326_v59, %v6717_v57  ;;  %vm4386_vm2 = vcmp.eq.s32.totalorder %v6627_v27, 2  ;;  %vm4388_vm3 = vcmp.eq.s32.totalorder %v6627_v27, 1 }
 0x47e   : > { %v4332_v28 = vadd.f32 %v4331_v47, %v4325_v40  ;;  %v4353_v22 = vadd.f32 %v4352_v54, %v4346_v11  ;;  %v4141_v0 = vsub.s32 0, %v6627_v27  ;;  %vm4390_vm4 = vcmp.eq.s32.totalorder %v6627_v27, 0 }
 0x47f   : > { %v4375_v45 = vadd.f32 %v4374_v56, %v4368_v53  ;;  %v4122_v2 = vpop.permute.xlu1 %4121 }
 0x480   : > { %v4333_v60 = vadd.f32 %v4332_v28, %v4326_v59  ;;  %v4354_v26 = vadd.f32 %v4353_v22, %v4347_v63  ;;  %v4137_v47 = vpop.permute.xlu0 %4136 }
 0x481   : > { %v4376_v14 = vadd.f32 %v4375_v45, %v4369_v61  ;;  %v4142_v54 = vrot.slane %v4137_v47, %v4141_v0 }
 0x482   : > { %v4334_v49 = vrot.slane %v4333_v60, 4  ;;  %v4355_v50 = vadd.f32 %v4354_v26, %v4348_v38 }
 0x483   : > { %v4377_v9 = vadd.f32 %v4376_v14, %v4370_v4 }
 0x484   : > { %v4335_v31 = vadd.f32 %v4334_v49, %v4333_v60  ;;  %v4356_v1 = vrot.slane %v4355_v50, 4 }
 0x485   : > { %v4378_v16 = vadd.f32 %v4377_v9, %v4371_v46 }
 0x486   : > { %v4336_v13 = vrot.slane %v4335_v31, 2  ;;  %v4357_v41 = vadd.f32 %v4356_v1, %v4355_v50 }
 0x487   : > { %v4379_v33 = vrot.slane %v4378_v16, 4 }
 0x488   : > { %v4337_v58 = vadd.f32 %v4336_v13, %v4335_v31  ;;  %v4358_v32 = vrot.slane %v4357_v41, 2 }
 0x489   : > { %v4380_v29 = vadd.f32 %v4379_v33, %v4378_v16 }
 0x48a   : > { %v4338_v12 = vrot.slane %v4337_v58, 1  ;;  %v4359_v25 = vadd.f32 %v4358_v32, %v4357_v41 }
 0x48b   : > { %v4381_v10 = vrot.slane %v4380_v29, 2 }
 0x48c   : > { %v4339_v7 = vadd.f32 %v4338_v12, %v4337_v58  ;;  %v4360_v23 = vrot.slane %v4359_v25, 1 }
 0x48d   : > { %v4382_v62 = vadd.f32 %v4381_v10, %v4380_v29 }
 0x48e   : > { %5190 = vrcp.f32 %v4339_v7  ;;  %v4361_v8 = vadd.f32 %v4360_v23, %v4359_v25 }
 0x48f   : > { %v4383_v3 = vrot.slane %v4382_v62, 1 }
 0x491   : > { %v4384_v57 = vadd.f32 %v4383_v3, %v4382_v62 }
 0x498   : > { %v5191_v34 = vpop.eup %5190 }
 0x499   : > { %v4362_v48 = vmul.f32 4.0, %v5191_v34 }
 0x49b   : > { %v4363_v42 = vmul.f32 %v4362_v48, %v4361_v8  ;;  %v4385_v36 = vmul.f32 %v4384_v57, %v4362_v48 }
 0x49d   : > { %v4387_v24 = vsel %vm4386_vm2, %v4385_v36, 0.0 }
 0x49e   : > { %v4389_v18 = vsel %vm4388_vm3, %v4363_v42, %v4387_v24 }
 0x4f9   : > { %v4995_v15 = vpop.f32.mrb[248].mxu0 }
 0x4fa   : > { %v4107_v43 = vadd.f32 %v4995_v15, %v4026_v39  ;;  %v4101_v44 = vpop.f32.mrb[249].mxu0 }
 0x4fb   : > { %v4102_v19 = vadd.f32 %v4101_v44, %v4021_v35 }
 0x4fc   : > { %v4111_v21 = vmax.f32 %v4107_v43, 0.0 }
 0x4fd   : > { %v4110_v40 = vmax.f32 %v4102_v19, 0.0 }
 0x4fe   : > { %v4125_v6 = vmul.f32 %v4122_v2, %v4111_v21 }
 0x4ff   : > { %v4124_v51 = vmul.f32 %v4117_v55, %v4110_v40 }
 0x501   : > { %v4126_v59 = vadd.f32 %v4125_v6, %v4124_v51 }
 0x503   : > { %v4127_v52 = vrot.slane %v4126_v59, 4 }
 0x505   : > { %v4128_v30 = vadd.f32 %v4127_v52, %v4126_v59 }
 0x507   : > { %v4129_v37 = vrot.slane %v4128_v30, 2 }
 0x509   : > { %v4130_v5 = vadd.f32 %v4129_v37, %v4128_v30 }
 0x50b   : > { %v4131_v11 = vrot.slane %v4130_v5, 1 }
 0x50d   : > { %v4132_v20 = vadd.f32 %v4131_v11, %v4130_v5 }
 0x50f   : > { %v4143_v17 = vadd.f32 %v4142_v54, %v4132_v20 }
 0x511   : > { %v4391_v28 = vsel %vm4390_vm4, %v4143_v17, %v4389_v18 }
 0x512   : > { %4392 = vst [vmem:[%s382_s15] sm:$0xff] %v4391_v28 }
 0x513 PF: > { %p17_p9 = scmp.ge.s32.totalorder %s5282_s10, 4   ;;  %s6845_s29 = smov %s5210_s30 }
 0x514   : > { %s6846_s30 = smov %s5291_s13  ;;  %s6847_s9 = smov %s5282_s10 }
 0x515   :  { %19 = sbr.rel (!%p17_p9) target bundleno = 5 (0x5), region = 128 }

</bundles_post_ra>
